<compile_context>
chip_gen: v7x
topology: tpu7x:2x2x1
jax: 0.10.0
libtpu: 0.0.40
codegen_flags: <defaults>
</compile_context>

<pallas_src>
import math
import functools

import jax
import jax.numpy as jnp
from jax.experimental import pallas as pl
from jax.experimental.pallas import tpu as pltpu


# lax.dot_general dimension numbers.
NN = (((1,), (0,)), ((), ()))   # a @ b
TN = (((0,), (0,)), ((), ()))   # a.T @ b


# --------------------------- pass 1: KV statistics ---------------------------
def _kv_stats_kernel(k_ref, v_ref, projt_ref, ctx_ref, ksum_ref,
                     m_sc, vsum_sc, *, eps, n_total):
    ki = pl.program_id(1)
    nk = pl.num_programs(1)

    d = k_ref.shape[-1]
    m_feat = projt_ref.shape[-1]
    ratio = float(m_feat) ** -0.5            # nb_features ** -0.5
    diag_scale = 0.5 / math.sqrt(float(d))   # 0.5 * (d**-0.25)**2

    @pl.when(ki == 0)
    def _():
        m_sc[...] = jnp.full(m_sc.shape, -jnp.inf, m_sc.dtype)
        vsum_sc[...] = jnp.zeros(vsum_sc.shape, vsum_sc.dtype)
        ctx_ref[0] = jnp.zeros(ctx_ref.shape[1:], ctx_ref.dtype)
        ksum_ref[0] = jnp.zeros(ksum_ref.shape[1:], ksum_ref.dtype)

    k = k_ref[0]                                                     # (TKV, D)
    v = v_ref[0]                                                     # (TKV, E)
    k_f32 = k.astype(jnp.float32)

    # Feature-map dot: MXU in the input dtype, f32 accumulation.
    # Projection is already scaled by d**-0.25 and transposed to (D, M).
    k_dash = jax.lax.dot_general(k, projt_ref[...], NN,
                                 preferred_element_type=jnp.float32)  # (TKV, M)
    diag = jnp.sum(k_f32 * k_f32, axis=-1, keepdims=True) * diag_scale  # (TKV, 1)

    # is_query=False -> global max over (N, M) per head; flash-style online max.
    chunk_max = jnp.max(jnp.max(k_dash, axis=-1, keepdims=True),
                        axis=0, keepdims=True)                        # (1, 1)
    m_old = m_sc[...]
    m_new = jnp.maximum(m_old, chunk_max)
    alpha = jnp.exp(m_old - m_new)                                    # (1, 1)

    p = jnp.exp(k_dash - diag - m_new)                                # (TKV, M) f32
    # k'^T @ v accumulation (f32), MXU operands in v's dtype.
    ctx_ref[0] = alpha * ctx_ref[0] + jax.lax.dot_general(
        p.astype(v.dtype), v, TN, preferred_element_type=jnp.float32)  # (M, E)
    ksum_ref[0] = alpha * ksum_ref[0] + jnp.sum(p, axis=0, keepdims=True)  # (1, M)
    vsum_sc[...] = vsum_sc[...] + jnp.sum(v.astype(jnp.float32),
                                          axis=0, keepdims=True)      # (1, E)
    m_sc[...] = m_new

    @pl.when(ki == nk - 1)
    def _():
        # k' = ratio * (exp(k_dash - diag - kmax) + eps); fold the eps terms in.
        ctx_ref[0] = (ratio * (ctx_ref[0] + eps * vsum_sc[...])).astype(ctx_ref.dtype)
        ksum_ref[0] = (ratio * (ksum_ref[0] + eps * float(n_total))).astype(ksum_ref.dtype)


# --------------------------- pass 2: query pass -------------------------------
def _q_pass_kernel(q_ref, projt_ref, ctx_ref, ksum_ref, o_ref, *, eps):
    d = q_ref.shape[-1]
    m_feat = projt_ref.shape[-1]
    ratio = float(m_feat) ** -0.5
    diag_scale = 0.5 / math.sqrt(float(d))

    q = q_ref[0]                                                      # (TQ, D)
    q_f32 = q.astype(jnp.float32)
    q_dash = jax.lax.dot_general(q, projt_ref[...], NN,
                                 preferred_element_type=jnp.float32)  # (TQ, M)
    diag = jnp.sum(q_f32 * q_f32, axis=-1, keepdims=True) * diag_scale
    q_max = jnp.max(q_dash, axis=-1, keepdims=True)                   # per-row max
    q_prime = ratio * (jnp.exp(q_dash - diag - q_max) + eps)          # (TQ, M) f32

    ksum = ksum_ref[0]                                                # (1, M) f32
    denom = jnp.sum(q_prime * ksum, axis=-1, keepdims=True)           # (TQ, 1) f32

    cdt = o_ref.dtype   # native MXU dtype when inputs are bf16
    num = jax.lax.dot_general(q_prime.astype(cdt), ctx_ref[0].astype(cdt), NN,
                              preferred_element_type=jnp.float32)     # (TQ, E)
    o_ref[0] = (num * pl.reciprocal(denom, approx=True)).astype(o_ref.dtype)


def _vmem_limit(estimate_bytes):
    # Generous headroom over the estimate; clamp inside [32 MiB, 56 MiB] which is
    # above the default scoped limits and safely under v7x's 64 MiB physical VMEM.
    return int(min(max(2 * estimate_bytes + (8 << 20), 32 << 20), 56 << 20))


def fast_attention(q, k, v, projection_matrix, *, q_tile=256, kv_tile=512, eps=1e-4):
    """Pallas equivalent of FastAttention(dim_heads)(q, k, v), non-causal path."""
    # TODO(synk): causal=True path (CausalDotProduct prefix-sum) not implemented.
    # TODO(synk): generalized_attention / no_projection branches not implemented.
    B, H, N, D = q.shape
    E = v.shape[-1]
    M = projection_matrix.shape[0]
    BH = B * H

    tq = min(q_tile, N)
    tkv = min(kv_tile, N)
    if N % tq != 0 or N % tkv != 0:
        raise ValueError(f"sequence length {N} must be divisible by q_tile {tq} "
                         f"and kv_tile {tkv}")
    nq = N // tq
    nkv = N // tkv

    # Pre-scale (d**-0.25) and pre-transpose the projection once, in the wrapper.
    normalizer = float(D) ** -0.25
    proj_t = (projection_matrix.astype(jnp.float32) * normalizer).T.astype(q.dtype)

    q2 = q.reshape(BH, N, D)
    k2 = k.reshape(BH, N, D)
    v2 = v.reshape(BH, N, E)

    isz = jnp.dtype(q.dtype).itemsize
    vmem_a = _vmem_limit(2 * (tkv * (D + E) + D * M) * isz
                         + 2 * (M * E + M) * 4 + 3 * tkv * M * 4)
    vmem_b = _vmem_limit(2 * (tq * D + D * M + tq * E) * isz
                         + 2 * (M * E + M) * 4 + 3 * tq * M * 4)

    # ---- pass 1: per-head ctx (M, E) and ksum (1, M), streamed over KV chunks.
    ctx, ksum = pl.pallas_call(
        functools.partial(_kv_stats_kernel, eps=eps, n_total=N),
        out_shape=(jax.ShapeDtypeStruct((BH, M, E), jnp.float32),
                   jax.ShapeDtypeStruct((BH, 1, M), jnp.float32)),
        grid_spec=pltpu.PrefetchScalarGridSpec(
            num_scalar_prefetch=0,
            grid=(BH, nkv),
            in_specs=[
                pl.BlockSpec((1, tkv, D), lambda bh, ki: (bh, ki, 0)),  # K chunk
                pl.BlockSpec((1, tkv, E), lambda bh, ki: (bh, ki, 0)),  # V chunk
                pl.BlockSpec((D, M), lambda bh, ki: (0, 0)),            # proj^T
            ],
            out_specs=(
                pl.BlockSpec((1, M, E), lambda bh, ki: (bh, 0, 0)),     # ctx
                pl.BlockSpec((1, 1, M), lambda bh, ki: (bh, 0, 0)),     # ksum
            ),
            scratch_shapes=[
                pltpu.VMEM((1, 1), jnp.float32),   # running global max
                pltpu.VMEM((1, E), jnp.float32),   # sum_n v (for the eps term)
            ],
        ),
        compiler_params=pltpu.CompilerParams(
            dimension_semantics=("parallel", "arbitrary"),
            vmem_limit_bytes=vmem_a,
        ),
    )(k2, v2, proj_t)

    # ---- pass 2: q feature map + normalization; fully parallel grid.
    out = pl.pallas_call(
        functools.partial(_q_pass_kernel, eps=eps),
        out_shape=jax.ShapeDtypeStruct((BH, N, E), q.dtype),
        grid_spec=pltpu.PrefetchScalarGridSpec(
            num_scalar_prefetch=0,
            grid=(BH, nq),
            in_specs=[
                pl.BlockSpec((1, tq, D), lambda bh, qi: (bh, qi, 0)),   # Q tile
                pl.BlockSpec((D, M), lambda bh, qi: (0, 0)),            # proj^T
                pl.BlockSpec((1, M, E), lambda bh, qi: (bh, 0, 0)),     # ctx
                pl.BlockSpec((1, 1, M), lambda bh, qi: (bh, 0, 0)),     # ksum
            ],
            out_specs=pl.BlockSpec((1, tq, E), lambda bh, qi: (bh, qi, 0)),
        ),
        compiler_params=pltpu.CompilerParams(
            dimension_semantics=("parallel", "parallel"),
            vmem_limit_bytes=vmem_b,
        ),
    )(q2, proj_t, ctx, ksum)

    return out.reshape(B, H, N, E)


# --------- module-__init__ equivalent (projection buffer), plain JAX ---------
def _orthogonal_matrix_chunk(key, cols):
    block = jax.random.normal(key, (cols, cols), dtype=jnp.float32)
    q_mat, _ = jnp.linalg.qr(block)
    return q_mat.T


def gaussian_orthogonal_random_matrix(key, nb_rows, nb_columns, scaling=0):
    nb_full_blocks = nb_rows // nb_columns
    keys = jax.random.split(key, nb_full_blocks + 2)
    blocks = [_orthogonal_matrix_chunk(keys[i], nb_columns)
              for i in range(nb_full_blocks)]
    remaining = nb_rows - nb_full_blocks * nb_columns
    if remaining > 0:
        blocks.append(_orthogonal_matrix_chunk(keys[nb_full_blocks],
                                               nb_columns)[:remaining])
    final = jnp.concatenate(blocks, axis=0)
    if scaling == 0:
        multiplier = jnp.linalg.norm(
            jax.random.normal(keys[-1], (nb_rows, nb_columns), jnp.float32), axis=1)
    elif scaling == 1:
        multiplier = math.sqrt(float(nb_columns)) * jnp.ones((nb_rows,), jnp.float32)
    else:
        raise ValueError(f"Invalid scaling {scaling}")
    return multiplier[:, None] * final


# --------------------------- pure-JAX reference ------------------------------
def fast_attention_reference(q, k, v, proj, eps=1e-4):
    hp = jax.lax.Precision.HIGHEST
    d = q.shape[-1]
    m = proj.shape[0]
    normalizer = float(d) ** -0.25
    ratio = float(m) ** -0.5

    def feature_map(x, is_query):
        x_dash = jnp.einsum('bhnd,md->bhnm', normalizer * x, proj, precision=hp)
        diag = jnp.sum(x * x, axis=-1, keepdims=True) * 0.5 * normalizer ** 2
        if is_query:
            mx = jnp.max(x_dash, axis=-1, keepdims=True)
        else:
            mx = jnp.max(x_dash, axis=(-1, -2), keepdims=True)
        return ratio * (jnp.exp(x_dash - diag - mx) + eps)

    qp = feature_map(q, True)
    kp = feature_map(k, False)
    k_sum = jnp.sum(kp, axis=-2)
    d_inv = 1.0 / jnp.einsum('bhnm,bhm->bhn', qp, k_sum, precision=hp)
    context = jnp.einsum('bhnm,bhne->bhme', kp, v, precision=hp)
    return jnp.einsum('bhnm,bhme->bhne', qp, context, precision=hp) * d_inv[..., None]


if __name__ == "__main__":
    key = jax.random.PRNGKey(0)
    kq, kk, kv, kp = jax.random.split(key, 4)

    # Small deterministic shapes: batch=2, heads=4, seq=256, dim_heads=128.
    B, H, N, D = 2, 4, 256, 128
    M = 256  # nb_features, multiple of 128 (MXU/lane friendly)

    q = jax.random.normal(kq, (B, H, N, D), dtype=jnp.float32)
    k = jax.random.normal(kk, (B, H, N, D), dtype=jnp.float32)
    v = jax.random.normal(kv, (B, H, N, D), dtype=jnp.float32)
    projection_matrix = gaussian_orthogonal_random_matrix(kp, M, D, scaling=0)

    # Tiles chosen < N so the test exercises both the multi-chunk online-max KV
    # accumulation (nkv=2) and multiple q tiles (nq=2).
    run = jax.jit(functools.partial(fast_attention, q_tile=128, kv_tile=128))
    out = jax.block_until_ready(run(q, k, v, projection_matrix))
    ref = jax.block_until_ready(fast_attention_reference(q, k, v, projection_matrix))

    assert out.shape == (B, H, N, D), out.shape
    assert bool(jnp.allclose(out, ref, rtol=2e-2, atol=2e-2)), (
        f"max abs err {float(jnp.max(jnp.abs(out - ref)))}")

    print("KERNEL_OK")
</pallas_src>

<mosaic_0001>
module attributes {stable_mosaic.version = 11 : i64} {
  func.func @_kv_stats_kernel(%arg0: i32, %arg1: i32, %arg2: memref<1x128x128xf32, #tpu.memory_space<vmem>>, %arg3: memref<1x128x128xf32, #tpu.memory_space<vmem>>, %arg4: memref<128x256xf32, #tpu.memory_space<vmem>>, %arg5: memref<1x256x128xf32, #tpu.memory_space<vmem>>, %arg6: memref<1x1x256xf32, #tpu.memory_space<vmem>>, %arg7: memref<1x1xf32, #tpu.memory_space<vmem>>, %arg8: memref<1x128xf32, #tpu.memory_space<vmem>>) attributes {dimension_semantics = [#tpu.dimension_semantics<parallel>, #tpu.dimension_semantics<arbitrary>], iteration_bounds = array<i64: 8, 2>, scalar_prefetch = 0 : i64, scratch_operands = 2 : i64, tpu.core_type = #tpu.core_type<tc>, window_params = [{transform_indices = @transform_0, window_bounds = array<i64: 1, 128, 128>}, {transform_indices = @transform_1, window_bounds = array<i64: 1, 128, 128>}, {pipeline_mode = #tpu.pipeline_mode<synchronous>, transform_indices = @transform_2, window_bounds = array<i64: 128, 256>}, {transform_indices = @transform_3, window_bounds = array<i64: 1, 256, 128>}, {transform_indices = @transform_4, window_bounds = array<i64: 1, 1, 256>}]} {
    %c0_i32 = arith.constant 0 : i32
    %0 = arith.cmpi eq, %arg1, %c0_i32 : i32
    %1 = arith.extui %0 : i1 to i32
    %c0_i32_0 = arith.constant 0 : i32
    %2 = arith.cmpi ne, %1, %c0_i32_0 : i32
    scf.if %2 {
      %cst_36 = arith.constant 0xFF800000 : f32
      %55 = vector.broadcast %cst_36 : f32 to vector<1x1xf32>
      %c0_37 = arith.constant 0 : index
      %c0_38 = arith.constant 0 : index
      %56 = vector.load %arg7[%c0_37, %c0_38] : memref<1x1xf32, #tpu.memory_space<vmem>>, vector<1x1xf32>
      tpu.vector_store %arg7[%c0_37, %c0_38], %55 {strides = array<i32>} : memref<1x1xf32, #tpu.memory_space<vmem>>, vector<1x1xf32>,
      %cst_39 = arith.constant 0.000000e+00 : f32
      %57 = vector.broadcast %cst_39 : f32 to vector<1x128xf32>
      %c0_40 = arith.constant 0 : index
      %c0_41 = arith.constant 0 : index
      %58 = vector.load %arg8[%c0_40, %c0_41] : memref<1x128xf32, #tpu.memory_space<vmem>>, vector<1x128xf32>
      tpu.vector_store %arg8[%c0_40, %c0_41], %57 {strides = array<i32>} : memref<1x128xf32, #tpu.memory_space<vmem>>, vector<1x128xf32>,
      %cst_42 = arith.constant 0.000000e+00 : f32
      %59 = vector.broadcast %cst_42 : f32 to vector<256x128xf32>
      %c0_43 = arith.constant 0 : index
      %c0_44 = arith.constant 0 : index
      %c0_45 = arith.constant 0 : index
      %60 = vector.load %arg5[%c0_43, %c0_44, %c0_45] : memref<1x256x128xf32, #tpu.memory_space<vmem>>, vector<1x256x128xf32>
      %61 = vector.shape_cast %60 : vector<1x256x128xf32> to vector<256x128xf32>
      %62 = vector.shape_cast %59 : vector<256x128xf32> to vector<1x256x128xf32>
      tpu.vector_store %arg5[%c0_43, %c0_44, %c0_45], %62 {strides = array<i32>} : memref<1x256x128xf32, #tpu.memory_space<vmem>>, vector<1x256x128xf32>,
      %cst_46 = arith.constant 0.000000e+00 : f32
      %63 = vector.broadcast %cst_46 : f32 to vector<1x256xf32>
      %c0_47 = arith.constant 0 : index
      %c0_48 = arith.constant 0 : index
      %c0_49 = arith.constant 0 : index
      %64 = vector.load %arg6[%c0_47, %c0_48, %c0_49] : memref<1x1x256xf32, #tpu.memory_space<vmem>>, vector<1x1x256xf32>
      %65 = vector.shape_cast %64 : vector<1x1x256xf32> to vector<1x256xf32>
      %66 = vector.shape_cast %63 : vector<1x256xf32> to vector<1x1x256xf32>
      tpu.vector_store %arg6[%c0_47, %c0_48, %c0_49], %66 {strides = array<i32>} : memref<1x1x256xf32, #tpu.memory_space<vmem>>, vector<1x1x256xf32>,
    } else {
    }
    %c0 = arith.constant 0 : index
    %c0_1 = arith.constant 0 : index
    %c0_2 = arith.constant 0 : index
    %3 = vector.load %arg2[%c0, %c0_1, %c0_2] : memref<1x128x128xf32, #tpu.memory_space<vmem>>, vector<1x128x128xf32>
    %4 = vector.shape_cast %3 : vector<1x128x128xf32> to vector<128x128xf32>
    %c0_3 = arith.constant 0 : index
    %c0_4 = arith.constant 0 : index
    %c0_5 = arith.constant 0 : index
    %5 = vector.load %arg3[%c0_3, %c0_4, %c0_5] : memref<1x128x128xf32, #tpu.memory_space<vmem>>, vector<1x128x128xf32>
    %6 = vector.shape_cast %5 : vector<1x128x128xf32> to vector<128x128xf32>
    %c0_6 = arith.constant 0 : index
    %c0_7 = arith.constant 0 : index
    %7 = vector.load %arg4[%c0_6, %c0_7] : memref<128x256xf32, #tpu.memory_space<vmem>>, vector<128x256xf32>
    %cst = arith.constant dense<0.000000e+00> : vector<128x256xf32>
    %8 = tpu.matmul %4, %7, %cst {dimension_numbers = #tpu.dot_dimension_numbers<[1], [0], [0], [1], [0, 0, 1, 1], [], []>} : vector<128x128xf32>, vector<128x256xf32>, vector<128x256xf32> -> vector<128x256xf32>
    %9 = arith.mulf %4, %4 : vector<128x128xf32>
    %cst_8 = arith.constant dense<0.000000e+00> : vector<128xf32>
    %10 = vector.multi_reduction <add>, %9, %cst_8 [1] : vector<128x128xf32> to vector<128xf32>
    %11 = vector.shape_cast %10 : vector<128xf32> to vector<128x1xf32>
    %cst_9 = arith.constant 0.0441941731 : f32
    %12 = vector.broadcast %cst_9 : f32 to vector<128x1xf32>
    %13 = arith.mulf %11, %12 : vector<128x1xf32>
    %cst_10 = arith.constant dense<0xFF800000> : vector<128xf32>
    %14 = vector.multi_reduction <maximumf>, %8, %cst_10 [1] : vector<128x256xf32> to vector<128xf32>
    %15 = vector.shape_cast %14 : vector<128xf32> to vector<128x1xf32>
    %cst_11 = arith.constant dense<0xFF800000> : vector<1xf32>
    %16 = vector.multi_reduction <maximumf>, %15, %cst_11 [0] : vector<128x1xf32> to vector<1xf32>
    %17 = vector.shape_cast %16 : vector<1xf32> to vector<1x1xf32>
    %c0_12 = arith.constant 0 : index
    %c0_13 = arith.constant 0 : index
    %18 = vector.load %arg7[%c0_12, %c0_13] : memref<1x1xf32, #tpu.memory_space<vmem>>, vector<1x1xf32>
    %19 = arith.maximumf %18, %17 : vector<1x1xf32>
    %20 = arith.subf %18, %19 : vector<1x1xf32>
    %21 = math.exp %20 : vector<1x1xf32>
    %22 = vector.broadcast %13 : vector<128x1xf32> to vector<128x256xf32>
    %23 = arith.subf %8, %22 : vector<128x256xf32>
    %24 = vector.broadcast %19 : vector<1x1xf32> to vector<128x256xf32>
    %25 = arith.subf %23, %24 : vector<128x256xf32>
    %26 = math.exp %25 : vector<128x256xf32>
    %c0_14 = arith.constant 0 : index
    %c0_15 = arith.constant 0 : index
    %c0_16 = arith.constant 0 : index
    %27 = vector.load %arg5[%c0_14, %c0_15, %c0_16] : memref<1x256x128xf32, #tpu.memory_space<vmem>>, vector<1x256x128xf32>
    %28 = vector.shape_cast %27 : vector<1x256x128xf32> to vector<256x128xf32>
    %29 = vector.broadcast %21 : vector<1x1xf32> to vector<256x128xf32>
    %30 = arith.mulf %29, %28 : vector<256x128xf32>
    %cst_17 = arith.constant dense<0.000000e+00> : vector<256x128xf32>
    %31 = tpu.matmul %26, %6, %cst_17 {dimension_numbers = #tpu.dot_dimension_numbers<[0], [0], [1], [1], [0, 1, 1, 1], [], []>} : vector<128x256xf32>, vector<128x128xf32>, vector<256x128xf32> -> vector<256x128xf32>
    %32 = arith.addf %30, %31 : vector<256x128xf32>
    %c0_18 = arith.constant 0 : index
    %c0_19 = arith.constant 0 : index
    %c0_20 = arith.constant 0 : index
    %33 = vector.load %arg5[%c0_18, %c0_19, %c0_20] : memref<1x256x128xf32, #tpu.memory_space<vmem>>, vector<1x256x128xf32>
    %34 = vector.shape_cast %33 : vector<1x256x128xf32> to vector<256x128xf32>
    %35 = vector.shape_cast %32 : vector<256x128xf32> to vector<1x256x128xf32>
    tpu.vector_store %arg5[%c0_18, %c0_19, %c0_20], %35 {strides = array<i32>} : memref<1x256x128xf32, #tpu.memory_space<vmem>>, vector<1x256x128xf32>,
    %c0_21 = arith.constant 0 : index
    %c0_22 = arith.constant 0 : index
    %c0_23 = arith.constant 0 : index
    %36 = vector.load %arg6[%c0_21, %c0_22, %c0_23] : memref<1x1x256xf32, #tpu.memory_space<vmem>>, vector<1x1x256xf32>
    %37 = vector.shape_cast %36 : vector<1x1x256xf32> to vector<1x256xf32>
    %38 = vector.broadcast %21 : vector<1x1xf32> to vector<1x256xf32>
    %39 = arith.mulf %38, %37 : vector<1x256xf32>
    %cst_24 = arith.constant dense<0.000000e+00> : vector<256xf32>
    %40 = vector.multi_reduction <add>, %26, %cst_24 [0] : vector<128x256xf32> to vector<256xf32>
    %41 = vector.shape_cast %40 : vector<256xf32> to vector<1x256xf32>
    %42 = arith.addf %39, %41 : vector<1x256xf32>
    %c0_25 = arith.constant 0 : index
    %c0_26 = arith.constant 0 : index
    %c0_27 = arith.constant 0 : index
    %43 = vector.load %arg6[%c0_25, %c0_26, %c0_27] : memref<1x1x256xf32, #tpu.memory_space<vmem>>, vector<1x1x256xf32>
    %44 = vector.shape_cast %43 : vector<1x1x256xf32> to vector<1x256xf32>
    %45 = vector.shape_cast %42 : vector<1x256xf32> to vector<1x1x256xf32>
    tpu.vector_store %arg6[%c0_25, %c0_26, %c0_27], %45 {strides = array<i32>} : memref<1x1x256xf32, #tpu.memory_space<vmem>>, vector<1x1x256xf32>,
    %c0_28 = arith.constant 0 : index
    %c0_29 = arith.constant 0 : index
    %46 = vector.load %arg8[%c0_28, %c0_29] : memref<1x128xf32, #tpu.memory_space<vmem>>, vector<1x128xf32>
    %cst_30 = arith.constant dense<0.000000e+00> : vector<128xf32>
    %47 = vector.multi_reduction <add>, %6, %cst_30 [0] : vector<128x128xf32> to vector<128xf32>
    %48 = vector.shape_cast %47 : vector<128xf32> to vector<1x128xf32>
    %49 = arith.addf %46, %48 : vector<1x128xf32>
    %c0_31 = arith.constant 0 : index
    %c0_32 = arith.constant 0 : index
    %50 = vector.load %arg8[%c0_31, %c0_32] : memref<1x128xf32, #tpu.memory_space<vmem>>, vector<1x128xf32>
    tpu.vector_store %arg8[%c0_31, %c0_32], %49 {strides = array<i32>} : memref<1x128xf32, #tpu.memory_space<vmem>>, vector<1x128xf32>,
    %c0_33 = arith.constant 0 : index
    %c0_34 = arith.constant 0 : index
    %51 = vector.load %arg7[%c0_33, %c0_34] : memref<1x1xf32, #tpu.memory_space<vmem>>, vector<1x1xf32>
    tpu.vector_store %arg7[%c0_33, %c0_34], %19 {strides = array<i32>} : memref<1x1xf32, #tpu.memory_space<vmem>>, vector<1x1xf32>,
    %c1_i32 = arith.constant 1 : i32
    %52 = arith.cmpi eq, %arg1, %c1_i32 : i32
    %53 = arith.extui %52 : i1 to i32
    %c0_i32_35 = arith.constant 0 : i32
    %54 = arith.cmpi ne, %53, %c0_i32_35 : i32
    scf.if %54 {
      %c0_36 = arith.constant 0 : index
      %c0_37 = arith.constant 0 : index
      %c0_38 = arith.constant 0 : index
      %55 = vector.load %arg5[%c0_36, %c0_37, %c0_38] : memref<1x256x128xf32, #tpu.memory_space<vmem>>, vector<1x256x128xf32>
      %56 = vector.shape_cast %55 : vector<1x256x128xf32> to vector<256x128xf32>
      %c0_39 = arith.constant 0 : index
      %c0_40 = arith.constant 0 : index
      %57 = vector.load %arg8[%c0_39, %c0_40] : memref<1x128xf32, #tpu.memory_space<vmem>>, vector<1x128xf32>
      %cst_41 = arith.constant 9.99999974E-5 : f32
      %58 = vector.broadcast %cst_41 : f32 to vector<1x128xf32>
      %59 = arith.mulf %58, %57 : vector<1x128xf32>
      %60 = vector.broadcast %59 : vector<1x128xf32> to vector<256x128xf32>
      %61 = arith.addf %56, %60 : vector<256x128xf32>
      %cst_42 = arith.constant 6.250000e-02 : f32
      %62 = vector.broadcast %cst_42 : f32 to vector<256x128xf32>
      %63 = arith.mulf %62, %61 : vector<256x128xf32>
      %c0_43 = arith.constant 0 : index
      %c0_44 = arith.constant 0 : index
      %c0_45 = arith.constant 0 : index
      %64 = vector.load %arg5[%c0_43, %c0_44, %c0_45] : memref<1x256x128xf32, #tpu.memory_space<vmem>>, vector<1x256x128xf32>
      %65 = vector.shape_cast %64 : vector<1x256x128xf32> to vector<256x128xf32>
      %66 = vector.shape_cast %63 : vector<256x128xf32> to vector<1x256x128xf32>
      tpu.vector_store %arg5[%c0_43, %c0_44, %c0_45], %66 {strides = array<i32>} : memref<1x256x128xf32, #tpu.memory_space<vmem>>, vector<1x256x128xf32>,
      %c0_46 = arith.constant 0 : index
      %c0_47 = arith.constant 0 : index
      %c0_48 = arith.constant 0 : index
      %67 = vector.load %arg6[%c0_46, %c0_47, %c0_48] : memref<1x1x256xf32, #tpu.memory_space<vmem>>, vector<1x1x256xf32>
      %68 = vector.shape_cast %67 : vector<1x1x256xf32> to vector<1x256xf32>
      %cst_49 = arith.constant 2.560000e-02 : f32
      %69 = vector.broadcast %cst_49 : f32 to vector<1x256xf32>
      %70 = arith.addf %68, %69 : vector<1x256xf32>
      %cst_50 = arith.constant 6.250000e-02 : f32
      %71 = vector.broadcast %cst_50 : f32 to vector<1x256xf32>
      %72 = arith.mulf %71, %70 : vector<1x256xf32>
      %c0_51 = arith.constant 0 : index
      %c0_52 = arith.constant 0 : index
      %c0_53 = arith.constant 0 : index
      %73 = vector.load %arg6[%c0_51, %c0_52, %c0_53] : memref<1x1x256xf32, #tpu.memory_space<vmem>>, vector<1x1x256xf32>
      %74 = vector.shape_cast %73 : vector<1x1x256xf32> to vector<1x256xf32>
      %75 = vector.shape_cast %72 : vector<1x256xf32> to vector<1x1x256xf32>
      tpu.vector_store %arg6[%c0_51, %c0_52, %c0_53], %75 {strides = array<i32>} : memref<1x1x256xf32, #tpu.memory_space<vmem>>, vector<1x1x256xf32>,
    } else {
    }
    return
  }
  func.func @transform_0(%arg0: i32, %arg1: i32) -> (i32, i32, i32) {
    %c0_i32 = arith.constant 0 : i32
    %c0_i32_0 = arith.constant 0 : i32
    return %arg0, %arg1, %c0_i32 : i32, i32, i32
  }
  func.func @transform_1(%arg0: i32, %arg1: i32) -> (i32, i32, i32) {
    %c0_i32 = arith.constant 0 : i32
    %c0_i32_0 = arith.constant 0 : i32
    return %arg0, %arg1, %c0_i32 : i32, i32, i32
  }
  func.func @transform_2(%arg0: i32, %arg1: i32) -> (i32, i32) {
    %c0_i32 = arith.constant 0 : i32
    %c0_i32_0 = arith.constant 0 : i32
    %c0_i32_1 = arith.constant 0 : i32
    return %c0_i32, %c0_i32_0 : i32, i32
  }
  func.func @transform_3(%arg0: i32, %arg1: i32) -> (i32, i32, i32) {
    %c0_i32 = arith.constant 0 : i32
    %c0_i32_0 = arith.constant 0 : i32
    %c0_i32_1 = arith.constant 0 : i32
    return %arg0, %c0_i32, %c0_i32_0 : i32, i32, i32
  }
  func.func @transform_4(%arg0: i32, %arg1: i32) -> (i32, i32, i32) {
    %c0_i32 = arith.constant 0 : i32
    %c0_i32_0 = arith.constant 0 : i32
    %c0_i32_1 = arith.constant 0 : i32
    return %arg0, %c0_i32, %c0_i32_0 : i32, i32, i32
  }
}

module attributes {stable_mosaic.version = 11 : i64} {
  func.func @_q_pass_kernel(%arg0: i32, %arg1: i32, %arg2: memref<1x128x128xf32, #tpu.memory_space<vmem>>, %arg3: memref<128x256xf32, #tpu.memory_space<vmem>>, %arg4: memref<1x256x128xf32, #tpu.memory_space<vmem>>, %arg5: memref<1x1x256xf32, #tpu.memory_space<vmem>>, %arg6: memref<1x128x128xf32, #tpu.memory_space<vmem>>) attributes {dimension_semantics = [#tpu.dimension_semantics<parallel>, #tpu.dimension_semantics<parallel>], iteration_bounds = array<i64: 8, 2>, scalar_prefetch = 0 : i64, scratch_operands = 0 : i64, tpu.core_type = #tpu.core_type<tc>, window_params = [{transform_indices = @transform_0, window_bounds = array<i64: 1, 128, 128>}, {pipeline_mode = #tpu.pipeline_mode<synchronous>, transform_indices = @transform_1, window_bounds = array<i64: 128, 256>}, {transform_indices = @transform_2, window_bounds = array<i64: 1, 256, 128>}, {transform_indices = @transform_3, window_bounds = array<i64: 1, 1, 256>}, {transform_indices = @transform_4, window_bounds = array<i64: 1, 128, 128>}]} {
    %c0 = arith.constant 0 : index
    %c0_0 = arith.constant 0 : index
    %c0_1 = arith.constant 0 : index
    %0 = vector.load %arg2[%c0, %c0_0, %c0_1] : memref<1x128x128xf32, #tpu.memory_space<vmem>>, vector<1x128x128xf32>
    %1 = vector.shape_cast %0 : vector<1x128x128xf32> to vector<128x128xf32>
    %c0_2 = arith.constant 0 : index
    %c0_3 = arith.constant 0 : index
    %2 = vector.load %arg3[%c0_2, %c0_3] : memref<128x256xf32, #tpu.memory_space<vmem>>, vector<128x256xf32>
    %cst = arith.constant dense<0.000000e+00> : vector<128x256xf32>
    %3 = tpu.matmul %1, %2, %cst {dimension_numbers = #tpu.dot_dimension_numbers<[1], [0], [0], [1], [0, 0, 1, 1], [], []>} : vector<128x128xf32>, vector<128x256xf32>, vector<128x256xf32> -> vector<128x256xf32>
    %4 = arith.mulf %1, %1 : vector<128x128xf32>
    %cst_4 = arith.constant dense<0.000000e+00> : vector<128xf32>
    %5 = vector.multi_reduction <add>, %4, %cst_4 [1] : vector<128x128xf32> to vector<128xf32>
    %6 = vector.shape_cast %5 : vector<128xf32> to vector<128x1xf32>
    %cst_5 = arith.constant 0.0441941731 : f32
    %7 = vector.broadcast %cst_5 : f32 to vector<128x1xf32>
    %8 = arith.mulf %6, %7 : vector<128x1xf32>
    %cst_6 = arith.constant dense<0xFF800000> : vector<128xf32>
    %9 = vector.multi_reduction <maximumf>, %3, %cst_6 [1] : vector<128x256xf32> to vector<128xf32>
    %10 = vector.shape_cast %9 : vector<128xf32> to vector<128x1xf32>
    %11 = vector.broadcast %8 : vector<128x1xf32> to vector<128x256xf32>
    %12 = arith.subf %3, %11 : vector<128x256xf32>
    %13 = vector.broadcast %10 : vector<128x1xf32> to vector<128x256xf32>
    %14 = arith.subf %12, %13 : vector<128x256xf32>
    %15 = math.exp %14 : vector<128x256xf32>
    %cst_7 = arith.constant 9.99999974E-5 : f32
    %16 = vector.broadcast %cst_7 : f32 to vector<128x256xf32>
    %17 = arith.addf %15, %16 : vector<128x256xf32>
    %cst_8 = arith.constant 6.250000e-02 : f32
    %18 = vector.broadcast %cst_8 : f32 to vector<128x256xf32>
    %19 = arith.mulf %18, %17 : vector<128x256xf32>
    %c0_9 = arith.constant 0 : index
    %c0_10 = arith.constant 0 : index
    %c0_11 = arith.constant 0 : index
    %20 = vector.load %arg5[%c0_9, %c0_10, %c0_11] : memref<1x1x256xf32, #tpu.memory_space<vmem>>, vector<1x1x256xf32>
    %21 = vector.shape_cast %20 : vector<1x1x256xf32> to vector<1x256xf32>
    %22 = vector.broadcast %21 : vector<1x256xf32> to vector<128x256xf32>
    %23 = arith.mulf %19, %22 : vector<128x256xf32>
    %cst_12 = arith.constant dense<0.000000e+00> : vector<128xf32>
    %24 = vector.multi_reduction <add>, %23, %cst_12 [1] : vector<128x256xf32> to vector<128xf32>
    %25 = vector.shape_cast %24 : vector<128xf32> to vector<128x1xf32>
    %c0_13 = arith.constant 0 : index
    %c0_14 = arith.constant 0 : index
    %c0_15 = arith.constant 0 : index
    %26 = vector.load %arg4[%c0_13, %c0_14, %c0_15] : memref<1x256x128xf32, #tpu.memory_space<vmem>>, vector<1x256x128xf32>
    %27 = vector.shape_cast %26 : vector<1x256x128xf32> to vector<256x128xf32>
    %cst_16 = arith.constant dense<0.000000e+00> : vector<128x128xf32>
    %28 = tpu.matmul %19, %27, %cst_16 {dimension_numbers = #tpu.dot_dimension_numbers<[1], [0], [0], [1], [0, 0, 1, 1], [], []>} : vector<128x256xf32>, vector<256x128xf32>, vector<128x128xf32> -> vector<128x128xf32>
    %29 = tpu.reciprocal %25 {approx = true} : vector<128x1xf32> -> vector<128x1xf32>
    %30 = vector.broadcast %29 : vector<128x1xf32> to vector<128x128xf32>
    %31 = arith.mulf %28, %30 : vector<128x128xf32>
    %c0_17 = arith.constant 0 : index
    %c0_18 = arith.constant 0 : index
    %c0_19 = arith.constant 0 : index
    %32 = vector.load %arg6[%c0_17, %c0_18, %c0_19] : memref<1x128x128xf32, #tpu.memory_space<vmem>>, vector<1x128x128xf32>
    %33 = vector.shape_cast %32 : vector<1x128x128xf32> to vector<128x128xf32>
    %34 = vector.shape_cast %31 : vector<128x128xf32> to vector<1x128x128xf32>
    tpu.vector_store %arg6[%c0_17, %c0_18, %c0_19], %34 {strides = array<i32>} : memref<1x128x128xf32, #tpu.memory_space<vmem>>, vector<1x128x128xf32>,
    return
  }
  func.func @transform_0(%arg0: i32, %arg1: i32) -> (i32, i32, i32) {
    %c0_i32 = arith.constant 0 : i32
    %c0_i32_0 = arith.constant 0 : i32
    return %arg0, %arg1, %c0_i32 : i32, i32, i32
  }
  func.func @transform_1(%arg0: i32, %arg1: i32) -> (i32, i32) {
    %c0_i32 = arith.constant 0 : i32
    %c0_i32_0 = arith.constant 0 : i32
    %c0_i32_1 = arith.constant 0 : i32
    return %c0_i32, %c0_i32_0 : i32, i32
  }
  func.func @transform_2(%arg0: i32, %arg1: i32) -> (i32, i32, i32) {
    %c0_i32 = arith.constant 0 : i32
    %c0_i32_0 = arith.constant 0 : i32
    %c0_i32_1 = arith.constant 0 : i32
    return %arg0, %c0_i32, %c0_i32_0 : i32, i32, i32
  }
  func.func @transform_3(%arg0: i32, %arg1: i32) -> (i32, i32, i32) {
    %c0_i32 = arith.constant 0 : i32
    %c0_i32_0 = arith.constant 0 : i32
    %c0_i32_1 = arith.constant 0 : i32
    return %arg0, %c0_i32, %c0_i32_0 : i32, i32, i32
  }
  func.func @transform_4(%arg0: i32, %arg1: i32) -> (i32, i32, i32) {
    %c0_i32 = arith.constant 0 : i32
    %c0_i32_0 = arith.constant 0 : i32
    return %arg0, %arg1, %c0_i32 : i32, i32, i32
  }
}

</mosaic_0001>

<bundles_post_ra>
// kernel: fast_attention.3
= control target key start
LH: loop header
LB: loop body
LE: loop exit
PB: predicated region body
PF: predicated region fallthrough
CT: control target
= control target key end

     0   :  { %9 = vsyncpa [#allocation3], 0  ;;  %s2249_s0 = inlined_call_operand.vmem [shape: f32[8,256,128], index: 0, kind: input, shape index: {}]   ;;  %s2250_s1 = inlined_call_operand.vmem [shape: f32[128,256], index: 1, kind: input, shape index: {}]   ;;  %s2251_s2 = inlined_call_operand.vmem [shape: f32[8,256,128], index: 2, kind: input, shape index: {}]   ;;  %s2252_s3 = inlined_call_operand.vmem [shape: f32[8,1,256], index: 3, kind: input, shape index: {}]   ;;  %s2253_s4 = inlined_call_operand.hbm [shape: f32[8,256,128], index: 4, kind: output, shape index: {}]  }
   0x1   :  { %11 = vsyncpa [#allocation3 + $0x1], 0  ;;  %s1674_s15 = smov 0   ;;  %s1676_s16 = smov 0  }
   0x2   :  { %s1678_s17 = smov 0   ;;  %s1680_s18 = smov 0  }
   0x3   :  { %s1682_s19 = smov 0   ;;  %s1684_s20 = smov 0  }
   0x4   :  { %s1686_s21 = smov 0   ;;  %s1688_s22 = smov 0  }
   0x5 LB: > { %2257 = sst [smem:[#allocation5_spill]] %s1639_s21  ;;  %s1216_s23 = sadd.s32 4294967295, %s1643_s22   ;;  %s1643_s22 = sphi %s1688_s22, %s17_s22   ;;  %s1639_s21 = sphi %s1686_s21, %s2264_s21   ;;  %s1635_s20 = sphi %s1684_s20, %s2269_s20   ;;  %s1631_s19 = sphi %s1682_s19, %s2262_s19   ;;  %s1627_s18 = sphi %s1680_s18, %s2268_s18   ;;  %s1623_s17 = sphi %s1678_s17, %s2267_s17   ;;  %s1619_s16 = sphi %s1676_s16, %s2266_s16   ;;  %s1615_s15 = sphi %s1674_s15, %s2265_s15  }
   0x6   : > { %s1217_s24 = sadd.s32 4294967294, %s1643_s22   ;;  %s26_s25 = sadd.s32 1, %s1635_s20 }
   0x7   : > { %p27_p0 = scmp.ge.s32.totalorder %s26_s25, 2  ;;  %s29_s26 = sadd.s32 1, %s1639_s21 }
   0x8   : > { %p149_p1 = scmp.ne.s32.totalorder %s1623_s17, %s1619_s16  ;;  %p150_p2 = scmp.eq.s32.totalorder %s1216_s23, 15 }
   0x9   : > { %s2271_s25 = smov (%p27_p0, %s26_s25), 0  ;;  %s2273_s26 = smov (!%p27_p0, %s29_s26), %s1639_s21 }
   0xa   : > { %2258 = sst [smem:[#allocation6_spill]] %s2271_s25  ;;  %s135_s27 = ssub.s32 %s1635_s20, %s2271_s25 }
   0xb   : > { %p1725_p3 = por %p150_p2, %p149_p1  ;;  %p31_p4 = scmp.ge.s32.totalorder %s2273_s26, 8 }
   0xc   : > { %p155_p5 = scmp.ne.s32.totalorder %s1619_s16, %s1615_s15  ;;  %p156_p6 = scmp.eq.s32.totalorder %s1217_s24, 15 }
   0xd   : > { %p1220_p7 = scmp.ge.s32.totalorder %s1643_s22, 1  ;;  %s2275_s26 = smov (%p31_p4, %s2273_s26), 0 }
   0xe   : > { %2260 = sst [smem:[#allocation7_spill]] %s2275_s26  ;;  %p1734_p8 = por %p156_p6, %p155_p5 }
   0xf   : > { %p205_p9 = scmp.lt.s32.totalorder %s1643_s22, 17  ;;  %s134_s30 = ssub.s32 %s1639_s21, %s2275_s26 }
  0x10   : > { %s139_s5 = sadd.s32 1, %s1623_s17  ;;  %s136_s6 = sor.u32 %s135_s27, %s134_s30 }
  0x11   : > { %p206_p10 = pnand %p1220_p7, %p205_p9  ;;  %p137_p11 = scmp.eq.s32.totalorder %s136_s6, 0 }
  0x12   : > { %v281_v0 = vld [vmem:[%s2250_s1 + $0x8] sm:$0xff] (!%p206_p10)  ;;  %v283_v1 = vld [vmem:[%s2250_s1 + $0x18] sm:$0xff] (!%p206_p10)  ;;  %v280_v2 = vld [vmem:[%s2250_s1] sm:$0xff] (!%p206_p10)  ;;  %s1755_s14 = sshll.u32 (!%p206_p10), %s1627_s18, 4  ;;  %p245_p12 = scmp.lt.s32.totalorder (!%p206_p10), %s1631_s19, 7  ;;  %v1645_v7 = vmov (!%p206_p10), 0.0  }
  0x13   : > { %s1743_s7 = scalar_select %p137_p11, %s1623_s17, %s139_s5  }
  0x14   : > { %209 = sbr.rel (%p206_p10) target bundleno = 725 (0x2d5), region = 36  ;;  %v1315_v3 = vpack.c.bf16 (!%p206_p10), %v283_v1, %v281_v0  ;;  %v282_v4 = vld [vmem:[%s2250_s1 + $0x10] sm:$0xff] (!%p206_p10)  ;;  %v285_v5 = vld [vmem:[%s2250_s1 + $0x28] sm:$0xff] (!%p206_p10)  ;;  %v287_v6 = vld [vmem:[%s2250_s1 + $0x38] sm:$0xff] (!%p206_p10)  ;;  %376 = vmatprep.mubr.f32.mxu0 (!%p206_p10), %v1645_v7  ;;  %p247_p13 = scmp.lt.s32.totalorder (!%p206_p10), %s1755_s14, 31 }
  0x15   : > { %v1317_v8 = vpack.c.bf16 (!%p206_p10), %v282_v4, %v280_v2  ;;  %v1319_v9 = vpack.c.bf16 (!%p206_p10), %v287_v6, %v285_v5  ;;  %v284_v10 = vld [vmem:[%s2250_s1 + $0x20] sm:$0xff] (!%p206_p10)  ;;  %v286_v11 = vld [vmem:[%s2250_s1 + $0x30] sm:$0xff] (!%p206_p10)  ;;  %v289_v12 = vld [vmem:[%s2250_s1 + $0x48] sm:$0xff] (!%p206_p10)  ;;  %s1230_s6 = sshll.u32 (!%p206_p10), %s1631_s19, 5  ;;  %s1646_s11 = smov (!%p206_p10), [#allocation2]  }
  0x16   : > { %1316 = vmatprep.subr.bf16.mxu0 (!%p206_p10), %v1315_v3  ;;  %v291_v13 = vld [vmem:[%s2250_s1 + $0x58] sm:$0xff] (!%p206_p10)  ;;  %v1321_v14 = vpack.c.bf16 (!%p206_p10), %v286_v11, %v284_v10  ;;  %v288_v16 = vld [vmem:[%s2250_s1 + $0x40] sm:$0xff] (!%p206_p10)  ;;  %v290_v17 = vld [vmem:[%s2250_s1 + $0x50] sm:$0xff] (!%p206_p10)  ;;  %s1107_s18 = sadd.s32 (!%p206_p10), %s1230_s6, %s1755_s14 }
  0x17   : > { %1318 = vmatpush1.bf16.msra.mxu0 (!%p206_p10), %v1317_v8  ;;  %v1323_v15 = vpack.c.bf16 (!%p206_p10), %v291_v13, %v289_v12  ;;  %v293_v18 = vld [vmem:[%s2250_s1 + $0x68] sm:$0xff] (!%p206_p10)  ;;  %v295_v19 = vld [vmem:[%s2250_s1 + $0x78] sm:$0xff] (!%p206_p10)  ;;  %v1325_v20 = vpack.c.bf16 (!%p206_p10), %v290_v17, %v288_v16  ;;  %v292_v22 = vld [vmem:[%s2250_s1 + $0x60] sm:$0xff] (!%p206_p10)  ;;  %s1231_s8 = sshll.u32 (!%p206_p10), %s1107_s18, 7 }
  0x18   : > { %1320 = vmatprep.subr.bf16.mxu0 (!%p206_p10), %v1319_v9  ;;  %v1327_v21 = vpack.c.bf16 (!%p206_p10), %v295_v19, %v293_v18  ;;  %v294_v23 = vld [vmem:[%s2250_s1 + $0x70] sm:$0xff] (!%p206_p10)  ;;  %v297_v24 = vld [vmem:[%s2250_s1 + $0x88] sm:$0xff] (!%p206_p10)  ;;  %v299_v25 = vld [vmem:[%s2250_s1 + $0x98] sm:$0xff] (!%p206_p10) }
  0x19   : > { %v1329_v28 = vpack.c.bf16 (!%p206_p10), %v294_v23, %v292_v22  ;;  %v1331_v30 = vpack.c.bf16 (!%p206_p10), %v299_v25, %v297_v24  ;;  %v296_v31 = vld [vmem:[%s2250_s1 + $0x80] sm:$0xff] (!%p206_p10)  ;;  %v298_v32 = vld [vmem:[%s2250_s1 + $0x90] sm:$0xff] (!%p206_p10)  ;;  %v301_v34 = vld [vmem:[%s2250_s1 + $0xa8] sm:$0xff] (!%p206_p10) }
  0x1a   : > { %v303_v35 = vld [vmem:[%s2250_s1 + $0xb8] sm:$0xff] (!%p206_p10)  ;;  %v1333_v36 = vpack.c.bf16 (!%p206_p10), %v298_v32, %v296_v31  ;;  %v300_v38 = vld [vmem:[%s2250_s1 + $0xa0] sm:$0xff] (!%p206_p10)  ;;  %v302_v39 = vld [vmem:[%s2250_s1 + $0xb0] sm:$0xff] (!%p206_p10) }
  0x1b   : > { %s1779_s13 = scalar_select %p245_p12, %s1631_s19, 7  ;;  %1322 = vmatpush1.bf16.msra.mxu0 %v1321_v14  ;;  %v1335_v37 = vpack.c.bf16 %v303_v35, %v301_v34  ;;  %v305_v40 = vld [vmem:[%s2250_s1 + $0xc8] sm:$0xff]  ;;  %v307_v41 = vld [vmem:[%s2250_s1 + $0xd8] sm:$0xff]  ;;  %v1337_v42 = vpack.c.bf16 %v302_v39, %v300_v38  ;;  %v304_v44 = vld [vmem:[%s2250_s1 + $0xc0] sm:$0xff] }
  0x1c   : > { %s248_s27 = scalar_select %p247_p13, %s1755_s14, 31  ;;  %1324 = vmatprep.subr.bf16.mxu0 %v1323_v15  ;;  %v1339_v43 = vpack.c.bf16 %v307_v41, %v305_v40  ;;  %v306_v45 = vld [vmem:[%s2250_s1 + $0xd0] sm:$0xff]  ;;  %v309_v46 = vld [vmem:[%s2250_s1 + $0xe8] sm:$0xff]  ;;  %v311_v47 = vld [vmem:[%s2250_s1 + $0xf8] sm:$0xff] }
  0x1d   : > { %s1223_s30 = sshll.u32 %s1779_s13, 5  ;;  %v1341_v48 = vpack.c.bf16 %v306_v45, %v304_v44  ;;  %v1343_v49 = vpack.c.bf16 %v311_v47, %v309_v46  ;;  %v308_v50 = vld [vmem:[%s2250_s1 + $0xe0] sm:$0xff]  ;;  %v310_v51 = vld [vmem:[%s2250_s1 + $0xf0] sm:$0xff] }
  0x1e   : > { %s250_s9 = sadd.s32 %s1223_s30, %s248_s27  ;;  %v1345_v52 = vpack.c.bf16 %v310_v51, %v308_v50 }
  0x1f   : > { %s1224_s24 = sshll.u32 %s250_s9, 3  ;;  %1326 = vmatpush1.bf16.msra.mxu0 %v1325_v20  ;;  %s1234_s9 = sshll.u32 %s1779_s13, 8 }
  0x20   : > { %s1801_s21 = scalar_lea.vmem %s2249_s0, %s1224_s24  ;;  %1328 = vmatprep.subr.bf16.mxu0 %v1327_v21  ;;  %s1934_s12 = scalar_lea.vmem %s2251_s2, %s1234_s9 }
  0x21   : > { %v264_v26 = vld [vmem:[%s1801_s21] sm:$0xff]  ;;  %v265_v29 = vld [vmem:[%s1801_s21 + $0x8] sm:$0xff]  ;;  %v1862_v53 = vld [vmem:[%s1801_s21 + $0x10] sm:$0xff]  ;;  %s2189_s9 = scalar_lea.hbm %s2253_s4, %s1231_s8 }
  0x22   : > { %v473_v27 = vmul.f32 %v264_v26, %v264_v26  ;;  %v474_v33 = vmul.f32 %v265_v29, %v265_v29  ;;  %v1867_v54 = vld [vmem:[%s1801_s21 + $0x18] sm:$0xff]  ;;  %v1872_v55 = vld [vmem:[%s1801_s21 + $0x20] sm:$0xff]  ;;  %v1877_v56 = vld [vmem:[%s1801_s21 + $0x28] sm:$0xff]  ;;  %v475_v25 = vmul.f32 %v1862_v53, %v1862_v53 }
  0x23   : > { %1330 = vmatpush1.bf16.msra.mxu0 %v1329_v28  ;;  %v1882_v57 = vld [vmem:[%s1801_s21 + $0x30] sm:$0xff]  ;;  %v1887_v58 = vld [vmem:[%s1801_s21 + $0x38] sm:$0xff]  ;;  %v1892_v59 = vld [vmem:[%s1801_s21 + $0x40] sm:$0xff] }
  0x24   : > { %489 = vadd.xlane.f32.xlu0 %v473_v27  ;;  %1332 = vmatprep.subr.bf16.mxu0 %v1331_v30  ;;  %v1897_v60 = vld [vmem:[%s1801_s21 + $0x48] sm:$0xff]  ;;  %v1902_v61 = vld [vmem:[%s1801_s21 + $0x50] sm:$0xff]  ;;  %v1907_v62 = vld [vmem:[%s1801_s21 + $0x58] sm:$0xff]  ;;  %v479_v47 = vmul.f32 %v1882_v57, %v1882_v57 }
  0x25   : > { %v1912_v63 = vld [vmem:[%s1801_s21 + $0x60] sm:$0xff]  ;;  %v1917_v0 = vld [vmem:[%s1801_s21 + $0x68] sm:$0xff]  ;;  %v1922_v1 = vld [vmem:[%s1801_s21 + $0x70] sm:$0xff] }
  0x26   : > { %v1927_v2 = vld [vmem:[%s1801_s21 + $0x78] sm:$0xff]  ;;  %v885_v3 = vld [vmem:[%s1934_s12 + $0x80] sm:$0xff]  ;;  %v886_v4 = vld [vmem:[%s1934_s12 + $0x88] sm:$0xff]  ;;  %s1227_s21 = sshll.u32 %s1779_s13, 1  ;;  %s241_s13 = sand.u32 1, %s1619_s16  }
  0x27   : > { %1334 = vmatpush1.bf16.msra.mxu0 %v1333_v36  ;;  %v869_v5 = vld [vmem:[%s1934_s12] sm:$0xff]  ;;  %v1347_v6 = vpack.c.bf16 %v886_v4, %v885_v3  ;;  %v887_v8 = vld [vmem:[%s1934_s12 + $0x90] sm:$0xff]  ;;  %v888_v9 = vld [vmem:[%s1934_s12 + $0x98] sm:$0xff]  ;;  %s262_s27 = scalar_lea.vmem %s2252_s3, %s1227_s21  ;;  %s1221_s30 = sshll.u32 %s241_s13, 7 }
  0x28   : > { %491 = vadd.xlane.f32.xlu0 %v474_v33  ;;  %1336 = vmatprep.subr.bf16.mxu0 %v1335_v37  ;;  %v1351_v11 = vpack.c.bf16 %v888_v9, %v887_v8  ;;  %v871_v12 = vld [vmem:[%s1934_s12 + $0x10] sm:$0xff]  ;;  %v872_v13 = vld [vmem:[%s1934_s12 + $0x18] sm:$0xff]  ;;  %v889_v14 = vld [vmem:[%s1934_s12 + $0xa0] sm:$0xff]  ;;  %v477_v33 = vmul.f32 %v1872_v55, %v1872_v55  ;;  %v478_v37 = vmul.f32 %v1877_v56, %v1877_v56  ;;  %s2167_s5 = scalar_lea.vmem [#allocation2], %s1221_s30  ;;  %s2197_s14 = scalar_lea.sflag [#allocation3], %s241_s13 }
  0x29   : > { %1348 = vmatprep.subr.bf16.mxu1 %v1347_v6  ;;  %v890_v15 = vld [vmem:[%s1934_s12 + $0xa8] sm:$0xff]  ;;  %v1353_v16 = vpack.c.bf16 %v872_v13, %v871_v12  ;;  %v873_v18 = vld [vmem:[%s1934_s12 + $0x20] sm:$0xff]  ;;  %v891_v38 = vld [vmem:[%s1934_s12 + $0xb0] sm:$0xff]  ;;  %s1110_s19 = sshll.u32 %s2167_s5, 4  ;;  %s2192_s19 = int_to_ptr.vmem [resolvable:$true] %s1110_s19 }
  0x2a   : > { %v1355_v17 = vpack.c.bf16 %v890_v15, %v889_v14  ;;  %v874_v19 = vld [vmem:[%s1934_s12 + $0x28] sm:$0xff]  ;;  %v892_v39 = vld [vmem:[%s1934_s12 + $0xb8] sm:$0xff]  ;;  %v895_v3 = vld [vmem:[%s1934_s12 + $0xd0] sm:$0xff]  ;;  %s1549_s10 = scalar_lea.vmem %s2192_s19, 2048 }
  0x2b   : > { %1338 = vmatpush1.bf16.msra.mxu0 %v1337_v42  ;;  %v1357_v20 = vpack.c.bf16 %v874_v19, %v873_v18  ;;  %v1359_v41 = vpack.c.bf16 %v892_v39, %v891_v38  ;;  %v875_v42 = vld [vmem:[%s1934_s12 + $0x30] sm:$0xff]  ;;  %v896_v4 = vld [vmem:[%s1934_s12 + $0xd8] sm:$0xff]  ;;  %v897_v12 = vld [vmem:[%s1934_s12 + $0xe0] sm:$0xff]  ;;  %p1550_p0 = scmp.ne.s32.totalorder %s2192_s19, %s1549_s10 }
  0x2c   : > { %1340 = vmatprep.subr.bf16.mxu0 %v1339_v43  ;;  %v876_v43 = vld [vmem:[%s1934_s12 + $0x38] sm:$0xff]  ;;  %v1367_v6 = vpack.c.bf16 %v896_v4, %v895_v3  ;;  %v898_v13 = vld [vmem:[%s1934_s12 + $0xe8] sm:$0xff]  ;;  %v488_v3 = vmul.f32 %v1927_v2, %v1927_v2 }
  0x2d   : > { %v1361_v45 = vpack.c.bf16 %v876_v43, %v875_v42  ;;  %v880_v8 = vld [vmem:[%s1934_s12 + $0x58] sm:$0xff]  ;;  %v1371_v15 = vpack.c.bf16 %v898_v13, %v897_v12  ;;  %v484_v43 = vmul.f32 %v1907_v62, %v1907_v62  ;;  %p1551_p1 = pnand %p1550_p0, %p1725_p3 }
  0x2f   : > { %1342 = vmatpush1.bf16.msra.mxu0 %v1341_v48  ;;  %v893_v48 = vld [vmem:[%s1934_s12 + $0xc0] sm:$0xff]  ;;  %p1552_p2 = pneg %p1551_p1 }
  0x30   : > { %1344 = vmatprep.subr.bf16.mxu0 %v1343_v49  ;;  %v894_v49 = vld [vmem:[%s1934_s12 + $0xc8] sm:$0xff] }
  0x31   : > { %v1363_v51 = vpack.c.bf16 %v894_v49, %v893_v48 }
  0x33   : > { %1346 = vmatpush1.bf16.msra.mxu0 %v1345_v52  ;;  %v877_v52 = vld [vmem:[%s1934_s12 + $0x40] sm:$0xff] }
  0x36   : > { %377 = vmatmul.mubr.f32.vlgmr.msra.gmra.mrb[0].mxu0 %v264_v26 }
  0x37   : > { %382 = vmatprep.mubr.f32.mxu0 %v1645_v7 }
  0x3a   : > { %383 = vmatmul.mubr.f32.gmra.mrb[2].mxu0 %v265_v29  ;;  %v476_v29 = vmul.f32 %v1867_v54, %v1867_v54 }
  0x3b   : > { %388 = vmatprep.mubr.f32.mxu0 %v1645_v7 }
  0x3e   : > { %389 = vmatmul.mubr.f32.gmra.mrb[4].mxu0 %v1862_v53  ;;  %v878_v53 = vld [vmem:[%s1934_s12 + $0x48] sm:$0xff] }
  0x3f   : > { %394 = vmatprep.mubr.f32.mxu0 %v1645_v7 }
  0x42   : > { %395 = vmatmul.mubr.f32.gmra.mrb[6].mxu0 %v1867_v54 }
  0x43   : > { %400 = vmatprep.mubr.f32.mxu0 %v1645_v7 }
  0x46   : > { %401 = vmatmul.mubr.f32.gmra.mrb[8].mxu0 %v1872_v55  ;;  %v1365_v55 = vpack.c.bf16 %v878_v53, %v877_v52 }
  0x47   : > { %406 = vmatprep.mubr.f32.mxu0 %v1645_v7 }
  0x4a   : > { %407 = vmatmul.mubr.f32.gmra.mrb[10].mxu0 %v1877_v56 }
  0x4b   : > { %412 = vmatprep.mubr.f32.mxu0 %v1645_v7 }
  0x4e   : > { %413 = vmatmul.mubr.f32.gmra.mrb[12].mxu0 %v1882_v57  ;;  %v480_v57 = vmul.f32 %v1887_v58, %v1887_v58 }
  0x4f   : > { %418 = vmatprep.mubr.f32.mxu0 %v1645_v7 }
  0x52   : > { %419 = vmatmul.mubr.f32.gmra.mrb[14].mxu0 %v1887_v58  ;;  %v481_v58 = vmul.f32 %v1892_v59, %v1892_v59 }
  0x53   : > { %424 = vmatprep.mubr.f32.mxu0 %v1645_v7 }
  0x56   : > { %425 = vmatmul.mubr.f32.gmra.mrb[16].mxu0 %v1892_v59  ;;  %v482_v59 = vmul.f32 %v1897_v60, %v1897_v60 }
  0x57   : > { %430 = vmatprep.mubr.f32.mxu0 %v1645_v7 }
  0x5a   : > { %431 = vmatmul.mubr.f32.gmra.mrb[18].mxu0 %v1897_v60  ;;  %v483_v60 = vmul.f32 %v1902_v61, %v1902_v61 }
  0x5b   : > { %436 = vmatprep.mubr.f32.mxu0 %v1645_v7 }
  0x5e   : > { %437 = vmatmul.mubr.f32.gmra.mrb[20].mxu0 %v1902_v61 }
  0x5f   : > { %442 = vmatprep.mubr.f32.mxu0 %v1645_v7 }
  0x62   : > { %443 = vmatmul.mubr.f32.gmra.mrb[22].mxu0 %v1907_v62 }
  0x63   : > { %448 = vmatprep.mubr.f32.mxu0 %v1645_v7 }
  0x66   : > { %449 = vmatmul.mubr.f32.gmra.mrb[24].mxu0 %v1912_v63 }
  0x67   : > { %454 = vmatprep.mubr.f32.mxu0 %v1645_v7 }
  0x6a   : > { %455 = vmatmul.mubr.f32.gmra.mrb[26].mxu0 %v1917_v0 }
  0x6b   : > { %460 = vmatprep.mubr.f32.mxu0 %v1645_v7 }
  0x6e   : > { %461 = vmatmul.mubr.f32.gmra.mrb[28].mxu0 %v1922_v1 }
  0x6f   : > { %466 = vmatprep.mubr.f32.mxu0 %v1645_v7  ;;  %v870_v7 = vld [vmem:[%s1934_s12 + $0x8] sm:$0xff] }
  0x70   : > { %v1349_v10 = vpack.c.bf16 %v870_v7, %v869_v5  ;;  %v879_v7 = vld [vmem:[%s1934_s12 + $0x50] sm:$0xff] }
  0x72   : > { %467 = vmatmul.mubr.f32.gmra.mrb[30].mxu0 %v1927_v2  ;;  %1350 = vmatpush3.bf16.msra.mxu1 %v1349_v10  ;;  %v1369_v10 = vpack.c.bf16 %v880_v8, %v879_v7 }
  0x73   : > { %1352 = vmatprep.subr.bf16.mxu1 %v1351_v11 }
  0x76   : > { %1354 = vmatpush3.bf16.msra.mxu1 %v1353_v16  ;;  %v881_v16 = vld [vmem:[%s1934_s12 + $0x60] sm:$0xff] }
  0x77   : > { %1356 = vmatprep.subr.bf16.mxu1 %v1355_v17  ;;  %v882_v17 = vld [vmem:[%s1934_s12 + $0x68] sm:$0xff] }
  0x78   : > { %v1373_v19 = vpack.c.bf16 %v882_v17, %v881_v16 }
  0x7a   : > { %1358 = vmatpush3.bf16.msra.mxu1 %v1357_v20 }
  0x7b   : > { %1360 = vmatprep.subr.bf16.mxu1 %v1359_v41 }
  0x7e   : > { %1362 = vmatpush3.bf16.msra.mxu1 %v1361_v45 }
  0x7f   : > { %1364 = vmatprep.subr.bf16.mxu1 %v1363_v51  ;;  %v486_v51 = vmul.f32 %v1917_v0, %v1917_v0 }
  0x82   : > { %1366 = vmatpush3.bf16.msra.mxu1 %v1365_v55 }
  0x83   : > { %1368 = vmatprep.subr.bf16.mxu1 %v1367_v6 }
  0x86   : > { %1370 = vmatpush3.bf16.msra.mxu1 %v1369_v10 }
  0x87   : > { %1372 = vmatprep.subr.bf16.mxu1 %v1371_v15 }
  0x8a   : > { %1374 = vmatpush3.bf16.msra.mxu1 %v1373_v19 }
 0x109   : > { %v1948_v21 = vpop.f32.mrb[0].mxu0 }
 0x10a   : > { %v1950_v22 = vpop.f32.mrb[1].mxu0 }
 0x10b   : > { %v537_v23 = vmax.f32 %v1948_v21, %v1950_v22 }
 0x10d   : > { %538 = vmax.xlane.f32.xlu1 %v537_v23  ;;  %v1954_v24 = vpop.f32.mrb[2].mxu0  ;;  %v899_v23 = vld [vmem:[%s1934_s12 + $0xf0] sm:$0xff] }
 0x10e   : > { %v1958_v26 = vpop.f32.mrb[3].mxu0 }
 0x10f   : > { %v540_v27 = vmax.f32 %v1954_v24, %v1958_v26 }
 0x111   : > { %493 = vadd.xlane.f32.xlu1 %v475_v25  ;;  %541 = vmax.xlane.f32.xlu0 %v540_v27  ;;  %v1962_v28 = vpop.f32.mrb[4].mxu0  ;;  %v900_v25 = vld [vmem:[%s1934_s12 + $0xf8] sm:$0xff] }
 0x112   : > { %v1966_v30 = vpop.f32.mrb[5].mxu0 }
 0x113   : > { %v543_v31 = vmax.f32 %v1962_v28, %v1966_v30 }
 0x115   : > { %495 = vadd.xlane.f32.xlu1 %v476_v29  ;;  %544 = vmax.xlane.f32.xlu0 %v543_v31  ;;  %v1970_v32 = vpop.f32.mrb[6].mxu0  ;;  %v1375_v29 = vpack.c.bf16 %v900_v25, %v899_v23  ;;  %v883_v31 = vld [vmem:[%s1934_s12 + $0x70] sm:$0xff]  ;;  %v779_v25 = vlaneseq }
 0x116   : > { %v1974_v34 = vpop.f32.mrb[7].mxu0 }
 0x117   : > { %v546_v35 = vmax.f32 %v1970_v32, %v1974_v34  ;;  %1376 = vmatprep.subr.bf16.mxu1 %v1375_v29 }
 0x119   : > { %497 = vadd.xlane.f32.xlu1 %v477_v33  ;;  %547 = vmax.xlane.f32.xlu0 %v546_v35  ;;  %v1978_v36 = vpop.f32.mrb[8].mxu0  ;;  %v884_v33 = vld [vmem:[%s1934_s12 + $0x78] sm:$0xff]  ;;  %s1553_s12 = sshll.u32 %s1646_s11, 4  ;;  %s1554_s12 = int_to_ptr.vmem [resolvable:$false] %s1553_s12 }
 0x11a   : > { %v1984_v40 = vpop.f32.mrb[9].mxu0  ;;  %s1555_s21 = scalar_lea.vmem %s1554_s12, 4096  ;;  %p1556_p4 = scmp.lt.s32.totalorder %s2192_s19, %s1554_s12 }
 0x11b   : > { %v549_v44 = vmax.f32 %v1978_v36, %v1984_v40  ;;  %p1557_p5 = scmp.lt.s32.totalorder %s1555_s21, %s1549_s10 }
 0x11d   : > { %499 = vadd.xlane.f32.xlu1 %v478_v37  ;;  %550 = vmax.xlane.f32.xlu0 %v549_v44  ;;  %v1990_v46 = vpop.f32.mrb[10].mxu0  ;;  %v1377_v37 = vpack.c.bf16 %v884_v33, %v883_v31  ;;  %p1558_p6 = por %p1557_p5, %p1556_p4 }
 0x11e   : > { %v1996_v50 = vpop.f32.mrb[11].mxu0 }
 0x11f   : > { %v552_v54 = vmax.f32 %v1990_v46, %v1996_v50  ;;  %1378 = vmatpush3.bf16.msra.mxu1 %v1377_v37  ;;  %p1559_p7 = pnand %p1558_p6, %p1552_p2 }
 0x121   : > { %501 = vadd.xlane.f32.xlu1 %v479_v47  ;;  %553 = vmax.xlane.f32.xlu0 %v552_v54  ;;  %v2002_v56 = vpop.f32.mrb[12].mxu0  ;;  %v485_v47 = vmul.f32 %v1912_v63, %v1912_v63  ;;  %v487_v54 = vmul.f32 %v1922_v1, %v1922_v1 }
 0x122   : > { %v2008_v5 = vpop.f32.mrb[13].mxu0 }
 0x123   : > { %v555_v9 = vmax.f32 %v2002_v56, %v2008_v5 }
 0x125   : > { %503 = vadd.xlane.f32.xlu1 %v480_v57  ;;  %556 = vmax.xlane.f32.xlu0 %v555_v9  ;;  %v2014_v11 = vpop.f32.mrb[14].mxu0  ;;  %v490_v9 = vpop.xlane.xlu0 %489 }
 0x126   : > { %v2020_v14 = vpop.f32.mrb[15].mxu0  ;;  %v521_v10 = vmul.f32 0.044194173, %v490_v9 }
 0x127   : > { %v558_v18 = vmax.f32 %v2014_v11, %v2020_v14 }
 0x128   : > { %v585_v2 = vsub.f32 %v1948_v21, %v521_v10  ;;  %v586_v12 = vsub.f32 %v1950_v22, %v521_v10 }
 0x129   : > { %505 = vadd.xlane.f32.xlu1 %v481_v58  ;;  %559 = vmax.xlane.f32.xlu0 %v558_v18  ;;  %v2026_v20 = vpop.f32.mrb[16].mxu0  ;;  %v492_v58 = vpop.xlane.xlu0 %491 }
 0x12a   : > { %v2032_v27 = vpop.f32.mrb[17].mxu0  ;;  %v522_v13 = vmul.f32 0.044194173, %v492_v58 }
 0x12b   : > { %v561_v35 = vmax.f32 %v2026_v20, %v2032_v27 }
 0x12c   : > { %v587_v18 = vsub.f32 %v1954_v24, %v522_v13  ;;  %v588_v19 = vsub.f32 %v1958_v26, %v522_v13  ;;  %v780_v24 = vshrl.u32 %v779_v25, 7 }
 0x12d   : > { %507 = vadd.xlane.f32.xlu1 %v482_v59  ;;  %562 = vmax.xlane.f32.xlu0 %v561_v35  ;;  %v2038_v38 = vpop.f32.mrb[18].mxu0 }
 0x12e   : > { %v2042_v39 = vpop.f32.mrb[19].mxu0  ;;  %v785_v58 = vsub.s32 1, %v780_v24 }
 0x12f   : > { %v564_v41 = vmax.f32 %v2038_v38, %v2042_v39 }
 0x131   : > { %509 = vadd.xlane.f32.xlu1 %v483_v60  ;;  %565 = vmax.xlane.f32.xlu0 %v564_v41  ;;  %v2046_v42 = vpop.f32.mrb[20].mxu0 }
 0x132   : > { %v2050_v44 = vpop.f32.mrb[21].mxu0 }
 0x133   : > { %v567_v45 = vmax.f32 %v2046_v42, %v2050_v44 }
 0x135   : > { %511 = vadd.xlane.f32.xlu1 %v484_v43  ;;  %568 = vmax.xlane.f32.xlu0 %v567_v45  ;;  %v2054_v61 = vpop.f32.mrb[22].mxu0 }
 0x136   : > { %v2058_v48 = vpop.f32.mrb[23].mxu0 }
 0x137   : > { %v570_v49 = vmax.f32 %v2054_v61, %v2058_v48 }
 0x139   : > { %513 = vadd.xlane.f32.xlu1 %v485_v47  ;;  %571 = vmax.xlane.f32.xlu0 %v570_v49  ;;  %v2062_v62 = vpop.f32.mrb[24].mxu0 }
 0x13a   : > { %v2066_v52 = vpop.f32.mrb[25].mxu0 }
 0x13b   : > { %v573_v53 = vmax.f32 %v2062_v62, %v2066_v52 }
 0x13d   : > { %515 = vadd.xlane.f32.xlu1 %v486_v51  ;;  %574 = vmax.xlane.f32.xlu0 %v573_v53  ;;  %v2070_v63 = vpop.f32.mrb[26].mxu0 }
 0x13e   : > { %v2074_v55 = vpop.f32.mrb[27].mxu0 }
 0x13f   : > { %v576_v57 = vmax.f32 %v2070_v63, %v2074_v55 }
 0x141   : > { %517 = vadd.xlane.f32.xlu1 %v487_v54  ;;  %577 = vmax.xlane.f32.xlu0 %v576_v57  ;;  %v2078_v0 = vpop.f32.mrb[28].mxu0  ;;  %v781_v54 = vsub.s32 0, %v780_v24 }
 0x142   : > { %v2082_v4 = vpop.f32.mrb[29].mxu0 }
 0x143   : > { %v579_v6 = vmax.f32 %v2078_v0, %v2082_v4 }
 0x145   : > { %519 = vadd.xlane.f32.xlu1 %v488_v3  ;;  %580 = vmax.xlane.f32.xlu0 %v579_v6  ;;  %v2086_v1 = vpop.f32.mrb[30].mxu0  ;;  %v777_v6 = vld [vmem:[%s262_s27] sm:$0x3] }
 0x146   : > { %v2088_v7 = vpop.f32.mrb[31].mxu0 }
 0x147   : > { %v582_v8 = vmax.f32 %v2086_v1, %v2088_v7 }
 0x149   : > { %583 = vmax.xlane.f32.xlu1 %v582_v8 }
 0x19a   : > { %v539_v15 = vpop.xlane.xlu1 %538 }
 0x19b   : > { %v617_v16 = vsub.f32 %v585_v2, %v539_v15  ;;  %v618_v17 = vsub.f32 %v586_v12, %v539_v15 }
 0x19d   : > { %v649_v59 = vmul.f32 1.442695, %v617_v16  ;;  %v651_v23 = vmul.f32 1.442695, %v618_v17  ;;  %v2106_v16 = vrot.slane %v777_v6, %v781_v54 }
 0x19e   : > { %v494_v29 = vpop.xlane.xlu1 %493  ;;  %v542_v31 = vpop.xlane.xlu0 %541 }
 0x19f   : > { %1453 = vpow2.f32 %v649_v59  ;;  %v523_v33 = vmul.f32 0.044194173, %v494_v29  ;;  %v619_v35 = vsub.f32 %v587_v18, %v542_v31  ;;  %v620_v21 = vsub.f32 %v588_v19, %v542_v31 }
 0x1a0   : > { %1455 = vpow2.f32 %v651_v23  ;;  %v2108_v29 = vrot.slane %v777_v6, %v785_v58 }
 0x1a1   : > { %v589_v22 = vsub.f32 %v1962_v28, %v523_v33  ;;  %v590_v37 = vsub.f32 %v1966_v30, %v523_v33  ;;  %v653_v60 = vmul.f32 1.442695, %v619_v35  ;;  %v655_v41 = vmul.f32 1.442695, %v620_v21 }
 0x1a2   : > { %v496_v43 = vpop.xlane.xlu1 %495  ;;  %v545_v26 = vpop.xlane.xlu0 %544 }
 0x1a3   : > { %1457 = vpow2.f32 %v653_v60  ;;  %v524_v45 = vmul.f32 0.044194173, %v496_v43  ;;  %v621_v47 = vsub.f32 %v589_v22, %v545_v26  ;;  %v622_v49 = vsub.f32 %v590_v37, %v545_v26 }
 0x1a4   : > { %1459 = vpow2.f32 %v655_v41 }
 0x1a5   : > { %v591_v51 = vsub.f32 %v1970_v32, %v524_v45  ;;  %v592_v28 = vsub.f32 %v1974_v34, %v524_v45  ;;  %v657_v53 = vmul.f32 1.442695, %v621_v47  ;;  %v659_v30 = vmul.f32 1.442695, %v622_v49 }
 0x1a6   : > { %v498_v57 = vpop.xlane.xlu1 %497  ;;  %v548_v3 = vpop.xlane.xlu0 %547 }
 0x1a7   : > { %1461 = vpow2.f32 %v657_v53  ;;  %v525_v8 = vmul.f32 0.044194173, %v498_v57  ;;  %v623_v9 = vsub.f32 %v591_v51, %v548_v3  ;;  %v624_v10 = vsub.f32 %v592_v28, %v548_v3 }
 0x1a8   : > { %1463 = vpow2.f32 %v659_v30 }
 0x1a9   : > { %v1454_v2 = vpop.eup %1453  ;;  %v593_v12 = vsub.f32 %v1978_v36, %v525_v8  ;;  %v594_v13 = vsub.f32 %v1984_v40, %v525_v8  ;;  %v661_v32 = vmul.f32 1.442695, %v623_v9  ;;  %v663_v15 = vmul.f32 1.442695, %v624_v10 }
 0x1aa   : > { %v1456_v34 = vpop.eup %1455  ;;  %v500_v17 = vpop.xlane.xlu1 %499  ;;  %v713_v19 = vadd.f32 0.0001, %v1454_v2 }
 0x1ab   : > { %v551_v18 = vpop.xlane.xlu0 %550  ;;  %1465 = vpow2.f32 %v661_v32  ;;  %v526_v59 = vmul.f32 0.044194173, %v500_v17  ;;  %v714_v31 = vadd.f32 0.0001, %v1456_v34 }
 0x1ac   : > { %v625_v23 = vsub.f32 %v593_v12, %v551_v18  ;;  %v626_v25 = vsub.f32 %v594_v13, %v551_v18  ;;  %1467 = vpow2.f32 %v663_v15  ;;  %v745_v33 = vmul.f32 0.0625, %v713_v19 }
 0x1ad   : > { %v1458_v36 = vpop.eup %1457  ;;  %v595_v40 = vsub.f32 %v1990_v46, %v526_v59  ;;  %v596_v35 = vsub.f32 %v1996_v50, %v526_v59  ;;  %v746_v60 = vmul.f32 0.0625, %v714_v31 }
 0x1ae   : > { %v665_v21 = vmul.f32 1.442695, %v625_v23  ;;  %v667_v22 = vmul.f32 1.442695, %v626_v25  ;;  %v1460_v37 = vpop.eup %1459  ;;  %v502_v41 = vpop.xlane.xlu1 %501  ;;  %v789_v43 = vmul.f32 %v2106_v16, %v745_v33  ;;  %v715_v26 = vadd.f32 0.0001, %v1458_v36 }
 0x1af   : > { %v554_v24 = vpop.xlane.xlu0 %553  ;;  %v527_v45 = vmul.f32 0.044194173, %v502_v41  ;;  %965 = vmatprep.mubr.f32.mxu1 %v746_v60  ;;  %v716_v51 = vadd.f32 0.0001, %v1460_v37  ;;  %v790_v46 = vmul.f32 %v2108_v29, %v746_v60 }
 0x1b0   : > { %1469 = vpow2.f32 %v665_v21  ;;  %v627_v47 = vsub.f32 %v595_v40, %v554_v24  ;;  %v628_v49 = vsub.f32 %v596_v35, %v554_v24  ;;  %v747_v28 = vmul.f32 0.0625, %v715_v26  ;;  %966 = vmatmul.mubr.f32.vlgmr.msra.gmra.mrb[0].mxu1 %v745_v33 }
 0x1b1   : > { %1471 = vpow2.f32 %v667_v22  ;;  %v1462_v50 = vpop.eup %1461  ;;  %v597_v53 = vsub.f32 %v2002_v56, %v527_v45  ;;  %v598_v30 = vsub.f32 %v2008_v5, %v527_v45  ;;  %v748_v8 = vmul.f32 0.0625, %v716_v51 }
 0x1b2   : > { %v669_v54 = vmul.f32 1.442695, %v627_v47  ;;  %v671_v57 = vmul.f32 1.442695, %v628_v49  ;;  %v1464_v3 = vpop.eup %1463  ;;  %v504_v6 = vpop.xlane.xlu1 %503  ;;  %v821_v10 = vadd.f32 %v790_v46, %v789_v43  ;;  %v791_v58 = vmul.f32 %v2106_v16, %v747_v28 }
 0x1b3   : > { %v557_v9 = vpop.xlane.xlu0 %556  ;;  %v717_v2 = vadd.f32 0.0001, %v1462_v50  ;;  %v528_v12 = vmul.f32 0.044194173, %v504_v6  ;;  %970 = vmatprep.mubr.f32.mxu1 %v748_v8  ;;  %v718_v56 = vadd.f32 0.0001, %v1464_v3  ;;  %v792_v5 = vmul.f32 %v2108_v29, %v748_v8 }
 0x1b4   : > { %1473 = vpow2.f32 %v669_v54  ;;  %v629_v13 = vsub.f32 %v597_v53, %v557_v9  ;;  %v630_v32 = vsub.f32 %v598_v30, %v557_v9  ;;  %822 = vadd.xlane.f32.xlu0 %v821_v10  ;;  %971 = vmatmul.mubr.f32.gmra.mrb[2].mxu1 %v747_v28 }
 0x1b5   : > { %1475 = vpow2.f32 %v671_v57  ;;  %v749_v15 = vmul.f32 0.0625, %v717_v2  ;;  %v1466_v34 = vpop.eup %1465  ;;  %v599_v17 = vsub.f32 %v2014_v11, %v528_v12  ;;  %v600_v18 = vsub.f32 %v2020_v14, %v528_v12 }
 0x1b6   : > { %v673_v19 = vmul.f32 1.442695, %v629_v13  ;;  %v675_v59 = vmul.f32 1.442695, %v630_v32  ;;  %v1468_v23 = vpop.eup %1467  ;;  %v506_v25 = vpop.xlane.xlu1 %505  ;;  %v750_v31 = vmul.f32 0.0625, %v718_v56  ;;  %v824_v36 = vadd.f32 %v792_v5, %v791_v58 }
 0x1b7   : > { %v560_v33 = vpop.xlane.xlu0 %559  ;;  %v793_v40 = vmul.f32 %v2106_v16, %v749_v15  ;;  %v719_v35 = vadd.f32 0.0001, %v1466_v34  ;;  %v529_v21 = vmul.f32 0.044194173, %v506_v25  ;;  %v720_v11 = vadd.f32 0.0001, %v1468_v23 }
 0x1b8   : > { %1477 = vpow2.f32 %v673_v19  ;;  %v631_v22 = vsub.f32 %v599_v17, %v560_v33  ;;  %v632_v37 = vsub.f32 %v600_v18, %v560_v33  ;;  %975 = vmatprep.mubr.f32.mxu1 %v750_v31  ;;  %825 = vadd.xlane.f32.xlu1 %v824_v36  ;;  %v794_v14 = vmul.f32 %v2108_v29, %v750_v31 }
 0x1b9   : > { %1479 = vpow2.f32 %v675_v59  ;;  %v751_v60 = vmul.f32 0.0625, %v719_v35  ;;  %v601_v24 = vsub.f32 %v2026_v20, %v529_v21  ;;  %v602_v43 = vsub.f32 %v2032_v27, %v529_v21  ;;  %976 = vmatmul.mubr.f32.gmra.mrb[4].mxu1 %v749_v15 }
 0x1ba   : > { %v1470_v41 = vpop.eup %1469  ;;  %v677_v26 = vmul.f32 1.442695, %v631_v22  ;;  %v679_v45 = vmul.f32 1.442695, %v632_v37  ;;  %v508_v49 = vpop.xlane.xlu1 %507  ;;  %v752_v51 = vmul.f32 0.0625, %v720_v11  ;;  %v827_v28 = vadd.f32 %v794_v14, %v793_v40 }
 0x1bb   : > { %v1472_v47 = vpop.eup %1471  ;;  %v563_v46 = vpop.xlane.xlu0 %562  ;;  %v795_v50 = vmul.f32 %v2106_v16, %v751_v60  ;;  %v721_v53 = vadd.f32 0.0001, %v1470_v41  ;;  %v530_v30 = vmul.f32 0.044194173, %v508_v49 }
 0x1bc   : > { %1481 = vpow2.f32 %v677_v26  ;;  %v633_v54 = vsub.f32 %v601_v24, %v563_v46  ;;  %v634_v57 = vsub.f32 %v602_v43, %v563_v46  ;;  %980 = vmatprep.mubr.f32.mxu1 %v752_v51  ;;  %828 = vadd.xlane.f32.xlu0 %v827_v28  ;;  %v722_v20 = vadd.f32 0.0001, %v1472_v47 }
 0x1bd   : > { %1483 = vpow2.f32 %v679_v45  ;;  %v796_v27 = vmul.f32 %v2108_v29, %v752_v51  ;;  %v753_v3 = vmul.f32 0.0625, %v721_v53  ;;  %v603_v8 = vsub.f32 %v2038_v38, %v530_v30  ;;  %981 = vmatmul.mubr.f32.gmra.mrb[6].mxu1 %v751_v60 }
 0x1be   : > { %v1474_v6 = vpop.eup %1473  ;;  %v604_v9 = vsub.f32 %v2042_v39, %v530_v30  ;;  %v681_v10 = vmul.f32 1.442695, %v633_v54  ;;  %v683_v58 = vmul.f32 1.442695, %v634_v57  ;;  %v510_v12 = vpop.xlane.xlu1 %509  ;;  %v754_v13 = vmul.f32 0.0625, %v722_v20 }
 0x1bf   : > { %v1476_v2 = vpop.eup %1475  ;;  %v566_v32 = vpop.xlane.xlu0 %565  ;;  %v830_v56 = vadd.f32 %v796_v27, %v795_v50  ;;  %v797_v5 = vmul.f32 %v2106_v16, %v753_v3  ;;  %v723_v15 = vadd.f32 0.0001, %v1474_v6  ;;  %v531_v34 = vmul.f32 0.044194173, %v510_v12 }
 0x1c0   : > { %1485 = vpow2.f32 %v681_v10  ;;  %v635_v17 = vsub.f32 %v603_v8, %v566_v32  ;;  %v636_v18 = vsub.f32 %v604_v9, %v566_v32  ;;  %985 = vmatprep.mubr.f32.mxu1 %v754_v13  ;;  %v724_v38 = vadd.f32 0.0001, %v1476_v2 }
 0x1c1   : > { %1487 = vpow2.f32 %v683_v58  ;;  %831 = vadd.xlane.f32.xlu1 %v830_v56  ;;  %v798_v39 = vmul.f32 %v2108_v29, %v754_v13  ;;  %v755_v19 = vmul.f32 0.0625, %v723_v15  ;;  %v605_v23 = vsub.f32 %v2046_v42, %v531_v34  ;;  %986 = vmatmul.mubr.f32.gmra.mrb[8].mxu1 %v753_v3 }
 0x1c2   : > { %v1478_v59 = vpop.eup %1477  ;;  %v606_v25 = vsub.f32 %v2050_v44, %v531_v34  ;;  %v685_v31 = vmul.f32 1.442695, %v635_v17  ;;  %v687_v33 = vmul.f32 1.442695, %v636_v18  ;;  %v512_v40 = vpop.xlane.xlu1 %511  ;;  %v756_v35 = vmul.f32 0.0625, %v724_v38 }
 0x1c3   : > { %v1480_v36 = vpop.eup %1479  ;;  %v569_v21 = vpop.xlane.xlu0 %568  ;;  %v833_v22 = vadd.f32 %v798_v39, %v797_v5  ;;  %v799_v37 = vmul.f32 %v2106_v16, %v755_v19  ;;  %v725_v11 = vadd.f32 0.0001, %v1478_v59  ;;  %v532_v14 = vmul.f32 0.044194173, %v512_v40 }
 0x1c4   : > { %1489 = vpow2.f32 %v685_v31  ;;  %v637_v60 = vsub.f32 %v605_v23, %v569_v21  ;;  %v638_v41 = vsub.f32 %v606_v25, %v569_v21  ;;  %990 = vmatprep.mubr.f32.mxu1 %v756_v35  ;;  %v726_v42 = vadd.f32 0.0001, %v1480_v36 }
 0x1c5   : > { %1491 = vpow2.f32 %v687_v33  ;;  %834 = vadd.xlane.f32.xlu0 %v833_v22  ;;  %v800_v44 = vmul.f32 %v2108_v29, %v756_v35  ;;  %v757_v24 = vmul.f32 0.0625, %v725_v11  ;;  %v607_v26 = vsub.f32 %v2054_v61, %v532_v14  ;;  %991 = vmatmul.mubr.f32.gmra.mrb[10].mxu1 %v755_v19 }
 0x1c6   : > { %v1482_v43 = vpop.eup %1481  ;;  %v608_v45 = vsub.f32 %v2058_v48, %v532_v14  ;;  %v689_v47 = vmul.f32 1.442695, %v637_v60  ;;  %v691_v49 = vmul.f32 1.442695, %v638_v41  ;;  %v514_v46 = vpop.xlane.xlu1 %513  ;;  %v758_v28 = vmul.f32 0.0625, %v726_v42 }
 0x1c7   : > { %v1484_v51 = vpop.eup %1483  ;;  %v572_v50 = vpop.xlane.xlu0 %571  ;;  %v836_v53 = vadd.f32 %v800_v44, %v799_v37  ;;  %v801_v30 = vmul.f32 %v2106_v16, %v757_v24  ;;  %v727_v54 = vadd.f32 0.0001, %v1482_v43  ;;  %v533_v57 = vmul.f32 0.044194173, %v514_v46 }
 0x1c8   : > { %1493 = vpow2.f32 %v689_v47  ;;  %v639_v20 = vsub.f32 %v607_v26, %v572_v50  ;;  %v640_v27 = vsub.f32 %v608_v45, %v572_v50  ;;  %995 = vmatprep.mubr.f32.mxu1 %v758_v28  ;;  %v728_v61 = vadd.f32 0.0001, %v1484_v51 }
 0x1c9   : > { %1495 = vpow2.f32 %v691_v49  ;;  %837 = vadd.xlane.f32.xlu1 %v836_v53  ;;  %v802_v48 = vmul.f32 %v2108_v29, %v758_v28  ;;  %v759_v3 = vmul.f32 0.0625, %v727_v54  ;;  %v609_v8 = vsub.f32 %v2062_v62, %v533_v57  ;;  %996 = vmatmul.mubr.f32.gmra.mrb[12].mxu1 %v757_v24 }
 0x1ca   : > { %v1486_v6 = vpop.eup %1485  ;;  %v610_v9 = vsub.f32 %v2066_v52, %v533_v57  ;;  %v693_v10 = vmul.f32 1.442695, %v639_v20  ;;  %v695_v58 = vmul.f32 1.442695, %v640_v27  ;;  %v516_v12 = vpop.xlane.xlu1 %515  ;;  %v760_v13 = vmul.f32 0.0625, %v728_v61 }
 0x1cb   : > { %v1488_v2 = vpop.eup %1487  ;;  %v575_v32 = vpop.xlane.xlu0 %574  ;;  %v839_v56 = vadd.f32 %v802_v48, %v801_v30  ;;  %v803_v5 = vmul.f32 %v2106_v16, %v759_v3  ;;  %v729_v15 = vadd.f32 0.0001, %v1486_v6  ;;  %v534_v34 = vmul.f32 0.044194173, %v516_v12 }
 0x1cc   : > { %1497 = vpow2.f32 %v693_v10  ;;  %v641_v17 = vsub.f32 %v609_v8, %v575_v32  ;;  %v642_v18 = vsub.f32 %v610_v9, %v575_v32  ;;  %1000 = vmatprep.mubr.f32.mxu1 %v760_v13  ;;  %v730_v62 = vadd.f32 0.0001, %v1488_v2 }
 0x1cd   : > { %1499 = vpow2.f32 %v695_v58  ;;  %840 = vadd.xlane.f32.xlu0 %v839_v56  ;;  %v804_v52 = vmul.f32 %v2108_v29, %v760_v13  ;;  %v761_v38 = vmul.f32 0.0625, %v729_v15  ;;  %v611_v19 = vsub.f32 %v2070_v63, %v534_v34  ;;  %1001 = vmatmul.mubr.f32.gmra.mrb[14].mxu1 %v759_v3 }
 0x1ce   : > { %v1490_v39 = vpop.eup %1489  ;;  %v612_v59 = vsub.f32 %v2074_v55, %v534_v34  ;;  %v697_v23 = vmul.f32 1.442695, %v641_v17  ;;  %v699_v25 = vmul.f32 1.442695, %v642_v18  ;;  %v518_v33 = vpop.xlane.xlu1 %517  ;;  %v762_v36 = vmul.f32 0.0625, %v730_v62 }
 0x1cf   : > { %v1492_v31 = vpop.eup %1491  ;;  %v578_v40 = vpop.xlane.xlu0 %577  ;;  %v842_v35 = vadd.f32 %v804_v52, %v803_v5  ;;  %v805_v21 = vmul.f32 %v2106_v16, %v761_v38  ;;  %v731_v22 = vadd.f32 0.0001, %v1490_v39  ;;  %v535_v37 = vmul.f32 0.044194173, %v518_v33 }
 0x1d0   : > { %1501 = vpow2.f32 %v697_v23  ;;  %v643_v11 = vsub.f32 %v611_v19, %v578_v40  ;;  %v644_v14 = vsub.f32 %v612_v59, %v578_v40  ;;  %1005 = vmatprep.mubr.f32.mxu1 %v762_v36  ;;  %v732_v63 = vadd.f32 0.0001, %v1492_v31 }
 0x1d1   : > { %1503 = vpow2.f32 %v699_v25  ;;  %843 = vadd.xlane.f32.xlu1 %v842_v35  ;;  %v806_v55 = vmul.f32 %v2108_v29, %v762_v36  ;;  %v763_v60 = vmul.f32 0.0625, %v731_v22  ;;  %v613_v42 = vsub.f32 %v2078_v0, %v535_v37  ;;  %1006 = vmatmul.mubr.f32.gmra.mrb[16].mxu1 %v761_v38 }
 0x1d2   : > { %v1494_v41 = vpop.eup %1493  ;;  %v614_v44 = vsub.f32 %v2082_v4, %v535_v37  ;;  %v701_v24 = vmul.f32 1.442695, %v643_v11  ;;  %v703_v43 = vmul.f32 1.442695, %v644_v14  ;;  %v520_v45 = vpop.xlane.xlu1 %519  ;;  %v764_v47 = vmul.f32 0.0625, %v732_v63 }
 0x1d3   : > { %v1496_v26 = vpop.eup %1495  ;;  %v845_v49 = vadd.f32 %v806_v55, %v805_v21  ;;  %v581_v51 = vpop.xlane.xlu0 %580  ;;  %v807_v46 = vmul.f32 %v2106_v16, %v763_v60  ;;  %v733_v28 = vadd.f32 0.0001, %v1494_v41  ;;  %v536_v50 = vmul.f32 0.044194173, %v520_v45 }
 0x1d4   : > { %1505 = vpow2.f32 %v701_v24  ;;  %v645_v53 = vsub.f32 %v613_v42, %v581_v51  ;;  %v646_v30 = vsub.f32 %v614_v44, %v581_v51  ;;  %1010 = vmatprep.mubr.f32.mxu1 %v764_v47  ;;  %v734_v0 = vadd.f32 0.0001, %v1496_v26 }
 0x1d5   : > { %1507 = vpow2.f32 %v703_v43  ;;  %846 = vadd.xlane.f32.xlu0 %v845_v49  ;;  %v808_v4 = vmul.f32 %v2108_v29, %v764_v47  ;;  %v765_v54 = vmul.f32 0.0625, %v733_v28  ;;  %v615_v20 = vsub.f32 %v2086_v1, %v536_v50  ;;  %1011 = vmatmul.mubr.f32.gmra.mrb[18].mxu1 %v763_v60 }
 0x1d6   : > { %v1498_v57 = vpop.eup %1497  ;;  %v616_v27 = vsub.f32 %v2088_v7, %v536_v50  ;;  %v705_v61 = vmul.f32 1.442695, %v645_v53  ;;  %v707_v48 = vmul.f32 1.442695, %v646_v30  ;;  %v766_v6 = vmul.f32 0.0625, %v734_v0  ;;  %v584_v9 = vpop.xlane.xlu1 %583 }
 0x1d7   : > { %v1500_v3 = vpop.eup %1499  ;;  %v848_v8 = vadd.f32 %v808_v4, %v807_v46  ;;  %v809_v10 = vmul.f32 %v2106_v16, %v765_v54  ;;  %v735_v58 = vadd.f32 0.0001, %v1498_v57  ;;  %v647_v2 = vsub.f32 %v615_v20, %v584_v9 }
 0x1d8   : > { %1509 = vpow2.f32 %v705_v61  ;;  %v648_v12 = vsub.f32 %v616_v27, %v584_v9  ;;  %v736_v13 = vadd.f32 0.0001, %v1500_v3  ;;  %1015 = vmatprep.mubr.f32.mxu1 %v766_v6  ;;  %v810_v1 = vmul.f32 %v2108_v29, %v766_v6 }
 0x1d9   : > { %1511 = vpow2.f32 %v707_v48  ;;  %849 = vadd.xlane.f32.xlu1 %v848_v8  ;;  %v767_v7 = vmul.f32 0.0625, %v735_v58  ;;  %v709_v56 = vmul.f32 1.442695, %v647_v2  ;;  %1016 = vmatmul.mubr.f32.gmra.mrb[20].mxu1 %v765_v54 }
 0x1da   : > { %v1502_v32 = vpop.eup %1501  ;;  %v711_v5 = vmul.f32 1.442695, %v648_v12  ;;  %v768_v15 = vmul.f32 0.0625, %v736_v13  ;;  %v851_v17 = vadd.f32 %v810_v1, %v809_v10 }
 0x1db   : > { %v1504_v34 = vpop.eup %1503  ;;  %v811_v18 = vmul.f32 %v2106_v16, %v767_v7  ;;  %v737_v62 = vadd.f32 0.0001, %v1502_v32  ;;  %1513 = vpow2.f32 %v709_v56 }
 0x1dc   : > { %1020 = vmatprep.mubr.f32.mxu1 %v768_v15  ;;  %v738_v52 = vadd.f32 0.0001, %v1504_v34  ;;  %v812_v38 = vmul.f32 %v2108_v29, %v768_v15  ;;  %1515 = vpow2.f32 %v711_v5  ;;  %852 = vadd.xlane.f32.xlu0 %v851_v17 }
 0x1dd   : > { %v769_v39 = vmul.f32 0.0625, %v737_v62  ;;  %1021 = vmatmul.mubr.f32.gmra.mrb[22].mxu1 %v767_v7 }
 0x1de   : > { %v1506_v19 = vpop.eup %1505  ;;  %v770_v59 = vmul.f32 0.0625, %v738_v52  ;;  %v854_v23 = vadd.f32 %v812_v38, %v811_v18 }
 0x1df   : > { %v1508_v25 = vpop.eup %1507  ;;  %v813_v31 = vmul.f32 %v2106_v16, %v769_v39  ;;  %v739_v33 = vadd.f32 0.0001, %v1506_v19 }
 0x1e0   : > { %1025 = vmatprep.mubr.f32.mxu1 %v770_v59  ;;  %855 = vadd.xlane.f32.xlu1 %v854_v23  ;;  %v740_v36 = vadd.f32 0.0001, %v1508_v25  ;;  %v814_v40 = vmul.f32 %v2108_v29, %v770_v59 }
 0x1e1   : > { %v771_v35 = vmul.f32 0.0625, %v739_v33  ;;  %1026 = vmatmul.mubr.f32.gmra.mrb[24].mxu1 %v769_v39 }
 0x1e2   : > { %v1510_v21 = vpop.eup %1509  ;;  %v772_v22 = vmul.f32 0.0625, %v740_v36  ;;  %v857_v37 = vadd.f32 %v814_v40, %v813_v31 }
 0x1e3   : > { %v1512_v11 = vpop.eup %1511  ;;  %v815_v14 = vmul.f32 %v2106_v16, %v771_v35  ;;  %v741_v63 = vadd.f32 0.0001, %v1510_v21 }
 0x1e4   : > { %1030 = vmatprep.mubr.f32.mxu1 %v772_v22  ;;  %858 = vadd.xlane.f32.xlu0 %v857_v37  ;;  %v742_v55 = vadd.f32 0.0001, %v1512_v11  ;;  %v816_v60 = vmul.f32 %v2108_v29, %v772_v22 }
 0x1e5   : > { %v773_v41 = vmul.f32 0.0625, %v741_v63  ;;  %v1514_v42 = vpop.eup %1513  ;;  %1031 = vmatmul.mubr.f32.gmra.mrb[26].mxu1 %v771_v35 }
 0x1e6   : > { %v774_v44 = vmul.f32 0.0625, %v742_v55  ;;  %v860_v24 = vadd.f32 %v816_v60, %v815_v14  ;;  %v1516_v43 = vpop.eup %1515  ;;  %v743_v45 = vadd.f32 0.0001, %v1514_v42 }
 0x1e7   : > { %v817_v26 = vmul.f32 %v2106_v16, %v773_v41  ;;  %v744_v49 = vadd.f32 0.0001, %v1516_v43 }
 0x1e8   : > { %1035 = vmatprep.mubr.f32.mxu1 %v774_v44  ;;  %861 = vadd.xlane.f32.xlu1 %v860_v24  ;;  %v818_v47 = vmul.f32 %v2108_v29, %v774_v44  ;;  %v775_v51 = vmul.f32 0.0625, %v743_v45 }
 0x1e9   : > { %1036 = vmatmul.mubr.f32.gmra.mrb[28].mxu1 %v773_v41  ;;  %v776_v28 = vmul.f32 0.0625, %v744_v49 }
 0x1ea   : > { %v863_v46 = vadd.f32 %v818_v47, %v817_v26  ;;  %v819_v50 = vmul.f32 %v2106_v16, %v775_v51 }
 0x1eb   : > { %1040 = vmatprep.mubr.f32.mxu1 %v776_v28  ;;  %v820_v53 = vmul.f32 %v2108_v29, %v776_v28 }
 0x1ec   : > { %864 = vadd.xlane.f32.xlu0 %v863_v46 }
 0x1ed   : > { %1041 = vmatmul.mubr.f32.gmra.mrb[30].mxu1 %v775_v51  ;;  %v866_v30 = vadd.f32 %v820_v53, %v819_v50 }
 0x1ef   : > { %867 = vadd.xlane.f32.xlu1 %v866_v30 }
 0x241   : > { %v823_v0 = vpop.xlane.xlu0 %822 }
 0x242   : > { %1517 = vrcp.f32 %v823_v0 }
 0x245   : > { %v826_v4 = vpop.xlane.xlu1 %825 }
 0x246   : > { %1519 = vrcp.f32 %v826_v4 }
 0x249   : > { %v829_v54 = vpop.xlane.xlu0 %828 }
 0x24a   : > { %1521 = vrcp.f32 %v829_v54 }
 0x24c   : > { %v1518_v61 = vpop.eup %1517 }
 0x24e   : > { %v832_v27 = vpop.xlane.xlu1 %831 }
 0x24f   : > { %1523 = vrcp.f32 %v832_v27 }
 0x250   : > { %v1520_v9 = vpop.eup %1519 }
 0x252   : > { %v835_v6 = vpop.xlane.xlu0 %834 }
 0x253   : > { %1525 = vrcp.f32 %v835_v6 }
 0x254   : > { %v1522_v1 = vpop.eup %1521 }
 0x256   : > { %v838_v12 = vpop.xlane.xlu1 %837 }
 0x257   : > { %1527 = vrcp.f32 %v838_v12 }
 0x259   : > { %v1524_v34 = vpop.eup %1523 }
 0x25a   : > { %v841_v5 = vpop.xlane.xlu0 %840 }
 0x25b   : > { %1529 = vrcp.f32 %v841_v5 }
 0x25d   : > { %v1526_v39 = vpop.eup %1525 }
 0x25e   : > { %v844_v52 = vpop.xlane.xlu1 %843 }
 0x25f   : > { %1531 = vrcp.f32 %v844_v52 }
 0x261   : > { %v1528_v33 = vpop.eup %1527 }
 0x262   : > { %v847_v25 = vpop.xlane.xlu0 %846 }
 0x263   : > { %1533 = vrcp.f32 %v847_v25 }
 0x265   : > { %v1530_v37 = vpop.eup %1529 }
 0x266   : > { %v850_v21 = vpop.xlane.xlu1 %849 }
 0x267   : > { %1535 = vrcp.f32 %v850_v21 }
 0x269   : > { %v853_v55 = vpop.xlane.xlu0 %852  ;;  %v1532_v41 = vpop.eup %1531 }
 0x26a   : > { %1537 = vrcp.f32 %v853_v55 }
 0x26d   : > { %v856_v43 = vpop.xlane.xlu1 %855  ;;  %v1534_v45 = vpop.eup %1533 }
 0x26e   : > { %1539 = vrcp.f32 %v856_v43 }
 0x271   : > { %v859_v46 = vpop.xlane.xlu0 %858  ;;  %v1536_v50 = vpop.eup %1535 }
 0x272   : > { %1541 = vrcp.f32 %v859_v46 }
 0x275   : > { %v862_v4 = vpop.xlane.xlu1 %861 }
 0x276   : > { %1543 = vrcp.f32 %v862_v4 }
 0x283   : > { %v1267_v57 = vpop.f32.mrb[0].mxu1 }
 0x284   : > { %v1268_v20 = vpop.f32.mrb[1].mxu1 }
 0x285   : > { %v1269_v16 = vadd.f32 %v1268_v20, %v1267_v57  ;;  %v1538_v57 = vpop.eup %1537 }
 0x287   : > { %v1062_v48 = vmul.f32 %v1518_v61, %v1269_v16  ;;  %v1270_v3 = vpop.f32.mrb[2].mxu1  ;;  %v865_v61 = vpop.xlane.xlu0 %864 }
 0x288   : > { %v1271_v29 = vpop.f32.mrb[3].mxu1  ;;  %1545 = vrcp.f32 %v865_v61 }
 0x289   : > { %1078 = vst [vmem:[%s2167_s5] sm:$0xff] %v1062_v48  ;;  %v1272_v8 = vadd.f32 %v1271_v29, %v1270_v3  ;;  %v1540_v3 = vpop.eup %1539 }
 0x28b   : > { %v1063_v10 = vmul.f32 %v1520_v9, %v1272_v8  ;;  %v868_v9 = vpop.xlane.xlu1 %867 }
 0x28c   : > { %v1273_v58 = vpop.f32.mrb[4].mxu1  ;;  %1547 = vrcp.f32 %v868_v9 }
 0x28d   : > { %v1274_v2 = vpop.f32.mrb[5].mxu1  ;;  %1079 = vst [vmem:[%s2167_s5 + $0x8] sm:$0xff] %v1063_v10 }
 0x28e   : > { %v1275_v13 = vadd.f32 %v1274_v2, %v1273_v58  ;;  %v1542_v58 = vpop.eup %1541 }
 0x290   : > { %v1064_v7 = vmul.f32 %v1522_v1, %v1275_v13  ;;  %v1276_v32 = vpop.f32.mrb[6].mxu1 }
 0x291   : > { %v1277_v56 = vpop.f32.mrb[7].mxu1 }
 0x292   : > { %1080 = vst [vmem:[%s2167_s5 + $0x10] sm:$0xff] %v1064_v7  ;;  %v1278_v15 = vadd.f32 %v1277_v56, %v1276_v32  ;;  %v1544_v7 = vpop.eup %1543 }
 0x294   : > { %v1065_v17 = vmul.f32 %v1524_v34, %v1278_v15  ;;  %v1279_v18 = vpop.f32.mrb[8].mxu1  ;;  %v1546_v34 = vpop.eup %1545 }
 0x295   : > { %v1280_v62 = vpop.f32.mrb[9].mxu1 }
 0x296   : > { %1081 = vst [vmem:[%s2167_s5 + $0x18] sm:$0xff] %v1065_v17  ;;  %v1281_v38 = vadd.f32 %v1280_v62, %v1279_v18 }
 0x298   : > { %v1066_v19 = vmul.f32 %v1526_v39, %v1281_v38  ;;  %v1282_v59 = vpop.f32.mrb[10].mxu1  ;;  %v1548_v38 = vpop.eup %1547 }
 0x299   : > { %v1283_v23 = vpop.f32.mrb[11].mxu1 }
 0x29a   : > { %1082 = vst [vmem:[%s2167_s5 + $0x20] sm:$0xff] %v1066_v19  ;;  %v1284_v31 = vadd.f32 %v1283_v23, %v1282_v59 }
 0x29c   : > { %v1067_v36 = vmul.f32 %v1528_v33, %v1284_v31  ;;  %v1285_v40 = vpop.f32.mrb[12].mxu1 }
 0x29d   : > { %v1286_v35 = vpop.f32.mrb[13].mxu1 }
 0x29e   : > { %1083 = vst [vmem:[%s2167_s5 + $0x28] sm:$0xff] %v1067_v36  ;;  %v1287_v22 = vadd.f32 %v1286_v35, %v1285_v40 }
 0x2a0   : > { %v1068_v11 = vmul.f32 %v1530_v37, %v1287_v22  ;;  %v1288_v14 = vpop.f32.mrb[14].mxu1 }
 0x2a1   : > { %v1289_v63 = vpop.f32.mrb[15].mxu1 }
 0x2a2   : > { %1084 = vst [vmem:[%s2167_s5 + $0x30] sm:$0xff] %v1068_v11  ;;  %v1290_v60 = vadd.f32 %v1289_v63, %v1288_v14 }
 0x2a4   : > { %v1069_v42 = vmul.f32 %v1532_v41, %v1290_v60  ;;  %v1291_v44 = vpop.f32.mrb[16].mxu1 }
 0x2a5   : > { %v1292_v24 = vpop.f32.mrb[17].mxu1 }
 0x2a6   : > { %1085 = vst [vmem:[%s2167_s5 + $0x38] sm:$0xff] %v1069_v42  ;;  %v1293_v26 = vadd.f32 %v1292_v24, %v1291_v44 }
 0x2a8   : > { %v1070_v47 = vmul.f32 %v1534_v45, %v1293_v26  ;;  %v1294_v49 = vpop.f32.mrb[18].mxu1 }
 0x2a9   : > { %v1295_v51 = vpop.f32.mrb[19].mxu1 }
 0x2aa   : > { %1086 = vst [vmem:[%s2167_s5 + $0x40] sm:$0xff] %v1070_v47  ;;  %v1296_v28 = vadd.f32 %v1295_v51, %v1294_v49 }
 0x2ac   : > { %v1071_v53 = vmul.f32 %v1536_v50, %v1296_v28  ;;  %v1297_v30 = vpop.f32.mrb[20].mxu1 }
 0x2ad   : > { %v1298_v0 = vpop.f32.mrb[21].mxu1 }
 0x2ae   : > { %1087 = vst [vmem:[%s2167_s5 + $0x48] sm:$0xff] %v1071_v53  ;;  %v1299_v54 = vadd.f32 %v1298_v0, %v1297_v30 }
 0x2b0   : > { %v1072_v20 = vmul.f32 %v1538_v57, %v1299_v54  ;;  %v1300_v27 = vpop.f32.mrb[22].mxu1 }
 0x2b1   : > { %v1301_v16 = vpop.f32.mrb[23].mxu1 }
 0x2b2   : > { %1088 = vst [vmem:[%s2167_s5 + $0x50] sm:$0xff] %v1072_v20  ;;  %v1302_v48 = vadd.f32 %v1301_v16, %v1300_v27 }
 0x2b4   : > { %v1073_v29 = vmul.f32 %v1540_v3, %v1302_v48  ;;  %v1303_v6 = vpop.f32.mrb[24].mxu1 }
 0x2b5   : > { %v1304_v8 = vpop.f32.mrb[25].mxu1 }
 0x2b6   : > { %1089 = vst [vmem:[%s2167_s5 + $0x58] sm:$0xff] %v1073_v29  ;;  %v1305_v10 = vadd.f32 %v1304_v8, %v1303_v6 }
 0x2b8   : > { %v1074_v2 = vmul.f32 %v1542_v58, %v1305_v10  ;;  %v1306_v12 = vpop.f32.mrb[26].mxu1 }
 0x2b9   : > { %v1307_v13 = vpop.f32.mrb[27].mxu1 }
 0x2ba   : > { %1090 = vst [vmem:[%s2167_s5 + $0x60] sm:$0xff] %v1074_v2  ;;  %v1308_v1 = vadd.f32 %v1307_v13, %v1306_v12 }
 0x2bc   : > { %v1075_v32 = vmul.f32 %v1544_v7, %v1308_v1  ;;  %v1309_v56 = vpop.f32.mrb[28].mxu1 }
 0x2bd   : > { %v1310_v5 = vpop.f32.mrb[29].mxu1 }
 0x2be   : > { %1091 = vst [vmem:[%s2167_s5 + $0x68] sm:$0xff] %v1075_v32  ;;  %v1311_v15 = vadd.f32 %v1310_v5, %v1309_v56 }
 0x2c0   : > { %v1076_v17 = vmul.f32 %v1546_v34, %v1311_v15  ;;  %v1312_v18 = vpop.f32.mrb[30].mxu1 }
 0x2c1   : > { %v1313_v62 = vpop.f32.mrb[31].mxu1 }
 0x2c2   : > { %1092 = vst [vmem:[%s2167_s5 + $0x70] sm:$0xff] %v1076_v17  ;;  %v1314_v52 = vadd.f32 %v1313_v62, %v1312_v18 }
 0x2c4   : > { %v1077_v39 = vmul.f32 %v1548_v38, %v1314_v52 }
 0x2c6   : > { %1093 = vst [vmem:[%s2167_s5 + $0x78] sm:$0xff] %v1077_v39 }
 0x2c7   : > { %1562 = shalt.err (!%p1559_p7)
}
 0x2c8   : > { %s1563_s23 = scalar_lea.hbm %s2189_s9, 2048  ;;  %s1567_s13 = scalar_lea.hbm %s2253_s4, 32768 }
 0x2c9   : > { %p1564_p9 = scmp.ne.s32.totalorder %s2189_s9, %s1563_s23  ;;  %p1568_p12 = scmp.lt.u32.totalorder %s2189_s9, %s2253_s4 }
 0x2ca   : > { %p1569_p13 = scmp.lt.u32.totalorder %s1567_s13, %s1563_s23  ;;  %p1571_p1 = scmp.lt.u32.totalorder %s1563_s23, %s2189_s9 }
 0x2cb   : > { %p1565_p10 = pnand %p1564_p9, %p1725_p3 }
 0x2cc   : > { %p1570_p0 = por %p1569_p13, %p1568_p12 }
 0x2cd   : > { %p1566_p11 = pneg %p1565_p10 }
 0x2ce   : > { %p1572_p2 = por %p1571_p1, %p1570_p0 }
 0x2d0   : > { %p1573_p4 = pnand %p1572_p2, %p1566_p11 }
 0x2d2   : > { %1576 = shalt.err (!%p1573_p4)
}
 0x2d3   : > { %s1647_s6 = smov 128   ;;  %s1648_s18 = smov 8  }
 0x2d4   : > { %1379 = dma.vmem_to_hbm [thread:$0]  (%p1725_p3), %s2192_s19, 2048, %s2189_s9, %s2197_s14, %s1647_s6, %s1647_s6, %s1648_s18  }
 0x2d5 PF: > { %p1385_p5 = scmp.ge.s32.totalorder %s1643_s22, 2  ;;  %s1125_s8 = sand.u32 1, %s1615_s15  }
 0x2d6   : > { %s1126_s25 = scalar_lea.sflag [#allocation3], %s1125_s8 }
 0x2d7   : > { %p1382_p6 = pnand %p1385_p5, %p1734_p8 }
 0x2d9   : > { %1610 = dma.done.wait (!%p1382_p6), %s1126_s25, 2048  }
 0x2da   : > { %1612 = vsyncadd (!%p1382_p6), %s1126_s25, 4294965248  ;;  %s17_s22 = sadd.s32 1, %s1643_s22   ;;  %s2262_s19 = sld [smem:[#allocation5_spill]] }
 0x2db   : > { %p14_p7 = scmp.ge.s32.totalorder %s17_s22, 18   ;;  %s2263_s28 = sld [smem:[#allocation6_spill]] }
 0x2dc   : > { %s2264_s21 = sld [smem:[#allocation7_spill]]  ;;  %s2265_s15 = smov %s1619_s16 }
 0x2dd   : > { %s2266_s16 = smov %s1623_s17  ;;  %s2267_s17 = smov %s1743_s7 }
 0x2de   : > { %s2268_s18 = smov %s1635_s20  ;;  %16 = sbr.rel (!%p14_p7) target bundleno = 5 (0x5), region = 77 }
 0x2e1   : > { %s2269_s20 = smov %s2263_s28 }
 0x2e5   :  { %1131 = vsyncpa [#allocation3], 1 }
 0x2e6   :  { %1133 = vsyncpa [#allocation3 + $0x1], 1 }

// kernel: fast_attention.2
= control target key start
LH: loop header
LB: loop body
LE: loop exit
PB: predicated region body
PF: predicated region fallthrough
CT: control target
= control target key end

     0   :  { %s3247_s0 = inlined_call_operand.hbm [shape: f32[8,256,128], index: 0, kind: input, shape index: {}]   ;;  %s3248_s1 = inlined_call_operand.hbm [shape: f32[8,256,128], index: 1, kind: input, shape index: {}]   ;;  %s3249_s2 = inlined_call_operand.vmem [shape: f32[128,256], index: 2, kind: input, shape index: {}]   ;;  %s3250_s3 = inlined_call_operand.vmem [shape: f32[8,256,128], index: 3, kind: output, shape index: {0}]   ;;  %s3251_s4 = inlined_call_operand.vmem [shape: f32[8,1,256], index: 4, kind: output, shape index: {1}]  }
   0x1   :  { %3265 = sst [smem:[#allocation18_spill]] %s3247_s0 }
   0x2   :  { %10 = vsyncpa [#allocation5], 0 }
   0x3   :  { %12 = vsyncpa [#allocation5 + $0x1], 0 }
   0x4   :  { %13 = vsyncpa [#allocation7], 0 }
   0x5   :  { %15 = vsyncpa [#allocation7 + $0x1], 0  ;;  %s2177_s15 = smov 0   ;;  %s2179_s16 = smov 0  }
   0x6   :  { %s2181_s17 = smov 0   ;;  %s2183_s18 = smov 0  }
   0x7   :  { %s2185_s19 = smov 0   ;;  %s2187_s20 = smov 0  }
   0x8   :  { %s2189_s21 = smov 0   ;;  %s2191_s22 = smov 0  }
   0x9 LB: > { %s1645_s23 = sadd.s32 4294967295, %s2141_s22   ;;  %s30_s24 = sadd.s32 1, %s2133_s20  ;;  %s2141_s22 = sphi %s2191_s22, %s21_s22   ;;  %s2137_s21 = sphi %s2189_s21, %s3318_s21   ;;  %s2133_s20 = sphi %s2187_s20, %s3317_s20   ;;  %s2129_s19 = sphi %s2185_s19, %s3316_s19   ;;  %s2125_s18 = sphi %s2183_s18, %s3315_s18   ;;  %s2121_s17 = sphi %s2181_s17, %s3314_s17   ;;  %s2117_s16 = sphi %s2179_s16, %s3313_s16   ;;  %s2113_s15 = sphi %s2177_s15, %s3312_s15  }
   0xa   : > { %p31_p0 = scmp.ge.s32.totalorder %s30_s24, 2  ;;  %s33_s25 = sadd.s32 1, %s2137_s21 }
   0xb   : > { %s42_s26 = sadd.s32 1, %s2121_s17  ;;  %p49_p1 = scmp.ne.s32.totalorder %s2121_s17, %s2117_s16 }
   0xc   : > { %s3320_s24 = smov (%p31_p0, %s30_s24), 0  ;;  %s3322_s25 = smov (!%p31_p0, %s33_s25), %s2137_s21 }
   0xd   : > { %s38_s27 = ssub.s32 %s2133_s20, %s3320_s24  ;;  %p50_p2 = scmp.eq.s32.totalorder %s2141_s22, 0 }
   0xe   : > { %p35_p3 = scmp.ge.s32.totalorder %s3322_s25, 8  ;;  %p55_p4 = scmp.ne.s32.totalorder %s2117_s16, %s2113_s15 }
   0xf   : > { %p2228_p5 = por %p50_p2, %p49_p1  ;;  %p56_p6 = scmp.eq.s32.totalorder %s1645_s23, 0 }
  0x10   : > { %s3324_s25 = smov (%p35_p3, %s3322_s25), 0  ;;  %p1871_p8 = scmp.lt.s32.totalorder %s2141_s22, 16 }
  0x11   : > { %p2234_p7 = por %p56_p6, %p55_p4  ;;  %s37_s30 = ssub.s32 %s2137_s21, %s3324_s25 }
  0x12   : > { %s39_s5 = sor.u32 %s38_s27, %s37_s30  ;;  %s2242_s6 = sand.u32 1, %s2121_s17  }
  0x13   : > { %s3267_s29 = scalar_select %p2234_p7, 1, 0 }
  0x14   : > { %p40_p9 = scmp.eq.s32.totalorder %s39_s5, 0  ;;  %s1649_s7 = sshll.u32 %s2242_s6, 7 }
  0x15   : > { %s1650_s8 = sshll.u32 %s2133_s20, 4  ;;  %s1651_s10 = sshll.u32 %s2137_s21, 5 }
  0x16   : > { %s2247_s9 = scalar_select %p40_p9, %s2121_s17, %s42_s26  }
  0x17   : > { %s2250_s11 = sadd.s32 %s1651_s10, %s1650_s8  ;;  %s187_s12 = scalar_lea.vmem [#allocation4], %s1649_s7 }
  0x18   : > { %s196_s13 = sshll.u32 %s187_s12, 4  ;;  %s1652_s14 = sshll.u32 %s2250_s11, 7  ;;  %s2255_s13 = int_to_ptr.vmem [resolvable:$true] %s196_s13 }
  0x19   : > { %s3268_s0 = sld [smem:[#allocation18_spill]]  ;;  %p2268_p10 = pnand %p1871_p8, %p2228_p5 }
  0x1a   : > { %s184_s30 = scalar_lea.sflag [#allocation5], %s2242_s6 }
  0x1b   : > { %p2013_p13 = pneg %p2268_p10 }
  0x1f   : > { %s2262_s27 = scalar_lea.hbm %s3268_s0, %s1652_s14  ;;  %s2016_s10 = scalar_lea.hbm %s3268_s0, 32768 }
  0x20   : > { %s2011_s5 = scalar_lea.hbm %s2262_s27, 2048  ;;  %p2017_p2 = scmp.lt.u32.totalorder %s2262_s27, %s3268_s0 }
  0x21   : > { %p2012_p12 = scmp.ne.s32.totalorder %s2262_s27, %s2011_s5  ;;  %p2018_p3 = scmp.lt.u32.totalorder %s2016_s10, %s2011_s5 }
  0x22   : > { %p2020_p5 = scmp.lt.u32.totalorder %s2011_s5, %s2262_s27 }
  0x23   : > { %p2014_p0 = pnand %p2013_p13, %p2012_p12  ;;  %p2019_p4 = por %p2018_p3, %p2017_p2 }
  0x25   : > { %p2015_p1 = pneg %p2014_p0  ;;  %p2021_p6 = por %p2020_p5, %p2019_p4 }
  0x27   : > { %p2022_p8 = pnand %p2021_p6, %p2015_p1 }
  0x29   : > { %2025 = shalt.err (!%p2022_p8)
}
  0x2a   : > { %s2026_s23 = scalar_lea.vmem %s2255_s13, 2048  ;;  %s2143_s28 = smov [#allocation4]  }
  0x2b   : > { %p2027_p9 = scmp.ne.s32.totalorder %s2255_s13, %s2026_s23  ;;  %s2031_s8 = sshll.u32 %s2143_s28, 4  ;;  %s2032_s8 = int_to_ptr.vmem [resolvable:$false] %s2031_s8 }
  0x2c   : > { %s2033_s12 = scalar_lea.vmem %s2032_s8, 4096  ;;  %p2034_p11 = scmp.lt.s32.totalorder %s2255_s13, %s2032_s8 }
  0x2d   : > { %p2029_p12 = pnand %p2027_p9, %p2013_p13  ;;  %p2035_p2 = scmp.lt.s32.totalorder %s2033_s12, %s2026_s23 }
  0x2f   : > { %p2030_p0 = pneg %p2029_p12  ;;  %p2036_p3 = por %p2035_p2, %p2034_p11 }
  0x31   : > { %p2037_p4 = pnand %p2036_p3, %p2030_p0 }
  0x33   : > { %2040 = shalt.err (!%p2037_p4)
}
  0x34   : > { %s2144_s5 = smov 128   ;;  %s2145_s10 = smov 8  }
  0x35   : > { %1867 = dma.hbm_to_vmem [thread:$0]  (!%p2268_p10), %s2262_s27, 2048, %s2255_s13, %s184_s30, %s2144_s5, %s2144_s5, %s2145_s10  }
  0x36   : > { %p227_p11 = scmp.lt.s32.totalorder %s2141_s22, 17  ;;  %s2310_s28 = scalar_lea.hbm %s3248_s1, %s1652_s14 }
  0x37   : > { %p3270_p1 = scmp.ge.s32.totalorder %s2141_s22, 1  ;;  %s210_s12 = scalar_lea.vmem [#allocation6], %s1649_s7 }
  0x38   : > { %s219_s0 = sshll.u32 %s210_s12, 4  ;;  %s207_s11 = scalar_lea.sflag [#allocation7], %s2242_s6  ;;  %s2320_s0 = int_to_ptr.vmem [resolvable:$true] %s219_s0 }
  0x39   : > { %p2314_p5 = pnand %p3270_p1, %p227_p11  ;;  %s2041_s13 = scalar_lea.hbm %s2310_s28, 2048 }
  0x3a   : > { %p2042_p6 = scmp.ne.s32.totalorder %s2310_s28, %s2041_s13  ;;  %s2046_s30 = scalar_lea.hbm %s3248_s1, 32768 }
  0x3b   : > { %p2047_p12 = scmp.lt.u32.totalorder %s2310_s28, %s3248_s1  ;;  %p2048_p0 = scmp.lt.u32.totalorder %s2046_s30, %s2041_s13 }
  0x3c   : > { %p2044_p8 = pnand %p2042_p6, %p2013_p13  ;;  %p2050_p3 = scmp.lt.u32.totalorder %s2041_s13, %s2310_s28 }
  0x3d   : > { %p2049_p2 = por %p2048_p0, %p2047_p12 }
  0x3e   : > { %p2045_p9 = pneg %p2044_p8 }
  0x3f   : > { %p2051_p4 = por %p2050_p3, %p2049_p2 }
  0x41   : > { %p2052_p11 = pnand %p2051_p4, %p2045_p9 }
  0x43   : > { %2055 = shalt.err (!%p2052_p11)
}
  0x44   : > { %s2056_s7 = scalar_lea.vmem %s2320_s0, 2048  ;;  %s2146_s12 = smov [#allocation6]  }
  0x45   : > { %p2057_p1 = scmp.ne.s32.totalorder %s2320_s0, %s2056_s7  ;;  %s2061_s14 = sshll.u32 %s2146_s12, 4  ;;  %s2062_s14 = int_to_ptr.vmem [resolvable:$false] %s2061_s14 }
  0x46   : > { %s2063_s27 = scalar_lea.vmem %s2062_s14, 4096  ;;  %p2064_p7 = scmp.lt.s32.totalorder %s2320_s0, %s2062_s14 }
  0x47   : > { %p2059_p6 = pnand %p2057_p1, %p2013_p13  ;;  %p2065_p12 = scmp.lt.s32.totalorder %s2063_s27, %s2056_s7 }
  0x49   : > { %p2060_p8 = pneg %p2059_p6  ;;  %p2066_p0 = por %p2065_p12, %p2064_p7 }
  0x4b   : > { %p2067_p2 = pnand %p2066_p0, %p2060_p8 }
  0x4d   : > { %2070 = shalt.err (!%p2067_p2)
}
  0x4e   : > { %1870 = dma.hbm_to_vmem [thread:$0]  (!%p2268_p10), %s2310_s28, 2048, %s2320_s0, %s207_s11, %s2144_s5, %s2144_s5, %s2145_s10  }
  0x4f   : > { %231 = sbr.rel (%p2314_p5) target bundleno = 1183 (0x49f), region = 32 }
  0x56   : > { %s233_s13 = sand.u32 1, %s2117_s16   ;;  %p3272_p7 = scmp.ne.s32.totalorder %s3267_s29, 0 }
  0x57   : > { %s1658_s30 = sshll.u32 %s233_s13, 7  ;;  %s234_s15 = scalar_lea.sflag [#allocation5], %s233_s13 }
  0x58   : > { %s2354_s23 = scalar_lea.vmem [#allocation4], %s1658_s30 }
  0x59   : > { %2104 = dma.done.wait (%p3272_p7), %s234_s15, 2048  }
  0x5a   : > { %2106 = vsyncadd (%p3272_p7), %s234_s15, 4294965248  ;;  %s243_s6 = scalar_lea.sflag [#allocation7], %s233_s13  ;;  %s2360_s26 = scalar_lea.vmem [#allocation6], %s1658_s30 }
  0x5b   : > { %2108 = dma.done.wait (%p3272_p7), %s243_s6, 2048  }
  0x5c   : > { %2110 = vsyncadd (%p3272_p7), %s243_s6, 4294965248  ;;  %p282_p10 = scmp.lt.s32.totalorder %s2129_s19, 7  ;;  %p1663_p13 = scmp.ne.s32.totalorder %s2125_s18, 0 }
  0x5d   : > { %vm295_vm0 = vcmask (!%p1663_p13), 0   ;;  %v330_v0 = vlaneseq (!%p1663_p13)  ;;  %v2147_v1 = vmov (!%p1663_p13), -inf   ;;  %v2148_v2 = vmov (!%p1663_p13), 0.0  }
  0x5e   : > { %s3326_s19 = smov (!%p282_p10, %s2129_s19), 7  ;;  %294 = sbr.rel (%p1663_p13) target bundleno = 114 (0x72), region = 44 }
  0x5f   : > { %s1667_s0 = sshll.u32 %s3326_s19, 8  ;;  %s1662_s5 = sshll.u32 %s3326_s19, 1  ;;  %296 = vst.msk [vmem:[#allocation2] sm:$0x1] (!%p1663_p13), %vm295_vm0, %v2147_v1  ;;  %297 = vst [vmem:[#allocation3] sm:$0x1] (!%p1663_p13), %v2148_v2 }
  0x60   : > { %s2371_s8 = scalar_lea.vmem %s3250_s3, %s1667_s0  ;;  %s2376_s12 = scalar_lea.vmem %s3251_s4, %s1662_s5  ;;  %vm332_vm1 = vcmp.lt.s32.totalorder (!%p1663_p13), %v330_v0, 256 }
  0x61   : > { %298 = vst [vmem:[%s2371_s8] sm:$0xff] (!%p1663_p13), %v2148_v2  ;;  %299 = vst [vmem:[%s2371_s8 + $0x8] sm:$0xff] (!%p1663_p13), %v2148_v2 }
  0x62   : > { %300 = vst [vmem:[%s2371_s8 + $0x10] sm:$0xff] (!%p1663_p13), %v2148_v2  ;;  %301 = vst [vmem:[%s2371_s8 + $0x18] sm:$0xff] (!%p1663_p13), %v2148_v2 }
  0x63   : > { %302 = vst [vmem:[%s2371_s8 + $0x20] sm:$0xff] (!%p1663_p13), %v2148_v2  ;;  %303 = vst [vmem:[%s2371_s8 + $0x28] sm:$0xff] (!%p1663_p13), %v2148_v2 }
  0x64   : > { %304 = vst [vmem:[%s2371_s8 + $0x30] sm:$0xff] (!%p1663_p13), %v2148_v2  ;;  %305 = vst [vmem:[%s2371_s8 + $0x38] sm:$0xff] (!%p1663_p13), %v2148_v2 }
  0x65   : > { %306 = vst [vmem:[%s2371_s8 + $0x40] sm:$0xff] %v2148_v2  ;;  %307 = vst [vmem:[%s2371_s8 + $0x48] sm:$0xff] %v2148_v2 }
  0x66   : > { %308 = vst [vmem:[%s2371_s8 + $0x50] sm:$0xff] %v2148_v2  ;;  %309 = vst [vmem:[%s2371_s8 + $0x58] sm:$0xff] %v2148_v2 }
  0x67   : > { %310 = vst [vmem:[%s2371_s8 + $0x60] sm:$0xff] %v2148_v2  ;;  %311 = vst [vmem:[%s2371_s8 + $0x68] sm:$0xff] %v2148_v2 }
  0x68   : > { %312 = vst [vmem:[%s2371_s8 + $0x70] sm:$0xff] %v2148_v2  ;;  %313 = vst [vmem:[%s2371_s8 + $0x78] sm:$0xff] %v2148_v2 }
  0x69   : > { %314 = vst [vmem:[%s2371_s8 + $0x80] sm:$0xff] %v2148_v2  ;;  %315 = vst [vmem:[%s2371_s8 + $0x88] sm:$0xff] %v2148_v2 }
  0x6a   : > { %316 = vst [vmem:[%s2371_s8 + $0x90] sm:$0xff] %v2148_v2  ;;  %317 = vst [vmem:[%s2371_s8 + $0x98] sm:$0xff] %v2148_v2 }
  0x6b   : > { %318 = vst [vmem:[%s2371_s8 + $0xa0] sm:$0xff] %v2148_v2  ;;  %319 = vst [vmem:[%s2371_s8 + $0xa8] sm:$0xff] %v2148_v2 }
  0x6c   : > { %320 = vst [vmem:[%s2371_s8 + $0xb0] sm:$0xff] %v2148_v2  ;;  %321 = vst [vmem:[%s2371_s8 + $0xb8] sm:$0xff] %v2148_v2 }
  0x6d   : > { %322 = vst [vmem:[%s2371_s8 + $0xc0] sm:$0xff] %v2148_v2  ;;  %323 = vst [vmem:[%s2371_s8 + $0xc8] sm:$0xff] %v2148_v2 }
  0x6e   : > { %324 = vst [vmem:[%s2371_s8 + $0xd0] sm:$0xff] %v2148_v2  ;;  %325 = vst [vmem:[%s2371_s8 + $0xd8] sm:$0xff] %v2148_v2 }
  0x6f   : > { %326 = vst [vmem:[%s2371_s8 + $0xe0] sm:$0xff] %v2148_v2  ;;  %327 = vst [vmem:[%s2371_s8 + $0xe8] sm:$0xff] %v2148_v2 }
  0x70   : > { %328 = vst [vmem:[%s2371_s8 + $0xf0] sm:$0xff] %v2148_v2  ;;  %329 = vst [vmem:[%s2371_s8 + $0xf8] sm:$0xff] %v2148_v2 }
  0x71   : > { %334 = vst.msk [vmem:[%s2376_s12] sm:$0x3] %vm332_vm1, %v2148_v2 }
  0x72 PF: > { %v368_v3 = vld [vmem:[%s3249_s2 + $0x8] sm:$0xff]  ;;  %v370_v4 = vld [vmem:[%s3249_s2 + $0x18] sm:$0xff]  ;;  %v367_v5 = vld [vmem:[%s3249_s2] sm:$0xff]  ;;  %v2149_v10 = vmov 0.0   ;;  %vm1361_vm2 = vcmask 0   ;;  %p1664_p5 = scmp.ne.s32.totalorder %s2125_s18, 1 }
  0x73   : > { %v1796_v6 = vpack.c.bf16 %v370_v4, %v368_v3  ;;  %v369_v7 = vld [vmem:[%s3249_s2 + $0x10] sm:$0xff]  ;;  %v372_v8 = vld [vmem:[%s3249_s2 + $0x28] sm:$0xff]  ;;  %v374_v9 = vld [vmem:[%s3249_s2 + $0x38] sm:$0xff]  ;;  %463 = vmatprep.mubr.f32.mxu0 %v2149_v10 }
  0x74   : > { %v1798_v11 = vpack.c.bf16 %v369_v7, %v367_v5  ;;  %v1800_v12 = vpack.c.bf16 %v374_v9, %v372_v8  ;;  %v371_v13 = vld [vmem:[%s3249_s2 + $0x20] sm:$0xff]  ;;  %v373_v14 = vld [vmem:[%s3249_s2 + $0x30] sm:$0xff]  ;;  %v376_v15 = vld [vmem:[%s3249_s2 + $0x48] sm:$0xff] }
  0x75   : > { %1797 = vmatprep.subr.bf16.mxu0 %v1796_v6  ;;  %v378_v16 = vld [vmem:[%s3249_s2 + $0x58] sm:$0xff]  ;;  %v1802_v17 = vpack.c.bf16 %v373_v14, %v371_v13  ;;  %v375_v19 = vld [vmem:[%s3249_s2 + $0x40] sm:$0xff]  ;;  %v377_v20 = vld [vmem:[%s3249_s2 + $0x50] sm:$0xff] }
  0x76   : > { %1799 = vmatpush1.bf16.msra.mxu0 %v1798_v11  ;;  %v1804_v18 = vpack.c.bf16 %v378_v16, %v376_v15  ;;  %v380_v21 = vld [vmem:[%s3249_s2 + $0x68] sm:$0xff]  ;;  %v382_v22 = vld [vmem:[%s3249_s2 + $0x78] sm:$0xff]  ;;  %v1806_v23 = vpack.c.bf16 %v377_v20, %v375_v19  ;;  %v379_v25 = vld [vmem:[%s3249_s2 + $0x60] sm:$0xff] }
  0x77   : > { %1801 = vmatprep.subr.bf16.mxu0 %v1800_v12  ;;  %v1808_v24 = vpack.c.bf16 %v382_v22, %v380_v21  ;;  %v381_v26 = vld [vmem:[%s3249_s2 + $0x70] sm:$0xff]  ;;  %v384_v27 = vld [vmem:[%s3249_s2 + $0x88] sm:$0xff]  ;;  %v386_v28 = vld [vmem:[%s3249_s2 + $0x98] sm:$0xff] }
  0x78   : > { %v1810_v29 = vpack.c.bf16 %v381_v26, %v379_v25  ;;  %v1812_v30 = vpack.c.bf16 %v386_v28, %v384_v27  ;;  %v383_v31 = vld [vmem:[%s3249_s2 + $0x80] sm:$0xff]  ;;  %v385_v32 = vld [vmem:[%s3249_s2 + $0x90] sm:$0xff]  ;;  %v388_v33 = vld [vmem:[%s3249_s2 + $0xa8] sm:$0xff] }
  0x79   : > { %v390_v34 = vld [vmem:[%s3249_s2 + $0xb8] sm:$0xff]  ;;  %v1814_v35 = vpack.c.bf16 %v385_v32, %v383_v31  ;;  %v387_v37 = vld [vmem:[%s3249_s2 + $0xa0] sm:$0xff]  ;;  %v389_v38 = vld [vmem:[%s3249_s2 + $0xb0] sm:$0xff] }
  0x7a   : > { %1803 = vmatpush1.bf16.msra.mxu0 %v1802_v17  ;;  %v1816_v36 = vpack.c.bf16 %v390_v34, %v388_v33  ;;  %v392_v39 = vld [vmem:[%s3249_s2 + $0xc8] sm:$0xff]  ;;  %v394_v40 = vld [vmem:[%s3249_s2 + $0xd8] sm:$0xff]  ;;  %v1818_v41 = vpack.c.bf16 %v389_v38, %v387_v37  ;;  %v391_v43 = vld [vmem:[%s3249_s2 + $0xc0] sm:$0xff] }
  0x7b   : > { %1805 = vmatprep.subr.bf16.mxu0 %v1804_v18  ;;  %v1820_v42 = vpack.c.bf16 %v394_v40, %v392_v39  ;;  %v393_v44 = vld [vmem:[%s3249_s2 + $0xd0] sm:$0xff]  ;;  %v396_v45 = vld [vmem:[%s3249_s2 + $0xe8] sm:$0xff]  ;;  %v398_v46 = vld [vmem:[%s3249_s2 + $0xf8] sm:$0xff] }
  0x7c   : > { %v1822_v47 = vpack.c.bf16 %v393_v44, %v391_v43  ;;  %v1824_v48 = vpack.c.bf16 %v398_v46, %v396_v45  ;;  %v395_v49 = vld [vmem:[%s3249_s2 + $0xe0] sm:$0xff]  ;;  %v397_v50 = vld [vmem:[%s3249_s2 + $0xf0] sm:$0xff] }
  0x7d   : > { %v1826_v51 = vpack.c.bf16 %v397_v50, %v395_v49  ;;  %v2510_v52 = vld [vmem:[%s2354_s23] sm:$0xff]  ;;  %v2515_v53 = vld [vmem:[%s2354_s23 + $0x8] sm:$0xff]  ;;  %v2520_v54 = vld [vmem:[%s2354_s23 + $0x10] sm:$0xff] }
  0x7e   : > { %1807 = vmatpush1.bf16.msra.mxu0 %v1806_v23  ;;  %v2525_v55 = vld [vmem:[%s2354_s23 + $0x18] sm:$0xff]  ;;  %v2530_v56 = vld [vmem:[%s2354_s23 + $0x20] sm:$0xff]  ;;  %v2535_v57 = vld [vmem:[%s2354_s23 + $0x28] sm:$0xff]  ;;  %v560_v50 = vmul.f32 %v2510_v52, %v2510_v52 }
  0x7f   : > { %1809 = vmatprep.subr.bf16.mxu0 %v1808_v24  ;;  %v2540_v58 = vld [vmem:[%s2354_s23 + $0x30] sm:$0xff]  ;;  %v2545_v59 = vld [vmem:[%s2354_s23 + $0x38] sm:$0xff]  ;;  %v2550_v60 = vld [vmem:[%s2354_s23 + $0x40] sm:$0xff] }
  0x80   : > { %v2555_v61 = vld [vmem:[%s2354_s23 + $0x48] sm:$0xff]  ;;  %v2560_v62 = vld [vmem:[%s2354_s23 + $0x50] sm:$0xff]  ;;  %v2565_v63 = vld [vmem:[%s2354_s23 + $0x58] sm:$0xff] }
  0x81   : > { %v2570_v0 = vld [vmem:[%s2354_s23 + $0x60] sm:$0xff]  ;;  %v2575_v1 = vld [vmem:[%s2354_s23 + $0x68] sm:$0xff]  ;;  %v2580_v2 = vld [vmem:[%s2354_s23 + $0x70] sm:$0xff] }
  0x82   : > { %1811 = vmatpush1.bf16.msra.mxu0 %v1810_v29  ;;  %v2585_v3 = vld [vmem:[%s2354_s23 + $0x78] sm:$0xff] }
  0x83   : > { %1813 = vmatprep.subr.bf16.mxu0 %v1812_v30 }
  0x86   : > { %1815 = vmatpush1.bf16.msra.mxu0 %v1814_v35 }
  0x87   : > { %1817 = vmatprep.subr.bf16.mxu0 %v1816_v36 }
  0x8a   : > { %1819 = vmatpush1.bf16.msra.mxu0 %v1818_v41 }
  0x8b   : > { %1821 = vmatprep.subr.bf16.mxu0 %v1820_v42 }
  0x8e   : > { %1823 = vmatpush1.bf16.msra.mxu0 %v1822_v47 }
  0x8f   : > { %1825 = vmatprep.subr.bf16.mxu0 %v1824_v48 }
  0x92   : > { %1827 = vmatpush1.bf16.msra.mxu0 %v1826_v51 }
  0x95   : > { %464 = vmatmul.mubr.f32.vlgmr.msra.gmra.mrb[0].mxu0 %v2510_v52  ;;  %v563_v52 = vmul.f32 %v2525_v55, %v2525_v55 }
  0x96   : > { %469 = vmatprep.mubr.f32.mxu0 %v2149_v10 }
  0x99   : > { %470 = vmatmul.mubr.f32.gmra.mrb[2].mxu0 %v2515_v53 }
  0x9a   : > { %475 = vmatprep.mubr.f32.mxu0 %v2149_v10 }
  0x9d   : > { %476 = vmatmul.mubr.f32.gmra.mrb[4].mxu0 %v2520_v54 }
  0x9e   : > { %481 = vmatprep.mubr.f32.mxu0 %v2149_v10 }
  0xa1   : > { %482 = vmatmul.mubr.f32.gmra.mrb[6].mxu0 %v2525_v55  ;;  %v569_v55 = vmul.f32 %v2555_v61, %v2555_v61 }
  0xa2   : > { %487 = vmatprep.mubr.f32.mxu0 %v2149_v10 }
  0xa5   : > { %488 = vmatmul.mubr.f32.gmra.mrb[8].mxu0 %v2530_v56 }
  0xa6   : > { %493 = vmatprep.mubr.f32.mxu0 %v2149_v10 }
  0xa9   : > { %494 = vmatmul.mubr.f32.gmra.mrb[10].mxu0 %v2535_v57 }
  0xaa   : > { %499 = vmatprep.mubr.f32.mxu0 %v2149_v10 }
  0xad   : > { %500 = vmatmul.mubr.f32.gmra.mrb[12].mxu0 %v2540_v58 }
  0xae   : > { %505 = vmatprep.mubr.f32.mxu0 %v2149_v10 }
  0xb1   : > { %506 = vmatmul.mubr.f32.gmra.mrb[14].mxu0 %v2545_v59 }
  0xb2   : > { %511 = vmatprep.mubr.f32.mxu0 %v2149_v10 }
  0xb5   : > { %512 = vmatmul.mubr.f32.gmra.mrb[16].mxu0 %v2550_v60 }
  0xb6   : > { %517 = vmatprep.mubr.f32.mxu0 %v2149_v10 }
  0xb9   : > { %518 = vmatmul.mubr.f32.gmra.mrb[18].mxu0 %v2555_v61  ;;  %v574_v61 = vmul.f32 %v2580_v2, %v2580_v2 }
  0xba   : > { %523 = vmatprep.mubr.f32.mxu0 %v2149_v10 }
  0xbd   : > { %524 = vmatmul.mubr.f32.gmra.mrb[20].mxu0 %v2560_v62 }
  0xbe   : > { %529 = vmatprep.mubr.f32.mxu0 %v2149_v10 }
  0xc1   : > { %530 = vmatmul.mubr.f32.gmra.mrb[22].mxu0 %v2565_v63 }
  0xc2   : > { %535 = vmatprep.mubr.f32.mxu0 %v2149_v10 }
  0xc5   : > { %536 = vmatmul.mubr.f32.gmra.mrb[24].mxu0 %v2570_v0 }
  0xc6   : > { %541 = vmatprep.mubr.f32.mxu0 %v2149_v10 }
  0xc9   : > { %542 = vmatmul.mubr.f32.gmra.mrb[26].mxu0 %v2575_v1 }
  0xca   : > { %547 = vmatprep.mubr.f32.mxu0 %v2149_v10 }
  0xcd   : > { %548 = vmatmul.mubr.f32.gmra.mrb[28].mxu0 %v2580_v2 }
  0xce   : > { %553 = vmatprep.mubr.f32.mxu0 %v2149_v10 }
  0xd1   : > { %554 = vmatmul.mubr.f32.gmra.mrb[30].mxu0 %v2585_v3 }
 0x168   : > { %v2588_v4 = vpop.f32.mrb[0].mxu0 }
 0x169   : > { %v2590_v5 = vpop.f32.mrb[1].mxu0 }
 0x16a   : > { %v624_v6 = vmax.f32 %v2588_v4, %v2590_v5 }
 0x16c   : > { %625 = vmax.xlane.f32.xlu0 %v624_v6  ;;  %v2594_v7 = vpop.f32.mrb[2].mxu0 }
 0x16d   : > { %v2596_v8 = vpop.f32.mrb[3].mxu0 }
 0x16e   : > { %v627_v9 = vmax.f32 %v2594_v7, %v2596_v8 }
 0x170   : > { %628 = vmax.xlane.f32.xlu0 %v627_v9  ;;  %v2600_v10 = vpop.f32.mrb[4].mxu0  ;;  %v562_v9 = vmul.f32 %v2520_v54, %v2520_v54  ;;  %v566_v54 = vmul.f32 %v2540_v58, %v2540_v58  ;;  %v571_v58 = vmul.f32 %v2565_v63, %v2565_v63 }
 0x171   : > { %v2602_v11 = vpop.f32.mrb[5].mxu0 }
 0x172   : > { %v630_v12 = vmax.f32 %v2600_v10, %v2602_v11 }
 0x174   : > { %631 = vmax.xlane.f32.xlu1 %v630_v12  ;;  %v2606_v13 = vpop.f32.mrb[6].mxu0  ;;  %v561_v12 = vmul.f32 %v2515_v53, %v2515_v53  ;;  %v567_v53 = vmul.f32 %v2545_v59, %v2545_v59  ;;  %v572_v59 = vmul.f32 %v2570_v0, %v2570_v0 }
 0x175   : > { %v2608_v14 = vpop.f32.mrb[7].mxu0 }
 0x176   : > { %v633_v15 = vmax.f32 %v2606_v13, %v2608_v14 }
 0x178   : > { %634 = vmax.xlane.f32.xlu1 %v633_v15  ;;  %v2612_v16 = vpop.f32.mrb[8].mxu0  ;;  %v564_v15 = vmul.f32 %v2530_v56, %v2530_v56  ;;  %v568_v56 = vmul.f32 %v2550_v60, %v2550_v60  ;;  %v573_v60 = vmul.f32 %v2575_v1, %v2575_v1 }
 0x179   : > { %v2614_v17 = vpop.f32.mrb[9].mxu0 }
 0x17a   : > { %v636_v18 = vmax.f32 %v2612_v16, %v2614_v17 }
 0x17c   : > { %637 = vmax.xlane.f32.xlu0 %v636_v18  ;;  %v2618_v19 = vpop.f32.mrb[10].mxu0  ;;  %v565_v18 = vmul.f32 %v2535_v57, %v2535_v57  ;;  %v570_v57 = vmul.f32 %v2560_v62, %v2560_v62  ;;  %v575_v62 = vmul.f32 %v2585_v3, %v2585_v3 }
 0x17d   : > { %v2620_v20 = vpop.f32.mrb[11].mxu0 }
 0x17e   : > { %v639_v21 = vmax.f32 %v2618_v19, %v2620_v20 }
 0x180   : > { %640 = vmax.xlane.f32.xlu1 %v639_v21  ;;  %v2624_v22 = vpop.f32.mrb[12].mxu0  ;;  %v3253_v21 = vmov 0  }
 0x181   : > { %v2626_v23 = vpop.f32.mrb[13].mxu0  ;;  %1943 = vset.pattern.permute.xlu0 %v3253_v21 }
 0x182   : > { %v642_v24 = vmax.f32 %v2624_v22, %v2626_v23 }
 0x184   : > { %643 = vmax.xlane.f32.xlu0 %v642_v24  ;;  %v2630_v25 = vpop.f32.mrb[14].mxu0 }
 0x185   : > { %v2632_v26 = vpop.f32.mrb[15].mxu0 }
 0x186   : > { %v645_v27 = vmax.f32 %v2630_v25, %v2632_v26 }
 0x188   : > { %646 = vmax.xlane.f32.xlu1 %v645_v27  ;;  %v2636_v28 = vpop.f32.mrb[16].mxu0 }
 0x189   : > { %v2638_v29 = vpop.f32.mrb[17].mxu0 }
 0x18a   : > { %v648_v30 = vmax.f32 %v2636_v28, %v2638_v29 }
 0x18c   : > { %649 = vmax.xlane.f32.xlu0 %v648_v30  ;;  %v2642_v31 = vpop.f32.mrb[18].mxu0 }
 0x18d   : > { %v2644_v32 = vpop.f32.mrb[19].mxu0 }
 0x18e   : > { %v651_v33 = vmax.f32 %v2642_v31, %v2644_v32 }
 0x190   : > { %652 = vmax.xlane.f32.xlu1 %v651_v33  ;;  %v2648_v34 = vpop.f32.mrb[20].mxu0 }
 0x191   : > { %v2650_v35 = vpop.f32.mrb[21].mxu0 }
 0x192   : > { %v654_v36 = vmax.f32 %v2648_v34, %v2650_v35 }
 0x194   : > { %655 = vmax.xlane.f32.xlu0 %v654_v36  ;;  %v2654_v37 = vpop.f32.mrb[22].mxu0 }
 0x195   : > { %v2656_v38 = vpop.f32.mrb[23].mxu0 }
 0x196   : > { %v657_v39 = vmax.f32 %v2654_v37, %v2656_v38 }
 0x198   : > { %658 = vmax.xlane.f32.xlu1 %v657_v39  ;;  %v2660_v40 = vpop.f32.mrb[24].mxu0 }
 0x199   : > { %v2662_v41 = vpop.f32.mrb[25].mxu0 }
 0x19a   : > { %v660_v42 = vmax.f32 %v2660_v40, %v2662_v41 }
 0x19c   : > { %661 = vmax.xlane.f32.xlu0 %v660_v42  ;;  %v2666_v43 = vpop.f32.mrb[26].mxu0 }
 0x19d   : > { %v2668_v44 = vpop.f32.mrb[27].mxu0 }
 0x19e   : > { %v663_v45 = vmax.f32 %v2666_v43, %v2668_v44 }
 0x1a0   : > { %664 = vmax.xlane.f32.xlu1 %v663_v45  ;;  %v2672_v46 = vpop.f32.mrb[28].mxu0 }
 0x1a1   : > { %v2674_v47 = vpop.f32.mrb[29].mxu0 }
 0x1a2   : > { %v666_v48 = vmax.f32 %v2672_v46, %v2674_v47 }
 0x1a4   : > { %667 = vmax.xlane.f32.xlu0 %v666_v48  ;;  %v2678_v49 = vpop.f32.mrb[30].mxu0 }
 0x1a5   : > { %v2682_v51 = vpop.f32.mrb[31].mxu0 }
 0x1a6   : > { %3273 = vst [vmem:[#allocation10_spill] sm:$0xff] %v2682_v51  ;;  %v669_v6 = vmax.f32 %v2678_v49, %v2682_v51 }
 0x1a8   : > { %576 = vadd.xlane.f32.xlu0 %v560_v50  ;;  %670 = vmax.xlane.f32.xlu1 %v669_v6 }
 0x1ac   : > { %580 = vadd.xlane.f32.xlu0 %v562_v9  ;;  %578 = vadd.xlane.f32.xlu1 %v561_v12 }
 0x1b0   : > { %584 = vadd.xlane.f32.xlu0 %v564_v15  ;;  %582 = vadd.xlane.f32.xlu1 %v563_v52 }
 0x1b4   : > { %586 = vadd.xlane.f32.xlu1 %v565_v18 }
 0x1b8   : > { %588 = vadd.xlane.f32.xlu1 %v566_v54 }
 0x1bc   : > { %590 = vadd.xlane.f32.xlu1 %v567_v53 }
 0x1c0   : > { %592 = vadd.xlane.f32.xlu1 %v568_v56 }
 0x1c4   : > { %594 = vadd.xlane.f32.xlu1 %v569_v55 }
 0x1c8   : > { %596 = vadd.xlane.f32.xlu1 %v570_v57 }
 0x1cc   : > { %598 = vadd.xlane.f32.xlu1 %v571_v58 }
 0x1d0   : > { %600 = vadd.xlane.f32.xlu1 %v572_v59 }
 0x1d4   : > { %602 = vadd.xlane.f32.xlu1 %v573_v60 }
 0x1d8   : > { %604 = vadd.xlane.f32.xlu1 %v574_v61 }
 0x1dc   : > { %606 = vadd.xlane.f32.xlu1 %v575_v62 }
 0x1f9   : > { %v626_v63 = vpop.xlane.xlu0 %625 }
 0x1fd   : > { %v629_v27 = vpop.xlane.xlu0 %628 }
 0x201   : > { %v632_v24 = vpop.xlane.xlu1 %631 }
 0x205   : > { %v635_v0 = vpop.xlane.xlu1 %634 }
 0x209   : > { %v638_v30 = vpop.xlane.xlu0 %637 }
 0x20a   : > { %v672_v9 = vmax.f32 %v626_v63, %v638_v30  ;;  %v2720_v30 = vld [vmem:[#allocation2] sm:$0x1] }
 0x20b   : > { %3275 = vst [vmem:[#allocation12_spill] sm:$0xff] %v2720_v30 }
 0x20d   : > { %v641_v33 = vpop.xlane.xlu1 %640 }
 0x20e   : > { %v673_v6 = vmax.f32 %v629_v27, %v641_v33  ;;  %v3256_v27 = vlaneseq }
 0x211   : > { %v644_v36 = vpop.xlane.xlu0 %643 }
 0x212   : > { %v674_v12 = vmax.f32 %v632_v24, %v644_v36  ;;  %v2718_v24 = vshrl.u32 %v3256_v27, 7  ;;  %v2761_v27 = vld [vmem:[%s2360_s26 + $0x38] sm:$0xff] }
 0x214   : > { %3274 = vst [vmem:[#allocation11_spill] sm:$0xff] %v2718_v24 }
 0x215   : > { %v647_v39 = vpop.xlane.xlu1 %646 }
 0x216   : > { %v675_v15 = vmax.f32 %v635_v0, %v647_v39  ;;  %v2723_v39 = vsub.s32 0, %v2718_v24 }
 0x218   : > { %3276 = vst [vmem:[#allocation13_spill] sm:$0xff] %v2723_v39 }
 0x219   : > { %v650_v42 = vpop.xlane.xlu0 %649 }
 0x21a   : > { %v676_v18 = vmax.f32 %v672_v9, %v650_v42 }
 0x21d   : > { %v653_v45 = vpop.xlane.xlu1 %652 }
 0x21e   : > { %v677_v3 = vmax.f32 %v673_v6, %v653_v45 }
 0x221   : > { %v656_v1 = vpop.xlane.xlu0 %655 }
 0x222   : > { %v678_v54 = vmax.f32 %v674_v12, %v656_v1 }
 0x225   : > { %v659_v48 = vpop.xlane.xlu1 %658 }
 0x226   : > { %v679_v53 = vmax.f32 %v675_v15, %v659_v48 }
 0x229   : > { %v662_v50 = vpop.xlane.xlu0 %661 }
 0x22a   : > { %v680_v57 = vmax.f32 %v676_v18, %v662_v50  ;;  %v351_v18 = vld [vmem:[%s2360_s26] sm:$0xff] }
 0x22d   : > { %v665_v2 = vpop.xlane.xlu1 %664 }
 0x22e   : > { %v681_v56 = vmax.f32 %v677_v3, %v665_v2 }
 0x230   : > { %v684_v60 = vmax.f32 %v680_v57, %v681_v56 }
 0x231   : > { %v668_v52 = vpop.xlane.xlu0 %667 }
 0x232   : > { %v682_v58 = vmax.f32 %v678_v54, %v668_v52  ;;  %v352_v54 = vld [vmem:[%s2360_s26 + $0x8] sm:$0xff] }
 0x235   : > { %v671_v55 = vpop.xlane.xlu1 %670  ;;  %v577_v15 = vpop.xlane.xlu0 %576 }
 0x236   : > { %v683_v59 = vmax.f32 %v679_v53, %v671_v55  ;;  %v1828_v53 = vpack.c.bf16 %v352_v54, %v351_v18  ;;  %v2735_v55 = vmul.f32 0.044194173, %v577_v15 }
 0x238   : > { %v685_v61 = vmax.f32 %v682_v58, %v683_v59  ;;  %1829 = vmatprep.subr.bf16.mxu1 %v1828_v53 }
 0x239   : > { %v579_v45 = vpop.xlane.xlu1 %578  ;;  %v581_v52 = vpop.xlane.xlu0 %580  ;;  %1831 = vmatpush3.bf16.msra.mxu1 %v1828_v53  ;;  %v1338_v53 = vadd.f32 %v352_v54, %v351_v18 }
 0x23a   : > { %v686_v62 = vmax.f32 %v684_v60, %v685_v61  ;;  %v2737_v58 = vmul.f32 0.044194173, %v581_v52  ;;  %v2739_v59 = vmul.f32 0.044194173, %v579_v45  ;;  %v353_v60 = vld [vmem:[%s2360_s26 + $0x10] sm:$0xff]  ;;  %v354_v61 = vld [vmem:[%s2360_s26 + $0x18] sm:$0xff] }
 0x23b   : > { %v2758_v52 = vld [vmem:[%s2360_s26 + $0x30] sm:$0xff] }
 0x23c   : > { %v687_v21 = vrot.slane %v686_v62, 4  ;;  %v700_v18 = vsub.f32 %v2594_v7, %v2739_v59  ;;  %v701_v54 = vsub.f32 %v2596_v8, %v2739_v59  ;;  %v1840_v7 = vpack.c.bf16 %v2761_v27, %v2758_v52 }
 0x23d   : > { %v583_v1 = vpop.xlane.xlu1 %582  ;;  %v585_v57 = vpop.xlane.xlu0 %584  ;;  %v1339_v59 = vadd.f32 %v1338_v53, %v353_v60 }
 0x23e   : > { %v688_v51 = vmax.f32 %v686_v62, %v687_v21  ;;  %v2744_v62 = vld [vmem:[%s2360_s26 + $0x20] sm:$0xff] }
 0x240   : > { %v689_v33 = vrot.slane %v688_v51, 2 }
 0x241   : > { %v587_v48 = vpop.xlane.xlu1 %586 }
 0x242   : > { %v690_v63 = vmax.f32 %v688_v51, %v689_v33  ;;  %v2746_v33 = vmul.f32 0.044194173, %v585_v57  ;;  %v699_v57 = vsub.f32 %v2590_v5, %v2735_v55 }
 0x244   : > { %v691_v0 = vrot.slane %v690_v63, 1 }
 0x245   : > { %v589_v50 = vpop.xlane.xlu1 %588 }
 0x246   : > { %v692_v36 = vmax.f32 %v690_v63, %v691_v0  ;;  %v1832_v63 = vpack.c.bf16 %v354_v61, %v353_v60  ;;  %v2749_v0 = vld [vmem:[%s2360_s26 + $0x28] sm:$0xff]  ;;  %v2775_v24 = vmul.f32 0.044194173, %v589_v50 }
 0x247   : > { %v1836_v45 = vpack.c.bf16 %v2749_v0, %v2744_v62 }
 0x248   : > { %v2726_v42 = vmax.f32 %v2720_v30, %v692_v36  ;;  %v698_v36 = vsub.f32 %v2588_v4, %v2735_v55  ;;  %v703_v4 = vsub.f32 %v2602_v11, %v2737_v58  ;;  %1833 = vmatprep.subr.bf16.mxu1 %v1832_v63  ;;  %v707_v11 = vsub.f32 %v2614_v17, %v2746_v33  ;;  %v2797_v55 = vld [vmem:[%s2360_s26 + $0x48] sm:$0xff] }
 0x249   : > { %v591_v6 = vpop.xlane.xlu1 %590  ;;  %1835 = vmatpush3.bf16.msra.mxu1 %v1832_v63  ;;  %v2794_v63 = vld [vmem:[%s2360_s26 + $0x40] sm:$0xff]  ;;  %3278 = vst [vmem:[#allocation15_spill] sm:$0xff] %v2797_v55 }
 0x24a   : > { %3277 = vst [vmem:[#allocation14_spill] sm:$0xff] %v2726_v42  ;;  %v734_v21 = vrot.slane %v2726_v42, %v2723_v39  ;;  %1362 = vst.msk [vmem:[#allocation2] sm:$0x1] %vm1361_vm2, %v2726_v42  ;;  %v2777_v5 = vmul.f32 0.044194173, %v591_v6  ;;  %1837 = vmatprep.subr.bf16.mxu1 %v1836_v45  ;;  %v1844_v53 = vpack.c.bf16 %v2797_v55, %v2794_v63 }
 0x24c   : > { %736 = vperm.xlu0 %1943, %v734_v21   ;;  %v2753_v21 = vmul.f32 0.044194173, %v583_v1  ;;  %v2769_v1 = vmul.f32 0.044194173, %v587_v48 }
 0x24d   : > { %v593_v2 = vpop.xlane.xlu1 %592  ;;  %1839 = vmatpush3.bf16.msra.mxu1 %v1836_v45 }
 0x24e   : > { %v2783_v48 = vmul.f32 0.044194173, %v593_v2  ;;  %v704_v8 = vsub.f32 %v2606_v13, %v2753_v21  ;;  %v705_v17 = vsub.f32 %v2608_v14, %v2753_v21  ;;  %v709_v51 = vsub.f32 %v2620_v20, %v2769_v1  ;;  %1841 = vmatprep.subr.bf16.mxu1 %v1840_v7  ;;  %v2830_v20 = vld [vmem:[%s2360_s26 + $0x50] sm:$0xff] }
 0x24f   : > { %v1340_v13 = vadd.f32 %v1339_v59, %v354_v61  ;;  %3279 = vst [vmem:[#allocation16_spill] sm:$0xff] %v2830_v20 }
 0x251   : > { %v595_v9 = vpop.xlane.xlu1 %594  ;;  %1843 = vmatpush3.bf16.msra.mxu1 %v1840_v7  ;;  %v2862_v7 = vld [vmem:[%s2360_s26 + $0x68] sm:$0xff] }
 0x252   : > { %v2789_v50 = vmul.f32 0.044194173, %v595_v9  ;;  %1845 = vmatprep.subr.bf16.mxu1 %v1844_v53 }
 0x255   : > { %v597_v12 = vpop.xlane.xlu1 %596  ;;  %1847 = vmatpush3.bf16.msra.mxu1 %v1844_v53 }
 0x256   : > { %v2791_v6 = vmul.f32 0.044194173, %v597_v12 }
 0x259   : > { %v599_v3 = vpop.xlane.xlu1 %598 }
 0x25a   : > { %v2805_v39 = vmul.f32 0.044194173, %v599_v3  ;;  %v2833_v3 = vld [vmem:[%s2360_s26 + $0x58] sm:$0xff] }
 0x25b   : > { %3280 = vst [vmem:[#allocation17_spill] sm:$0xff] %v2833_v3  ;;  %v1848_v42 = vpack.c.bf16 %v2833_v3, %v2830_v20  ;;  %v3281_v3 = vsub.f32 %v2600_v10, %v2737_v58 }
 0x25d   : > { %v601_v56 = vpop.xlane.xlu1 %600  ;;  %1849 = vmatprep.subr.bf16.mxu1 %v1848_v42 }
 0x25e   : > { %v2813_v14 = vmul.f32 0.044194173, %v601_v56  ;;  %1851 = vmatpush3.bf16.msra.mxu1 %v1848_v42 }
 0x261   : > { %v603_v15 = vpop.xlane.xlu1 %602 }
 0x262   : > { %v2841_v9 = vmul.f32 0.044194173, %v603_v15 }
 0x265   : > { %v605_v60 = vpop.xlane.xlu1 %604 }
 0x266   : > { %v2866_v2 = vmul.f32 0.044194173, %v605_v60 }
 0x268   : > { %v727_v53 = vsub.f32 %v2674_v47, %v2866_v2 }
 0x269   : > { %v607_v61 = vpop.xlane.xlu1 %606 }
 0x2cb   : > { %v2843_v56 = vpop.permute.xlu0 %736 }
 0x2cc   : > { %v740_v59 = vsub.f32 %v699_v57, %v2843_v56  ;;  %v744_v45 = vsub.f32 %v703_v4, %v2843_v56  ;;  %v742_v21 = vsub.f32 %v701_v54, %v2843_v56  ;;  %v746_v15 = vsub.f32 %v705_v17, %v2843_v56  ;;  %v2859_v54 = vld [vmem:[%s2360_s26 + $0x60] sm:$0xff] }
 0x2cd   : > { %v739_v12 = vsub.f32 %v698_v36, %v2843_v56  ;;  %v741_v57 = vsub.f32 %v700_v18, %v2843_v56  ;;  %v1341_v4 = vadd.f32 %v1340_v13, %v2744_v62  ;;  %v724_v17 = vsub.f32 %v2666_v43, %v2841_v9 }
 0x2ce   : > { %v773_v30 = vmul.f32 1.442695, %v740_v59  ;;  %v777_v55 = vmul.f32 1.442695, %v742_v21  ;;  %v781_v36 = vmul.f32 1.442695, %v744_v45  ;;  %v743_v59 = vsub.f32 %v3281_v3, %v2843_v56 }
 0x2cf   : > { %v725_v18 = vsub.f32 %v2668_v44, %v2841_v9  ;;  %v771_v62 = vmul.f32 1.442695, %v739_v12  ;;  %v748_v13 = vsub.f32 %v707_v11, %v2843_v56  ;;  %v2875_v21 = vmul.f32 0.044194173, %v607_v61  ;;  %v3300_v44 = vld [vmem:[#allocation16_spill] sm:$0xff] }
 0x2d0   : > { %1945 = vpow2.f32 %v773_v30  ;;  %v785_v20 = vmul.f32 1.442695, %v746_v15  ;;  %v745_v60 = vsub.f32 %v704_v8, %v2843_v56  ;;  %v1852_v45 = vpack.c.bf16 %v2862_v7, %v2859_v54 }
 0x2d1   : > { %1947 = vpow2.f32 %v777_v55  ;;  %v775_v10 = vmul.f32 1.442695, %v741_v57  ;;  %v750_v58 = vsub.f32 %v709_v51, %v2843_v56  ;;  %v1342_v3 = vadd.f32 %v1341_v4, %v2749_v0 }
 0x2d2   : > { %v726_v30 = vsub.f32 %v2672_v46, %v2866_v2  ;;  %1949 = vpow2.f32 %v781_v36  ;;  %v779_v11 = vmul.f32 1.442695, %v743_v59  ;;  %v3282_v12 = vsub.f32 %v2612_v16, %v2746_v33  ;;  %1853 = vmatprep.subr.bf16.mxu1 %v1852_v45 }
 0x2d3   : > { %1951 = vpow2.f32 %v771_v62  ;;  %v789_v55 = vmul.f32 1.442695, %v748_v13  ;;  %v3283_v51 = vsub.f32 %v2626_v23, %v2775_v24  ;;  %v728_v61 = vsub.f32 %v2678_v49, %v2875_v21  ;;  %1855 = vmatpush3.bf16.msra.mxu1 %v1852_v45 }
 0x2d4   : > { %v747_v8 = vsub.f32 %v3282_v12, %v2843_v56  ;;  %1953 = vpow2.f32 %v785_v20  ;;  %v783_v15 = vmul.f32 1.442695, %v745_v60  ;;  %v3284_v16 = vsub.f32 %v2618_v19, %v2769_v1 }
 0x2d5   : > { %v752_v0 = vsub.f32 %v3283_v51, %v2843_v56  ;;  %1955 = vpow2.f32 %v775_v10  ;;  %v793_v57 = vmul.f32 1.442695, %v750_v58  ;;  %v3285_v4 = vsub.f32 %v2632_v26, %v2777_v5  ;;  %v3292_v58 = vld [vmem:[#allocation10_spill] sm:$0xff] }
 0x2d6   : > { %v749_v33 = vsub.f32 %v3284_v16, %v2843_v56  ;;  %v1343_v42 = vadd.f32 %v1342_v3, %v2758_v52  ;;  %1957 = vpow2.f32 %v779_v11  ;;  %v787_v36 = vmul.f32 1.442695, %v747_v8 }
 0x2d7   : > { %v754_v23 = vsub.f32 %v3285_v4, %v2843_v56  ;;  %v3286_v20 = vsub.f32 %v2624_v22, %v2775_v24  ;;  %v3287_v19 = vsub.f32 %v2630_v25, %v2777_v5  ;;  %1959 = vpow2.f32 %v789_v55 }
 0x2d8   : > { %v797_v62 = vmul.f32 1.442695, %v752_v0  ;;  %v3288_v26 = vsub.f32 %v2638_v29, %v2783_v48  ;;  %v3289_v52 = vsub.f32 %v2636_v28, %v2783_v48  ;;  %1961 = vpow2.f32 %v783_v15 }
 0x2d9   : > { %v751_v59 = vsub.f32 %v3286_v20, %v2843_v56  ;;  %v753_v1 = vsub.f32 %v3287_v19, %v2843_v56  ;;  %v791_v22 = vmul.f32 1.442695, %v749_v33  ;;  %v3290_v25 = vsub.f32 %v2644_v32, %v2789_v50  ;;  %v2953_v19 = vld [vmem:[%s2360_s26 + $0x78] sm:$0xff] }
 0x2da   : > { %v756_v13 = vsub.f32 %v3288_v26, %v2843_v56  ;;  %v755_v60 = vsub.f32 %v3289_v52, %v2843_v56  ;;  %v3291_v5 = vsub.f32 %v2642_v31, %v2789_v50  ;;  %v1946_v29 = vpop.eup %1945  ;;  %v729_v3 = vsub.f32 %v3292_v58, %v2875_v21 }
 0x2db   : > { %v758_v24 = vsub.f32 %v3290_v25, %v2843_v56  ;;  %1963 = vpow2.f32 %v793_v57  ;;  %v801_v28 = vmul.f32 1.442695, %v754_v23  ;;  %v3293_v48 = vsub.f32 %v2650_v35, %v2791_v6  ;;  %940 = vxpose.xlu0.b32.start [1/16] %v1946_v29, 128  ;;  %v1948_v12 = vpop.eup %1947 }
 0x2dc   : > { %v757_v10 = vsub.f32 %v3291_v5, %v2843_v56  ;;  %1965 = vpow2.f32 %v787_v36  ;;  %v795_v32 = vmul.f32 1.442695, %v751_v59  ;;  %v3294_v11 = vsub.f32 %v2648_v34, %v2791_v6  ;;  %v1950_v0 = vpop.eup %1949  ;;  %v2950_v59 = vld [vmem:[%s2360_s26 + $0x70] sm:$0xff] }
 0x2dd   : > { %v760_v45 = vsub.f32 %v3293_v48, %v2843_v56  ;;  %v1344_v50 = vadd.f32 %v1343_v42, %v2761_v27  ;;  %1967 = vpow2.f32 %v797_v62  ;;  %v799_v8 = vmul.f32 1.442695, %v753_v1  ;;  %v1952_v33 = vpop.eup %1951 }
 0x2de   : > { %v759_v31 = vsub.f32 %v3294_v11, %v2843_v56  ;;  %v805_v55 = vmul.f32 1.442695, %v756_v13  ;;  %v803_v51 = vmul.f32 1.442695, %v755_v60  ;;  %v1292_v15 = vadd.f32 %v1948_v12, %v1946_v29  ;;  %v1954_v23 = vpop.eup %1953  ;;  %908 = vxpose.xlu1.b32.start [1/16] %v1952_v33, 128  ;;  %v3299_v60 = vld [vmem:[#allocation15_spill] sm:$0xff] }
 0x2df   : > { %1969 = vpow2.f32 %v791_v22  ;;  %v809_v35 = vmul.f32 1.442695, %v758_v24  ;;  %v807_v16 = vmul.f32 1.442695, %v757_v10  ;;  %v813_v57 = vmul.f32 1.442695, %v760_v45  ;;  %941 = vxpose.xlu0.b32.cont [2/16] %v1948_v12, 128  ;;  %v1956_v1 = vpop.eup %1955 }
 0x2e0   : > { %1971 = vpow2.f32 %v801_v28  ;;  %v3295_v34 = vsub.f32 %v2656_v38, %v2805_v39  ;;  %v3296_v6 = vsub.f32 %v2654_v37, %v2805_v39  ;;  %v1293_v42 = vadd.f32 %v1950_v0, %v1292_v15  ;;  %v1958_v26 = vpop.eup %1957 }
 0x2e1   : > { %1973 = vpow2.f32 %v795_v32  ;;  %v811_v36 = vmul.f32 1.442695, %v759_v31  ;;  %v1345_v20 = vadd.f32 %v1344_v50, %v2794_v63  ;;  %v3297_v38 = vsub.f32 %v2662_v41, %v2813_v14  ;;  %v1960_v25 = vpop.eup %1959  ;;  %v3301_v31 = vld [vmem:[#allocation17_spill] sm:$0xff] }
 0x2e2   : > { %v762_v27 = vsub.f32 %v3295_v34, %v2843_v56  ;;  %v761_v4 = vsub.f32 %v3296_v6, %v2843_v56  ;;  %1975 = vpow2.f32 %v805_v55  ;;  %v3298_v39 = vsub.f32 %v2660_v40, %v2813_v14  ;;  %v1962_v40 = vpop.eup %1961  ;;  %909 = vxpose.xlu1.b32.cont [2/16] %v1956_v1, 128 }
 0x2e3   : > { %v764_v37 = vsub.f32 %v3297_v38, %v2843_v56  ;;  %v766_v63 = vsub.f32 %v725_v18, %v2843_v56  ;;  %v1294_v13 = vadd.f32 %v1954_v23, %v1293_v42  ;;  %v1271_v52 = vadd.f32 %v1956_v1, %v1952_v33  ;;  %942 = vxpose.xlu0.b32.cont [3/16] %v1950_v0, 128 }
 0x2e4   : > { %v763_v62 = vsub.f32 %v3298_v39, %v2843_v56  ;;  %1977 = vpow2.f32 %v799_v8  ;;  %v1346_v22 = vadd.f32 %v1345_v20, %v3299_v60  ;;  %v817_v41 = vmul.f32 1.442695, %v762_v27 }
 0x2e5   : > { %1979 = vpow2.f32 %v809_v35  ;;  %v815_v24 = vmul.f32 1.442695, %v761_v4  ;;  %v1856_v5 = vpack.c.bf16 %v2953_v19, %v2950_v59  ;;  %v1272_v14 = vadd.f32 %v1958_v26, %v1271_v52  ;;  %v1964_v29 = vpop.eup %1963 }
 0x2e6   : > { %1981 = vpow2.f32 %v803_v51  ;;  %v1347_v18 = vadd.f32 %v1346_v22, %v3300_v44  ;;  %v1295_v10 = vadd.f32 %v1960_v25, %v1294_v13  ;;  %v821_v28 = vmul.f32 1.442695, %v764_v37  ;;  %v1966_v32 = vpop.eup %1965  ;;  %910 = vxpose.xlu1.b32.cont [3/16] %v1958_v26, 128 }
 0x2e7   : > { %1983 = vpow2.f32 %v813_v57  ;;  %v765_v48 = vsub.f32 %v724_v17, %v2843_v56  ;;  %v768_v45 = vsub.f32 %v727_v53, %v2843_v56  ;;  %1857 = vmatprep.subr.bf16.mxu1 %v1856_v5  ;;  %v1273_v11 = vadd.f32 %v1962_v40, %v1272_v14  ;;  %v1968_v8 = vpop.eup %1967  ;;  %943 = vxpose.xlu0.b32.cont [4/16] %v1954_v23, 128 }
 0x2e8   : > { %1985 = vpow2.f32 %v807_v16  ;;  %v1348_v50 = vadd.f32 %v1347_v18, %v3301_v31  ;;  %1859 = vmatpush3.bf16.msra.mxu1 %v1856_v5  ;;  %v1296_v12 = vadd.f32 %v1964_v29, %v1295_v10  ;;  %v819_v55 = vmul.f32 1.442695, %v763_v62 }
 0x2e9   : > { %1987 = vpow2.f32 %v817_v41  ;;  %v825_v51 = vmul.f32 1.442695, %v766_v63  ;;  %v770_v43 = vsub.f32 %v729_v3, %v2843_v56  ;;  %v1970_v9 = vpop.eup %1969  ;;  %v1274_v47 = vadd.f32 %v1966_v32, %v1273_v11 }
 0x2ea   : > { %1989 = vpow2.f32 %v811_v36  ;;  %v1349_v17 = vadd.f32 %v1348_v50, %v2859_v54  ;;  %v1297_v53 = vadd.f32 %v1968_v8, %v1296_v12  ;;  %v1972_v0 = vpop.eup %1971  ;;  %v823_v15 = vmul.f32 1.442695, %v765_v48  ;;  %911 = vxpose.xlu1.b32.cont [4/16] %v1962_v40, 128 }
 0x2eb   : > { %1991 = vpow2.f32 %v821_v28  ;;  %v829_v35 = vmul.f32 1.442695, %v768_v45  ;;  %v767_v16 = vsub.f32 %v726_v30, %v2843_v56  ;;  %v1974_v33 = vpop.eup %1973  ;;  %v1275_v58 = vadd.f32 %v1970_v9, %v1274_v47  ;;  %944 = vxpose.xlu0.b32.cont [5/16] %v1960_v25, 128  ;;  %v1337_v28 = vld [vmem:[#allocation3] sm:$0x1] }
 0x2ec   : > { %1993 = vpow2.f32 %v815_v24  ;;  %v1350_v3 = vadd.f32 %v1349_v17, %v2862_v7  ;;  %v1298_v57 = vadd.f32 %v1972_v0, %v1297_v53  ;;  %v1976_v34 = vpop.eup %1975  ;;  %v833_v27 = vmul.f32 1.442695, %v770_v43 }
 0x2ed   : > { %1995 = vpow2.f32 %v825_v51  ;;  %v769_v54 = vsub.f32 %v728_v61, %v2843_v56  ;;  %v1276_v4 = vadd.f32 %v1974_v33, %v1275_v58  ;;  %v827_v7 = vmul.f32 1.442695, %v767_v16 }
 0x2ee   : > { %v1978_v6 = vpop.eup %1977  ;;  %1997 = vpow2.f32 %v819_v55  ;;  %v1351_v46 = vadd.f32 %v1350_v3, %v2950_v59  ;;  %v1299_v2 = vadd.f32 %v1976_v34, %v1298_v57  ;;  %912 = vxpose.xlu1.b32.cont [5/16] %v1966_v32, 128  ;;  %v3302_v3 = vld [vmem:[#allocation12_spill] sm:$0xff]  ;;  %v3303_v57 = vld [vmem:[#allocation14_spill] sm:$0xff] }
 0x2ef   : > { %v1980_v30 = vpop.eup %1979  ;;  %1999 = vpow2.f32 %v829_v35  ;;  %v1277_v36 = vadd.f32 %v1978_v6, %v1276_v4  ;;  %v831_v49 = vmul.f32 1.442695, %v769_v54  ;;  %945 = vxpose.xlu0.b32.cont [6/16] %v1964_v29, 128 }
 0x2f0   : > { %v1982_v23 = vpop.eup %1981  ;;  %2001 = vpow2.f32 %v823_v15  ;;  %v1352_v42 = vadd.f32 %v1351_v46, %v2953_v19  ;;  %v1300_v20 = vadd.f32 %v1980_v30, %v1299_v2  ;;  %v3306_v46 = vmov 0  }
 0x2f1   : > { %v1984_v1 = vpop.eup %1983  ;;  %2003 = vpow2.f32 %v833_v27  ;;  %v1278_v61 = vadd.f32 %v1982_v23, %v1277_v36 }
 0x2f2   : > { %v1986_v56 = vpop.eup %1985  ;;  %v1353_v21 = vrot.slane %v1352_v42, 4  ;;  %v1301_v38 = vadd.f32 %v1984_v1, %v1300_v20  ;;  %2005 = vpow2.f32 %v827_v7  ;;  %913 = vxpose.xlu1.b32.cont [6/16] %v1970_v9, 128 }
 0x2f3   : > { %v1988_v59 = vpop.eup %1987  ;;  %v1279_v62 = vadd.f32 %v1986_v56, %v1278_v61  ;;  %2007 = vpow2.f32 %v831_v49  ;;  %946 = vxpose.xlu0.b32.cont [7/16] %v1968_v8, 128 }
 0x2f4   : > { %v1990_v37 = vpop.eup %1989  ;;  %v1354_v39 = vadd.f32 %v1353_v21, %v1352_v42  ;;  %v1302_v63 = vadd.f32 %v1988_v59, %v1301_v38 }
 0x2f5   : > { %v1992_v26 = vpop.eup %1991  ;;  %v1280_v52 = vadd.f32 %v1990_v37, %v1279_v62 }
 0x2f6   : > { %v1994_v19 = vpop.eup %1993  ;;  %v1355_v13 = vrot.slane %v1354_v39, 2  ;;  %v1303_v60 = vadd.f32 %v1992_v26, %v1302_v63  ;;  %914 = vxpose.xlu1.b32.cont [7/16] %v1974_v33, 128 }
 0x2f7   : > { %v1996_v22 = vpop.eup %1995  ;;  %v1281_v24 = vadd.f32 %v1994_v19, %v1280_v52  ;;  %947 = vxpose.xlu0.b32.cont [8/16] %v1972_v0, 128 }
 0x2f8   : > { %v1998_v25 = vpop.eup %1997  ;;  %v1356_v41 = vadd.f32 %v1355_v13, %v1354_v39  ;;  %v1304_v5 = vadd.f32 %v1996_v22, %v1303_v60 }
 0x2f9   : > { %v2000_v40 = vpop.eup %1999  ;;  %v1282_v18 = vadd.f32 %v1998_v25, %v1281_v24 }
 0x2fa   : > { %v2002_v14 = vpop.eup %2001  ;;  %v1357_v44 = vrot.slane %v1356_v41, 1  ;;  %v1305_v10 = vadd.f32 %v2000_v40, %v1304_v5  ;;  %915 = vxpose.xlu1.b32.cont [8/16] %v1978_v6, 128  ;;  %v3305_v6 = vld [vmem:[#allocation13_spill] sm:$0xff] }
 0x2fb   : > { %v2004_v29 = vpop.eup %2003  ;;  %v1283_v45 = vadd.f32 %v2002_v14, %v1282_v18  ;;  %948 = vxpose.xlu0.b32.cont [9/16] %v1976_v34, 128  ;;  %v3304_v34 = vsub.f32 %v3302_v3, %v3303_v57  ;;  %v837_v3 = vld [vmem:[%s2371_s8 + $0x10] sm:$0xff] }
 0x2fc   : > { %v1358_v48 = vadd.f32 %v1357_v44, %v1356_v41  ;;  %v1306_v32 = vadd.f32 %v2004_v29, %v1305_v10  ;;  %v2006_v11 = vpop.eup %2005  ;;  %v2151_v44 = vmov 1966171168  }
 0x2fd   : > { %v1284_v50 = vadd.f32 %v2006_v11, %v1283_v45  ;;  %v2008_v8 = vpop.eup %2007  ;;  %v696_v27 = vmul.f32 1.442695, %v3304_v34  ;;  %v1317_v18 = vunpack.c.l.s4 %v2151_v44 }
 0x2fe   : > { %v1359_v31 = vadd.f32 %v1358_v48, %v1337_v28  ;;  %v1307_v12 = vrot.slane %v1306_v32, 4  ;;  %916 = vxpose.xlu1.b32.cont [9/16] %v1982_v23, 128  ;;  %v3307_v48 = vld [vmem:[#allocation11_spill] sm:$0xff] }
 0x2ff   : > { %v1285_v55 = vadd.f32 %v2008_v8, %v1284_v50  ;;  %949 = vxpose.xlu0.b32.cont [10/16] %v1980_v30, 128  ;;  %2009 = vpow2.f32 %v696_v27 }
 0x300   : > { %1360 = vst [vmem:[#allocation3] sm:$0x1] %v1359_v31  ;;  %v1308_v51 = vadd.f32 %v1307_v12, %v1306_v32 }
 0x301   : > { %v1286_v43 = vrot.slane %v1285_v55, 4 }
 0x302   : > { %v1309_v9 = vrot.slane %v1308_v51, 2  ;;  %917 = vxpose.xlu1.b32.cont [10/16] %v1986_v56, 128 }
 0x303   : > { %v1287_v47 = vadd.f32 %v1286_v43, %v1285_v55  ;;  %950 = vxpose.xlu0.b32.cont [11/16] %v1984_v1, 128  ;;  %v3308_v55 = vlaneseq }
 0x304   : > { %v1310_v17 = vadd.f32 %v1309_v9, %v1308_v51 }
 0x305   : > { %v1288_v53 = vrot.slane %v1287_v47, 2  ;;  %vm3014_vm3 = vcmp.lt.s32.totalorder %v3308_v55, 256 }
 0x306   : > { %v1311_v0 = vrot.slane %v1310_v17, 1  ;;  %918 = vxpose.xlu1.b32.cont [11/16] %v1990_v37, 128 }
 0x307   : > { %v1289_v15 = vadd.f32 %v1288_v53, %v1287_v47  ;;  %951 = vxpose.xlu0.b32.cont [12/16] %v1988_v59, 128  ;;  %v836_v47 = vld [vmem:[%s2371_s8 + $0x8] sm:$0xff] }
 0x308   : > { %v2996_v16 = vadd.f32 %v1311_v0, %v1310_v17  ;;  %v835_v17 = vld [vmem:[%s2371_s8] sm:$0xff] }
 0x309   : > { %v1290_v35 = vrot.slane %v1289_v15, 1  ;;  %v2010_v54 = vpop.eup %2009 }
 0x30a   : > { %919 = vxpose.xlu1.b32.cont [12/16] %v1994_v19, 128  ;;  %v871_v4 = vrot.slane %v2010_v54, %v3305_v6 }
 0x30b   : > { %v2998_v33 = vadd.f32 %v1290_v35, %v1289_v15  ;;  %952 = vxpose.xlu0.b32.cont [13/16] %v1992_v26, 128 }
 0x30d   : > { %v1315_v58 = vcombine.low %v2998_v33, %v2996_v16 }
 0x30e   : > { %920 = vxpose.xlu1.b32.cont [13/16] %v1998_v25, 128 }
 0x30f   : > { %953 = vxpose.xlu0.b32.cont [14/16] %v1996_v22, 128 }
 0x312   : > { %921 = vxpose.xlu1.b32.cont [14/16] %v2002_v14, 128 }
 0x313   : > { %954 = vxpose.xlu0.b32.cont [15/16] %v2000_v40, 128 }
 0x316   : > { %922 = vxpose.xlu1.b32.cont [15/16] %v2006_v11, 128  ;;  %v1261_v11 = vld [vmem:[%s2376_s12] sm:$0x3] }
 0x317   : > { %955 = vxpose.xlu0.b32.end [16/16] %v2004_v29, 128  ;;  %v1318_v29 = vunpack.c.0.s8 %v1317_v18  ;;  %v848_v18 = vld [vmem:[%s2371_s8 + $0x68] sm:$0xff] }
 0x319   : > { %v1321_v45 = vsub.s32 %v1318_v29, %v3307_v48 }
 0x31a   : > { %923 = vxpose.xlu1.b32.end [16/16] %v2008_v8, 128 }
 0x31b   : > { %v1322_v32 = vrot.slane %v1315_v58, %v1321_v45  ;;  %v838_v58 = vld [vmem:[%s2371_s8 + $0x18] sm:$0xff] }
 0x31d   : > { %v1329_v8 = vrot.slane %v1322_v32, %v1321_v45 }
 0x338   : > { %1944 = vset.pattern.permute.xlu1 %v3306_v46  ;;  %v840_v46 = vld [vmem:[%s2371_s8 + $0x28] sm:$0xff] }
 0x339   : > { %873 = vperm.xlu1 %1944, %v871_v4  }
 0x340   : > { %1263 = vperm.xlu0 %1943, %v2010_v54  }
 0x35b   : > { %v956_v30 = vpop.trf.xlu0 }
 0x35e   : > { %v924_v2 = vpop.trf.xlu1 }
 0x35f   : > { %1748 = vmatprep.mubr.f32.mxu1 %v924_v2  ;;  %v957_v23 = vpop.trf.xlu0  ;;  %v839_v2 = vld [vmem:[%s2371_s8 + $0x20] sm:$0xff] }
 0x362   : > { %v925_v7 = vpop.trf.xlu1 }
 0x363   : > { %1749 = vmatmul.mubr.f32.vlgmr.msra.gmra.mrb[0].mxu1 %v925_v7  ;;  %v958_v20 = vpop.trf.xlu0 }
 0x366   : > { %v926_v42 = vpop.trf.xlu1 }
 0x367   : > { %1751 = vmatprep.mubr.f32.mxu1 %v926_v42  ;;  %v959_v49 = vpop.trf.xlu0 }
 0x36a   : > { %v927_v36 = vpop.trf.xlu1 }
 0x36b   : > { %1752 = vmatmul.mubr.f32.gmra.mrb[2].mxu1 %v927_v36  ;;  %v960_v61 = vpop.trf.xlu0 }
 0x36e   : > { %v928_v1 = vpop.trf.xlu1 }
 0x36f   : > { %1754 = vmatprep.mubr.f32.mxu1 %v928_v1  ;;  %v961_v59 = vpop.trf.xlu0  ;;  %v842_v1 = vld [vmem:[%s2371_s8 + $0x38] sm:$0xff] }
 0x372   : > { %v929_v56 = vpop.trf.xlu1 }
 0x373   : > { %1755 = vmatmul.mubr.f32.gmra.mrb[4].mxu1 %v929_v56  ;;  %v962_v62 = vpop.trf.xlu0 }
 0x376   : > { %v930_v21 = vpop.trf.xlu1 }
 0x377   : > { %1757 = vmatprep.mubr.f32.mxu1 %v930_v21  ;;  %v963_v26 = vpop.trf.xlu0 }
 0x37a   : > { %v931_v38 = vpop.trf.xlu1 }
 0x37b   : > { %1758 = vmatmul.mubr.f32.gmra.mrb[6].mxu1 %v931_v38  ;;  %v964_v52 = vpop.trf.xlu0 }
 0x37e   : > { %v932_v37 = vpop.trf.xlu1 }
 0x37f   : > { %1760 = vmatprep.mubr.f32.mxu1 %v932_v37  ;;  %v965_v22 = vpop.trf.xlu0 }
 0x382   : > { %v933_v39 = vpop.trf.xlu1 }
 0x383   : > { %1761 = vmatmul.mubr.f32.gmra.mrb[8].mxu1 %v933_v39  ;;  %v966_v24 = vpop.trf.xlu0  ;;  %v844_v39 = vld [vmem:[%s2371_s8 + $0x48] sm:$0xff] }
 0x386   : > { %v934_v63 = vpop.trf.xlu1 }
 0x387   : > { %1763 = vmatprep.mubr.f32.mxu1 %v934_v63  ;;  %v967_v5 = vpop.trf.xlu0 }
 0x38a   : > { %v935_v19 = vpop.trf.xlu1 }
 0x38b   : > { %1764 = vmatmul.mubr.f32.gmra.mrb[10].mxu1 %v935_v19  ;;  %v968_v40 = vpop.trf.xlu0 }
 0x38e   : > { %v936_v13 = vpop.trf.xlu1 }
 0x38f   : > { %1766 = vmatprep.mubr.f32.mxu1 %v936_v13  ;;  %v969_v14 = vpop.trf.xlu0 }
 0x392   : > { %v937_v60 = vpop.trf.xlu1 }
 0x393   : > { %1767 = vmatmul.mubr.f32.gmra.mrb[12].mxu1 %v937_v60  ;;  %v970_v10 = vpop.trf.xlu0 }
 0x396   : > { %v938_v25 = vpop.trf.xlu1 }
 0x397   : > { %1769 = vmatprep.mubr.f32.mxu1 %v938_v25  ;;  %v971_v28 = vpop.trf.xlu0  ;;  %v845_v25 = vld [vmem:[%s2371_s8 + $0x50] sm:$0xff] }
 0x39a   : > { %v939_v41 = vpop.trf.xlu1 }
 0x39b   : > { %1770 = vmatmul.mubr.f32.gmra.mrb[14].mxu1 %v939_v41 }
 0x39c   : > { %1772 = vmatprep.mubr.f32.mxu1 %v956_v30 }
 0x39f   : > { %1773 = vmatmul.mubr.f32.gmra.mrb[16].mxu1 %v957_v23 }
 0x3a0   : > { %1775 = vmatprep.mubr.f32.mxu1 %v958_v20 }
 0x3a3   : > { %1776 = vmatmul.mubr.f32.gmra.mrb[18].mxu1 %v959_v49  ;;  %v841_v49 = vld [vmem:[%s2371_s8 + $0x30] sm:$0xff] }
 0x3a4   : > { %1778 = vmatprep.mubr.f32.mxu1 %v960_v61 }
 0x3a7   : > { %1779 = vmatmul.mubr.f32.gmra.mrb[20].mxu1 %v961_v59 }
 0x3a8   : > { %1781 = vmatprep.mubr.f32.mxu1 %v962_v62  ;;  %v843_v62 = vld [vmem:[%s2371_s8 + $0x40] sm:$0xff] }
 0x3ab   : > { %1782 = vmatmul.mubr.f32.gmra.mrb[22].mxu1 %v963_v26 }
 0x3ac   : > { %1784 = vmatprep.mubr.f32.mxu1 %v964_v52 }
 0x3af   : > { %1785 = vmatmul.mubr.f32.gmra.mrb[24].mxu1 %v965_v22  ;;  %v846_v22 = vld [vmem:[%s2371_s8 + $0x58] sm:$0xff] }
 0x3b0   : > { %1787 = vmatprep.mubr.f32.mxu1 %v966_v24 }
 0x3b3   : > { %1788 = vmatmul.mubr.f32.gmra.mrb[26].mxu1 %v967_v5 }
 0x3b4   : > { %1790 = vmatprep.mubr.f32.mxu1 %v968_v40 }
 0x3b7   : > { %1791 = vmatmul.mubr.f32.gmra.mrb[28].mxu1 %v969_v14 }
 0x3b8   : > { %1793 = vmatprep.mubr.f32.mxu1 %v970_v10  ;;  %v3021_v9 = vpop.permute.xlu1 %873  ;;  %v847_v10 = vld [vmem:[%s2371_s8 + $0x60] sm:$0xff] }
 0x3b9   : > { %v877_v53 = vmul.f32 %v3021_v9, %v836_v47  ;;  %v876_v15 = vmul.f32 %v3021_v9, %v835_v17  ;;  %v879_v57 = vmul.f32 %v3021_v9, %v838_v58  ;;  %v878_v27 = vmul.f32 %v3021_v9, %v837_v3 }
 0x3ba   : > { %v881_v30 = vmul.f32 %v3021_v9, %v840_v46  ;;  %v880_v23 = vmul.f32 %v3021_v9, %v839_v2  ;;  %v883_v56 = vmul.f32 %v3021_v9, %v842_v1  ;;  %v882_v61 = vmul.f32 %v3021_v9, %v841_v49 }
 0x3bb   : > { %1794 = vmatmul.mubr.f32.gmra.mrb[30].mxu1 %v971_v28  ;;  %v885_v63 = vmul.f32 %v3021_v9, %v844_v39  ;;  %v884_v19 = vmul.f32 %v3021_v9, %v843_v62  ;;  %v887_v41 = vmul.f32 %v3021_v9, %v846_v22  ;;  %v886_v5 = vmul.f32 %v3021_v9, %v845_v25 }
 0x3bc   : > { %v889_v29 = vmul.f32 %v3021_v9, %v848_v18  ;;  %v888_v48 = vmul.f32 %v3021_v9, %v847_v10 }
 0x3bf   : > { %v1264_v31 = vpop.permute.xlu0 %1263 }
 0x3c0   : > { %v1269_v50 = vrot.slane %v1264_v31, %v3305_v6  ;;  %v850_v31 = vld [vmem:[%s2371_s8 + $0x78] sm:$0xff] }
 0x3c2   : > { %v1270_v12 = vmul.f32 %v1269_v50, %v1261_v11  ;;  %v849_v50 = vld [vmem:[%s2371_s8 + $0x70] sm:$0xff] }
 0x3c3   : > { %v890_v55 = vmul.f32 %v3021_v9, %v849_v50 }
 0x3c4   : > { %v1331_v43 = vadd.f32 %v1329_v8, %v1270_v12  ;;  %v891_v12 = vmul.f32 %v3021_v9, %v850_v31 }
 0x3c6   : > { %1336 = vst.msk [vmem:[%s2376_s12] sm:$0x3] %vm3014_vm3, %v1331_v43  ;;  %v852_v43 = vld [vmem:[%s2371_s8 + $0x88] sm:$0xff] }
 0x436   : > { %v1750_v0 = vpop.f32.mrb[0].mxu1 }
 0x437   : > { %v1198_v35 = vadd.f32 %v1750_v0, %v877_v53  ;;  %v1038_v16 = vpop.f32.mrb[1].mxu1  ;;  %v851_v53 = vld [vmem:[%s2371_s8 + $0x80] sm:$0xff] }
 0x438   : > { %v1197_v33 = vadd.f32 %v1038_v16, %v876_v15  ;;  %v893_v15 = vmul.f32 %v3021_v9, %v852_v43  ;;  %v892_v16 = vmul.f32 %v3021_v9, %v851_v53 }
 0x439   : > { %1230 = vst [vmem:[%s2371_s8 + $0x8] sm:$0xff] %v1198_v35 }
 0x43a   : > { %1229 = vst [vmem:[%s2371_s8] sm:$0xff] %v1197_v33  ;;  %v854_v33 = vld [vmem:[%s2371_s8 + $0x98] sm:$0xff] }
 0x43e   : > { %v1753_v34 = vpop.f32.mrb[2].mxu1 }
 0x43f   : > { %v1200_v54 = vadd.f32 %v1753_v34, %v879_v57  ;;  %v1048_v6 = vpop.f32.mrb[3].mxu1  ;;  %v853_v57 = vld [vmem:[%s2371_s8 + $0x90] sm:$0xff] }
 0x440   : > { %v1199_v4 = vadd.f32 %v1048_v6, %v878_v27  ;;  %v895_v27 = vmul.f32 %v3021_v9, %v854_v33  ;;  %v894_v6 = vmul.f32 %v3021_v9, %v853_v57  ;;  %v3311_v57 = vld [vmem:[#allocation13_spill] sm:$0xff] (!%p1664_p5) }
 0x441   : > { %1232 = vst [vmem:[%s2371_s8 + $0x18] sm:$0xff] %v1200_v54 }
 0x442   : > { %1231 = vst [vmem:[%s2371_s8 + $0x10] sm:$0xff] %v1199_v4  ;;  %v856_v4 = vld [vmem:[%s2371_s8 + $0xa8] sm:$0xff] }
 0x446   : > { %v1756_v7 = vpop.f32.mrb[4].mxu1 }
 0x447   : > { %v1202_v42 = vadd.f32 %v1756_v7, %v881_v30  ;;  %v1058_v36 = vpop.f32.mrb[5].mxu1  ;;  %v855_v30 = vld [vmem:[%s2371_s8 + $0xa0] sm:$0xff] }
 0x448   : > { %v1201_v20 = vadd.f32 %v1058_v36, %v880_v23  ;;  %v897_v23 = vmul.f32 %v3021_v9, %v856_v4  ;;  %v896_v36 = vmul.f32 %v3021_v9, %v855_v30 }
 0x449   : > { %1234 = vst [vmem:[%s2371_s8 + $0x28] sm:$0xff] %v1202_v42  ;;  %v1369_v33 = vld [vmem:[%s2371_s8 + $0x10] sm:$0xff] (!%p1664_p5) }
 0x44a   : > { %1233 = vst [vmem:[%s2371_s8 + $0x20] sm:$0xff] %v1201_v20  ;;  %v858_v20 = vld [vmem:[%s2371_s8 + $0xb8] sm:$0xff] }
 0x44e   : > { %v1759_v21 = vpop.f32.mrb[6].mxu1 }
 0x44f   : > { %v1204_v38 = vadd.f32 %v1759_v21, %v883_v56  ;;  %v1068_v59 = vpop.f32.mrb[7].mxu1  ;;  %v857_v56 = vld [vmem:[%s2371_s8 + $0xb0] sm:$0xff] }
 0x450   : > { %v1203_v37 = vadd.f32 %v1068_v59, %v882_v61  ;;  %v899_v61 = vmul.f32 %v3021_v9, %v858_v20  ;;  %v898_v59 = vmul.f32 %v3021_v9, %v857_v56 }
 0x451   : > { %1236 = vst [vmem:[%s2371_s8 + $0x38] sm:$0xff] %v1204_v38 }
 0x452   : > { %1235 = vst [vmem:[%s2371_s8 + $0x30] sm:$0xff] %v1203_v37  ;;  %v860_v37 = vld [vmem:[%s2371_s8 + $0xc8] sm:$0xff] }
 0x456   : > { %v1762_v26 = vpop.f32.mrb[8].mxu1 }
 0x457   : > { %v1206_v13 = vadd.f32 %v1762_v26, %v885_v63  ;;  %v1078_v52 = vpop.f32.mrb[9].mxu1  ;;  %v859_v63 = vld [vmem:[%s2371_s8 + $0xc0] sm:$0xff] }
 0x458   : > { %v1205_v60 = vadd.f32 %v1078_v52, %v884_v19  ;;  %v901_v19 = vmul.f32 %v3021_v9, %v860_v37  ;;  %v900_v52 = vmul.f32 %v3021_v9, %v859_v63 }
 0x459   : > { %1238 = vst [vmem:[%s2371_s8 + $0x48] sm:$0xff] %v1206_v13 }
 0x45a   : > { %1237 = vst [vmem:[%s2371_s8 + $0x40] sm:$0xff] %v1205_v60  ;;  %v862_v60 = vld [vmem:[%s2371_s8 + $0xd8] sm:$0xff] }
 0x45e   : > { %v1765_v24 = vpop.f32.mrb[10].mxu1 }
 0x45f   : > { %v1208_v40 = vadd.f32 %v1765_v24, %v887_v41  ;;  %v1088_v14 = vpop.f32.mrb[11].mxu1  ;;  %v861_v41 = vld [vmem:[%s2371_s8 + $0xd0] sm:$0xff] }
 0x460   : > { %v1207_v44 = vadd.f32 %v1088_v14, %v886_v5  ;;  %v903_v5 = vmul.f32 %v3021_v9, %v862_v60  ;;  %v902_v14 = vmul.f32 %v3021_v9, %v861_v41 }
 0x461   : > { %1240 = vst [vmem:[%s2371_s8 + $0x58] sm:$0xff] %v1208_v40 }
 0x462   : > { %1239 = vst [vmem:[%s2371_s8 + $0x50] sm:$0xff] %v1207_v44  ;;  %v864_v44 = vld [vmem:[%s2371_s8 + $0xe8] sm:$0xff] }
 0x466   : > { %v1768_v28 = vpop.f32.mrb[12].mxu1 }
 0x467   : > { %v1210_v45 = vadd.f32 %v1768_v28, %v889_v29  ;;  %v1098_v32 = vpop.f32.mrb[13].mxu1  ;;  %v863_v29 = vld [vmem:[%s2371_s8 + $0xe0] sm:$0xff] }
 0x468   : > { %v1209_v11 = vadd.f32 %v1098_v32, %v888_v48  ;;  %v905_v48 = vmul.f32 %v3021_v9, %v864_v44  ;;  %v904_v32 = vmul.f32 %v3021_v9, %v863_v29  ;;  %v1378_v56 = vld [vmem:[%s2371_s8 + $0x58] sm:$0xff] (!%p1664_p5) }
 0x469   : > { %1242 = vst [vmem:[%s2371_s8 + $0x68] sm:$0xff] %v1210_v45 }
 0x46a   : > { %1241 = vst [vmem:[%s2371_s8 + $0x60] sm:$0xff] %v1209_v11  ;;  %v866_v11 = vld [vmem:[%s2371_s8 + $0xf8] sm:$0xff] }
 0x46e   : > { %v1771_v8 = vpop.f32.mrb[14].mxu1 }
 0x46f   : > { %v1212_v47 = vadd.f32 %v1771_v8, %v891_v12  ;;  %v1108_v17 = vpop.f32.mrb[15].mxu1  ;;  %v865_v12 = vld [vmem:[%s2371_s8 + $0xf0] sm:$0xff] }
 0x470   : > { %v1211_v0 = vadd.f32 %v1108_v17, %v890_v55  ;;  %v907_v55 = vmul.f32 %v3021_v9, %v866_v11 }
 0x471   : > { %1244 = vst [vmem:[%s2371_s8 + $0x78] sm:$0xff] %v1212_v47  ;;  %v906_v47 = vmul.f32 %v3021_v9, %v865_v12  ;;  %v1367_v9 = vld [vmem:[%s2371_s8] sm:$0xff] (!%p1664_p5) }
 0x472   : > { %1243 = vst [vmem:[%s2371_s8 + $0x70] sm:$0xff] %v1211_v0  ;;  %v1774_v35 = vpop.f32.mrb[16].mxu1 }
 0x473   : > { %v1214_v58 = vadd.f32 %v1774_v35, %v893_v15  ;;  %v1118_v3 = vpop.f32.mrb[17].mxu1  ;;  %v1399_v15 = vld [vmem:[#allocation3] sm:$0x1] (!%p1664_p5) }
 0x474   : > { %v1213_v34 = vadd.f32 %v1118_v3, %v892_v16  ;;  %v1400_v35 = vmul.f32 (!%p1664_p5), 0.0001, %v1399_v15  ;;  %v1368_v16 = vld [vmem:[%s2371_s8 + $0x8] sm:$0xff] (!%p1664_p5)  ;;  %v1371_v3 = vld [vmem:[%s2371_s8 + $0x20] sm:$0xff] (!%p1664_p5) }
 0x475   : > { %1246 = vst [vmem:[%s2371_s8 + $0x88] sm:$0xff] %v1214_v58  ;;  %v1370_v58 = vld [vmem:[%s2371_s8 + $0x18] sm:$0xff] (!%p1664_p5) }
 0x476   : > { %1245 = vst [vmem:[%s2371_s8 + $0x80] sm:$0xff] %v1213_v34  ;;  %v1777_v54 = vpop.f32.mrb[18].mxu1  ;;  %v3126_v34 = vrot.slane (!%p1664_p5), %v1400_v35, %v3311_v57 }
 0x477   : > { %v1216_v46 = vadd.f32 %v1777_v54, %v895_v27  ;;  %v1128_v2 = vpop.f32.mrb[19].mxu1  ;;  %v1372_v27 = vld [vmem:[%s2371_s8 + $0x28] sm:$0xff] (!%p1664_p5)  ;;  %v1373_v54 = vld [vmem:[%s2371_s8 + $0x30] sm:$0xff] (!%p1664_p5) }
 0x478   : > { %v1215_v7 = vadd.f32 %v1128_v2, %v894_v6  ;;  %v1374_v6 = vld [vmem:[%s2371_s8 + $0x38] sm:$0xff] (!%p1664_p5)  ;;  %v1407_v4 = vadd.f32 (!%p1664_p5), %v3126_v34, %v1367_v9  ;;  %v1409_v2 = vadd.f32 (!%p1664_p5), %v3126_v34, %v1369_v33  ;;  %v1410_v30 = vadd.f32 (!%p1664_p5), %v3126_v34, %v1370_v58 }
 0x479   : > { %1248 = vst [vmem:[%s2371_s8 + $0x98] sm:$0xff] %v1216_v46  ;;  %v1408_v46 = vadd.f32 (!%p1664_p5), %v3126_v34, %v1368_v16  ;;  %v1412_v20 = vadd.f32 (!%p1664_p5), %v3126_v34, %v1372_v27  ;;  %v1382_v63 = vld [vmem:[%s2371_s8 + $0x78] sm:$0xff] (!%p1664_p5)  ;;  %v1418_v41 = vadd.f32 (!%p1664_p5), %v3126_v34, %v1378_v56 }
 0x47a   : > { %1247 = vst [vmem:[%s2371_s8 + $0x90] sm:$0xff] %v1215_v7  ;;  %v1780_v42 = vpop.f32.mrb[20].mxu1  ;;  %v1375_v7 = vld [vmem:[%s2371_s8 + $0x40] sm:$0xff] (!%p1664_p5)  ;;  %v1441_v37 = vmul.f32 (!%p1664_p5), 0.0625, %v1409_v2 }
 0x47b   : > { %v1218_v1 = vadd.f32 %v1780_v42, %v897_v23  ;;  %v1138_v49 = vpop.f32.mrb[21].mxu1  ;;  %v1376_v23 = vld [vmem:[%s2371_s8 + $0x48] sm:$0xff] (!%p1664_p5)  ;;  %v1377_v42 = vld [vmem:[%s2371_s8 + $0x50] sm:$0xff] (!%p1664_p5)  ;;  %v1415_v60 = vadd.f32 (!%p1664_p5), %v3126_v34, %v1375_v7 }
 0x47c   : > { %v1217_v21 = vadd.f32 %v1138_v49, %v896_v36  ;;  %v1411_v36 = vadd.f32 (!%p1664_p5), %v3126_v34, %v1371_v3  ;;  %v1414_v49 = vadd.f32 (!%p1664_p5), %v3126_v34, %v1374_v6  ;;  %1473 = vst [vmem:[%s2371_s8 + $0x10] sm:$0xff] (!%p1664_p5), %v1441_v37 }
 0x47d   : > { %1250 = vst [vmem:[%s2371_s8 + $0xa8] sm:$0xff] %v1218_v1  ;;  %v1413_v1 = vadd.f32 (!%p1664_p5), %v3126_v34, %v1373_v54 }
 0x47e   : > { %1249 = vst [vmem:[%s2371_s8 + $0xa0] sm:$0xff] %v1217_v21  ;;  %v1783_v38 = vpop.f32.mrb[22].mxu1  ;;  %v1379_v21 = vld [vmem:[%s2371_s8 + $0x60] sm:$0xff] (!%p1664_p5) }
 0x47f   : > { %v1220_v39 = vadd.f32 %v1783_v38, %v899_v61  ;;  %v1148_v62 = vpop.f32.mrb[23].mxu1  ;;  %v1380_v61 = vld [vmem:[%s2371_s8 + $0x68] sm:$0xff] (!%p1664_p5)  ;;  %v1439_v38 = vmul.f32 (!%p1664_p5), 0.0625, %v1407_v4 }
 0x480   : > { %v1219_v26 = vadd.f32 %v1148_v62, %v898_v59  ;;  %v1440_v59 = vmul.f32 (!%p1664_p5), 0.0625, %v1408_v46  ;;  %v1381_v62 = vld [vmem:[%s2371_s8 + $0x70] sm:$0xff] (!%p1664_p5)  ;;  %v1420_v44 = vadd.f32 (!%p1664_p5), %v3126_v34, %v1380_v61  ;;  %v1386_v29 = vld [vmem:[%s2371_s8 + $0x98] sm:$0xff] (!%p1664_p5) }
 0x481   : > { %1252 = vst [vmem:[%s2371_s8 + $0xb8] sm:$0xff] %v1220_v39  ;;  %v1442_v39 = vmul.f32 (!%p1664_p5), 0.0625, %v1410_v30  ;;  %1471 = vst [vmem:[%s2371_s8] sm:$0xff] (!%p1664_p5), %v1439_v38  ;;  %v1426_v15 = vadd.f32 (!%p1664_p5), %v3126_v34, %v1386_v29 }
 0x482   : > { %1251 = vst [vmem:[%s2371_s8 + $0xb0] sm:$0xff] %v1219_v26  ;;  %v1786_v13 = vpop.f32.mrb[24].mxu1  ;;  %v1443_v26 = vmul.f32 (!%p1664_p5), 0.0625, %v1411_v36  ;;  %1472 = vst [vmem:[%s2371_s8 + $0x8] sm:$0xff] (!%p1664_p5), %v1440_v59 }
 0x483   : > { %v1222_v22 = vadd.f32 %v1786_v13, %v901_v19  ;;  %v1158_v25 = vpop.f32.mrb[25].mxu1  ;;  %v1444_v19 = vmul.f32 (!%p1664_p5), 0.0625, %v1412_v20  ;;  %v1445_v13 = vmul.f32 (!%p1664_p5), 0.0625, %v1413_v1  ;;  %1474 = vst [vmem:[%s2371_s8 + $0x18] sm:$0xff] (!%p1664_p5), %v1442_v39  ;;  %v1458_v30 = vmul.f32 (!%p1664_p5), 0.0625, %v1426_v15 }
 0x484   : > { %v1221_v24 = vadd.f32 %v1158_v25, %v900_v52  ;;  %v1446_v52 = vmul.f32 (!%p1664_p5), 0.0625, %v1414_v49  ;;  %v1417_v25 = vadd.f32 (!%p1664_p5), %v3126_v34, %v1377_v42  ;;  %1475 = vst [vmem:[%s2371_s8 + $0x20] sm:$0xff] (!%p1664_p5), %v1443_v26 }
 0x485   : > { %1254 = vst [vmem:[%s2371_s8 + $0xc8] sm:$0xff] %v1222_v22  ;;  %v1416_v22 = vadd.f32 (!%p1664_p5), %v3126_v34, %v1376_v23  ;;  %1476 = vst [vmem:[%s2371_s8 + $0x28] sm:$0xff] (!%p1664_p5), %v1444_v19 }
 0x486   : > { %1253 = vst [vmem:[%s2371_s8 + $0xc0] sm:$0xff] %v1221_v24  ;;  %v1789_v40 = vpop.f32.mrb[26].mxu1  ;;  %v1383_v24 = vld [vmem:[%s2371_s8 + $0x80] sm:$0xff] (!%p1664_p5)  ;;  %1477 = vst [vmem:[%s2371_s8 + $0x30] sm:$0xff] (!%p1664_p5), %v1445_v13  ;;  %v1449_v11 = vmul.f32 (!%p1664_p5), 0.0625, %v1417_v25 }
 0x487   : > { %v1224_v18 = vadd.f32 %v1789_v40, %v903_v5  ;;  %v1168_v10 = vpop.f32.mrb[27].mxu1  ;;  %v1384_v5 = vld [vmem:[%s2371_s8 + $0x88] sm:$0xff] (!%p1664_p5)  ;;  %v1385_v40 = vld [vmem:[%s2371_s8 + $0x90] sm:$0xff] (!%p1664_p5)  ;;  %1478 = vst [vmem:[%s2371_s8 + $0x38] sm:$0xff] (!%p1664_p5), %v1446_v52  ;;  %1490 = vst [vmem:[%s2371_s8 + $0x98] sm:$0xff] (!%p1664_p5), %v1458_v30 }
 0x488   : > { %v1223_v28 = vadd.f32 %v1168_v10, %v902_v14  ;;  %v1419_v14 = vadd.f32 (!%p1664_p5), %v3126_v34, %v1379_v21  ;;  %v1422_v10 = vadd.f32 (!%p1664_p5), %v3126_v34, %v1382_v63  ;;  %v1390_v12 = vld [vmem:[%s2371_s8 + $0xb8] sm:$0xff] (!%p1664_p5)  ;;  %1481 = vst [vmem:[%s2371_s8 + $0x50] sm:$0xff] (!%p1664_p5), %v1449_v11 }
 0x489   : > { %1256 = vst [vmem:[%s2371_s8 + $0xd8] sm:$0xff] %v1224_v18  ;;  %v1421_v18 = vadd.f32 (!%p1664_p5), %v3126_v34, %v1381_v62  ;;  %v1430_v57 = vadd.f32 (!%p1664_p5), %v3126_v34, %v1390_v12  ;;  %v1503_v62 = vld [vmem:[%s2376_s12] sm:$0x3] (!%p1664_p5) }
 0x48a   : > { %1255 = vst [vmem:[%s2371_s8 + $0xd0] sm:$0xff] %v1223_v28  ;;  %v1792_v45 = vpop.f32.mrb[28].mxu1  ;;  %v1387_v28 = vld [vmem:[%s2371_s8 + $0xa0] sm:$0xff] (!%p1664_p5) }
 0x48b   : > { %v1226_v31 = vadd.f32 %v1792_v45, %v905_v48  ;;  %v1178_v50 = vpop.f32.mrb[29].mxu1  ;;  %v1388_v48 = vld [vmem:[%s2371_s8 + $0xa8] sm:$0xff] (!%p1664_p5)  ;;  %v1447_v45 = vmul.f32 (!%p1664_p5), 0.0625, %v1415_v60  ;;  %v1427_v33 = vadd.f32 (!%p1664_p5), %v3126_v34, %v1387_v28  ;;  %v1462_v1 = vmul.f32 (!%p1664_p5), 0.0625, %v1430_v57 }
 0x48c   : > { %v1225_v8 = vadd.f32 %v1178_v50, %v904_v32  ;;  %1366 = sbr.rel (%p1664_p5) target bundleno = 1183 (0x49f), region = 48  ;;  %v1448_v32 = vmul.f32 (!%p1664_p5), 0.0625, %v1416_v22  ;;  %v1389_v50 = vld [vmem:[%s2371_s8 + $0xb0] sm:$0xff] (!%p1664_p5)  ;;  %v1392_v35 = vld [vmem:[%s2371_s8 + $0xc8] sm:$0xff] (!%p1664_p5)  ;;  %v1428_v58 = vadd.f32 (!%p1664_p5), %v3126_v34, %v1388_v48 }
 0x48d   : > { %1258 = vst [vmem:[%s2371_s8 + $0xe8] sm:$0xff] %v1226_v31  ;;  %v1450_v31 = vmul.f32 (!%p1664_p5), 0.0625, %v1418_v41  ;;  %1479 = vst [vmem:[%s2371_s8 + $0x40] sm:$0xff] (!%p1664_p5), %v1447_v45  ;;  %v1391_v9 = vld [vmem:[%s2371_s8 + $0xc0] sm:$0xff] (!%p1664_p5)  ;;  %v1429_v3 = vadd.f32 (!%p1664_p5), %v3126_v34, %v1389_v50  ;;  %v1459_v42 = vmul.f32 (!%p1664_p5), 0.0625, %v1427_v33  ;;  %v1432_v56 = vadd.f32 (!%p1664_p5), %v3126_v34, %v1392_v35 }
 0x48e   : > { %1257 = vst [vmem:[%s2371_s8 + $0xe0] sm:$0xff] %v1225_v8  ;;  %v1795_v43 = vpop.f32.mrb[30].mxu1  ;;  %v1451_v8 = vmul.f32 (!%p1664_p5), 0.0625, %v1419_v14  ;;  %1480 = vst [vmem:[%s2371_s8 + $0x48] sm:$0xff] (!%p1664_p5), %v1448_v32  ;;  %v1460_v36 = vmul.f32 (!%p1664_p5), 0.0625, %v1428_v58  ;;  %v1431_v49 = vadd.f32 (!%p1664_p5), %v3126_v34, %v1391_v9 }
 0x48f   : > { %v1228_v17 = vadd.f32 %v1795_v43, %v907_v55  ;;  %v1188_v53 = vpop.f32.mrb[31].mxu1  ;;  %v1452_v55 = vmul.f32 (!%p1664_p5), 0.0625, %v1420_v44  ;;  %v1453_v43 = vmul.f32 (!%p1664_p5), 0.0625, %v1421_v18  ;;  %1482 = vst [vmem:[%s2371_s8 + $0x58] sm:$0xff] (!%p1664_p5), %v1450_v31  ;;  %v1461_v20 = vmul.f32 (!%p1664_p5), 0.0625, %v1429_v3  ;;  %1491 = vst [vmem:[%s2371_s8 + $0xa0] sm:$0xff] (!%p1664_p5), %v1459_v42 }
 0x490   : > { %v1227_v0 = vadd.f32 %v1188_v53, %v906_v47  ;;  %v1454_v47 = vmul.f32 (!%p1664_p5), 0.0625, %v1422_v10  ;;  %v1424_v53 = vadd.f32 (!%p1664_p5), %v3126_v34, %v1384_v5  ;;  %1483 = vst [vmem:[%s2371_s8 + $0x60] sm:$0xff] (!%p1664_p5), %v1451_v8  ;;  %v1394_v27 = vld [vmem:[%s2371_s8 + $0xd8] sm:$0xff] (!%p1664_p5)  ;;  %1492 = vst [vmem:[%s2371_s8 + $0xa8] sm:$0xff] (!%p1664_p5), %v1460_v36  ;;  %v1463_v63 = vmul.f32 (!%p1664_p5), 0.0625, %v1431_v49 }
 0x491   : > { %1260 = vst [vmem:[%s2371_s8 + $0xf8] sm:$0xff] %v1228_v17  ;;  %v1423_v17 = vadd.f32 (!%p1664_p5), %v3126_v34, %v1383_v24  ;;  %v1393_v16 = vld [vmem:[%s2371_s8 + $0xd0] sm:$0xff] (!%p1664_p5)  ;;  %1484 = vst [vmem:[%s2371_s8 + $0x68] sm:$0xff] (!%p1664_p5), %v1452_v55  ;;  %v1434_v61 = vadd.f32 (!%p1664_p5), %v3126_v34, %v1394_v27  ;;  %v1464_v26 = vmul.f32 (!%p1664_p5), 0.0625, %v1432_v56  ;;  %v1504_v41 = vadd.f32 (!%p1664_p5), 0.0256, %v1503_v62 }
 0x492   : > { %1259 = vst [vmem:[%s2371_s8 + $0xf0] sm:$0xff] %v1227_v0  ;;  %v1425_v0 = vadd.f32 (!%p1664_p5), %v3126_v34, %v1385_v40  ;;  %1485 = vst [vmem:[%s2371_s8 + $0x70] sm:$0xff] (!%p1664_p5), %v1453_v43  ;;  %v1456_v46 = vmul.f32 (!%p1664_p5), 0.0625, %v1424_v53  ;;  %v1433_v21 = vadd.f32 (!%p1664_p5), %v3126_v34, %v1393_v16 }
 0x493   : > { %1486 = vst [vmem:[%s2371_s8 + $0x78] sm:$0xff] %v1454_v47  ;;  %v1455_v4 = vmul.f32 0.0625, %v1423_v17  ;;  %1493 = vst [vmem:[%s2371_s8 + $0xb0] sm:$0xff] %v1461_v20  ;;  %v1466_v13 = vmul.f32 0.0625, %v1434_v61 }
 0x494   : > { %v1396_v6 = vld [vmem:[%s2371_s8 + $0xe8] sm:$0xff]  ;;  %v1457_v2 = vmul.f32 0.0625, %v1425_v0  ;;  %1488 = vst [vmem:[%s2371_s8 + $0x88] sm:$0xff] %v1456_v46  ;;  %1494 = vst [vmem:[%s2371_s8 + $0xb8] sm:$0xff] %v1462_v1  ;;  %v1465_v19 = vmul.f32 0.0625, %v1433_v21 }
 0x495   : > { %v1395_v54 = vld [vmem:[%s2371_s8 + $0xe0] sm:$0xff]  ;;  %1487 = vst [vmem:[%s2371_s8 + $0x80] sm:$0xff] %v1455_v4  ;;  %v1436_v59 = vadd.f32 %v3126_v34, %v1396_v6  ;;  %1495 = vst [vmem:[%s2371_s8 + $0xc0] sm:$0xff] %v1463_v63 }
 0x496   : > { %1489 = vst [vmem:[%s2371_s8 + $0x90] sm:$0xff] %v1457_v2  ;;  %v1435_v38 = vadd.f32 %v3126_v34, %v1395_v54  ;;  %1496 = vst [vmem:[%s2371_s8 + $0xc8] sm:$0xff] %v1464_v26 }
 0x497   : > { %v1468_v60 = vmul.f32 0.0625, %v1436_v59  ;;  %1497 = vst [vmem:[%s2371_s8 + $0xd0] sm:$0xff] %v1465_v19  ;;  %1498 = vst [vmem:[%s2371_s8 + $0xd8] sm:$0xff] %v1466_v13 }
 0x498   : > { %v1398_v23 = vld [vmem:[%s2371_s8 + $0xf8] sm:$0xff]  ;;  %v1467_v52 = vmul.f32 0.0625, %v1435_v38 }
 0x499   : > { %v1397_v7 = vld [vmem:[%s2371_s8 + $0xf0] sm:$0xff]  ;;  %v1438_v39 = vadd.f32 %v3126_v34, %v1398_v23  ;;  %1500 = vst [vmem:[%s2371_s8 + $0xe8] sm:$0xff] %v1468_v60 }
 0x49a   : > { %v1437_v37 = vadd.f32 %v3126_v34, %v1397_v7  ;;  %1499 = vst [vmem:[%s2371_s8 + $0xe0] sm:$0xff] %v1467_v52  ;;  %v1505_v34 = vmul.f32 0.0625, %v1504_v41 }
 0x49b   : > { %v1470_v25 = vmul.f32 0.0625, %v1438_v39 }
 0x49c   : > { %v1469_v22 = vmul.f32 0.0625, %v1437_v37  ;;  %1506 = vst.msk [vmem:[%s2376_s12] sm:$0x3] %vm3014_vm3, %v1505_v34 }
 0x49d   : > { %1502 = vst [vmem:[%s2371_s8 + $0xf8] sm:$0xff] %v1470_v25 }
 0x49e   : > { %1501 = vst [vmem:[%s2371_s8 + $0xf0] sm:$0xff] %v1469_v22 }
 0x49f PF: > { %s21_s22 = sadd.s32 1, %s2141_s22   ;;  %s3312_s15 = smov %s2117_s16 }
 0x4a0   : > { %p18_p9 = scmp.ge.s32.totalorder %s21_s22, 18   ;;  %s3313_s16 = smov %s2121_s17 }
 0x4a1   : > { %s3314_s17 = smov %s2247_s9  ;;  %s3315_s18 = smov %s2133_s20 }
 0x4a2   : > { %s3316_s19 = smov %s2137_s21  ;;  %s3317_s20 = smov %s3320_s24 }
 0x4a3   : > { %s3318_s21 = smov %s3324_s25  ;;  %20 = sbr.rel (!%p18_p9) target bundleno = 9 (0x9), region = 105 }
 0x4aa   :  { %1542 = vsyncpa [#allocation5], 1 }
 0x4ab   :  { %1544 = vsyncpa [#allocation5 + $0x1], 1 }
 0x4ac   :  { %1545 = vsyncpa [#allocation7], 1 }
 0x4ad   :  { %1547 = vsyncpa [#allocation7 + $0x1], 1 }

</bundles_post_ra>
